<compile_context>
chip_gen: v7x
topology: tpu7x:2x2x1
jax: 0.10.0
libtpu: 0.0.40
codegen_flags: <defaults>
</compile_context>

<pallas_src>
import functools
import math

import jax
import jax.numpy as jnp
from jax.experimental import pallas as pl
from jax.experimental.pallas import tpu as pltpu

# ----------------------------- model constants -----------------------------
INPUT_SIZE = 1
HIDDEN = 32                       # hidden_size (small-shape version of 128)
NUM_LAYERS = 2
E = 2 * HIDDEN                    # lstm_output_size (bidirectional)
NUM_HEADS = 8
HEAD_DIM = E // NUM_HEADS
FEAT1 = HIDDEN
FEAT2 = HIDDEN // 2
LN_EPS = 1e-5
NEG_INF = -1e30


# ------------------------------ fused kernel -------------------------------
def _fused_forward_kernel(
    x_ref,                                          # (T*B8, 1) time-major, row = t*B8 + b
    wih0f_ref, wih0b_ref, b0f_ref, b0b_ref,         # layer 0 input proj: (1,4H) each
    whh0f_ref, whh0b_ref,                           # layer 0 recurrent: (H,4H) per dir
    wih1f_ref, wih1b_ref, b1f_ref, b1b_ref,         # layer 1 input proj: (E,4H), (1,4H)
    whh1f_ref, whh1b_ref,                           # layer 1 recurrent: (H,4H)
    lng_ref, lnb_ref,                               # LayerNorm gamma/beta (1, E)
    wq_ref, bq_ref, wkv_ref, bkv_ref, wo_ref, bo_ref,   # attention projections
    w1_ref, bf1_ref, w2_ref, bf2_ref, wh_ref, bh_ref,   # MLP + stacked heads
    o_ref,                                          # (B8, 4) output
    out0_ref, out1_ref,                             # scratch: per-layer LSTM out (T*B8, E)
    *, B8, T):
    H = HIDDEN

    def bilstm(pf, pb, whh_f, whh_b, out_scr):
        """pf/pb: (T*B8, 4H) per-direction preacts (biases folded), gate cols [i f o g].
        whh_f/whh_b: (H, 4H). Writes (T*B8, 2H) into out_scr and returns it."""
        h_f = jnp.zeros((B8, H), jnp.float32)
        c_f = jnp.zeros((B8, H), jnp.float32)
        h_b = jnp.zeros((B8, H), jnp.float32)
        c_b = jnp.zeros((B8, H), jnp.float32)
        for it in range(T):                          # static unroll (T is small)
            tb = T - 1 - it                          # backward-direction time index
            gf = pf[it * B8:(it + 1) * B8, :] + jnp.dot(
                h_f, whh_f, preferred_element_type=jnp.float32)
            gb = pb[tb * B8:(tb + 1) * B8, :] + jnp.dot(
                h_b, whh_b, preferred_element_type=jnp.float32)
            # sigmoid over the contiguous [i f o] block, tanh only over g
            sf = jax.nn.sigmoid(gf[:, 0:3 * H])
            sb = jax.nn.sigmoid(gb[:, 0:3 * H])
            gtf = jnp.tanh(gf[:, 3 * H:4 * H])
            gtb = jnp.tanh(gb[:, 3 * H:4 * H])
            c_f = sf[:, H:2 * H] * c_f + sf[:, 0:H] * gtf
            c_b = sb[:, H:2 * H] * c_b + sb[:, 0:H] * gtb
            h_f = sf[:, 2 * H:3 * H] * jnp.tanh(c_f)
            h_b = sb[:, 2 * H:3 * H] * jnp.tanh(c_b)
            # per-step stores: nothing stays live across the unroll
            out_scr[it * B8:(it + 1) * B8, 0:H] = h_f
            out_scr[tb * B8:(tb + 1) * B8, H:2 * H] = h_b
        return out_scr[...]                          # (T*B8, 2H)

    # ---- LSTM layer 0: K=1 input projection as a broadcast multiply (VPU) ----
    x_col = x_ref[...]                               # (T*B8, 1)
    p0f = x_col * wih0f_ref[...] + b0f_ref[...]      # (T*B8, 4H)
    p0b = x_col * wih0b_ref[...] + b0b_ref[...]
    y0 = bilstm(p0f, p0b, whh0f_ref[...], whh0b_ref[...], out0_ref)

    # ---- LSTM layer 1: hoisted per-direction input projections ----
    p1f = jnp.dot(y0, wih1f_ref[...], preferred_element_type=jnp.float32) + b1f_ref[...]
    p1b = jnp.dot(y0, wih1b_ref[...], preferred_element_type=jnp.float32) + b1b_ref[...]
    y1 = bilstm(p1f, p1b, whh1f_ref[...], whh1b_ref[...], out1_ref)   # (T*B8, E)

    # ---- LayerNorm (row-wise) ----
    mean = jnp.mean(y1, axis=-1, keepdims=True)
    var = jnp.mean(jnp.square(y1 - mean), axis=-1, keepdims=True)
    ln = (y1 - mean) * jax.lax.rsqrt(var + LN_EPS) * lng_ref[...] + lnb_ref[...]

    # ---- multihead self-attention, last-timestep query only ----
    ln_last = ln[(T - 1) * B8:T * B8, :]             # (B8, E)
    q = jnp.dot(ln_last, wq_ref[...], preferred_element_type=jnp.float32) + bq_ref[...]
    kv = jnp.dot(ln, wkv_ref[...], preferred_element_type=jnp.float32) + bkv_ref[...]
    k = kv[:, 0:E]                                   # (T*B8, E)
    v = kv[:, E:2 * E]                               # (T*B8, E)

    # head-major slabs (NH leading batch dim), then two batched dot_generals
    q3 = jnp.stack([q[:, h * HEAD_DIM:(h + 1) * HEAD_DIM]
                    for h in range(NUM_HEADS)], axis=0)      # (NH, B8, HD)
    k3 = jnp.stack([k[:, h * HEAD_DIM:(h + 1) * HEAD_DIM]
                    for h in range(NUM_HEADS)], axis=0)      # (NH, T*B8, HD)
    v3 = jnp.stack([v[:, h * HEAD_DIM:(h + 1) * HEAD_DIM]
                    for h in range(NUM_HEADS)], axis=0)      # (NH, T*B8, HD)

    # key row r belongs to batch r % B8; mask cross-batch keys additively
    col = jax.lax.broadcasted_iota(jnp.int32, (B8, T * B8), 1)
    row = jax.lax.broadcasted_iota(jnp.int32, (B8, T * B8), 0)
    neg = jnp.where(col % B8 == row, 0.0, NEG_INF)           # (B8, T*B8)

    scale = 1.0 / math.sqrt(HEAD_DIM)
    s = jax.lax.dot_general(q3, k3, (((2,), (2,)), ((0,), (0,))),
                            preferred_element_type=jnp.float32) * scale + neg[None, :, :]
    s = s - jnp.max(s, axis=-1, keepdims=True)
    p = jnp.exp(s)
    p = p / jnp.sum(p, axis=-1, keepdims=True)               # (NH, B8, T*B8)
    o3 = jax.lax.dot_general(p, v3, (((2,), (1,)), ((0,), (0,))),
                             preferred_element_type=jnp.float32)    # (NH, B8, HD)
    attn = jnp.concatenate([o3[h] for h in range(NUM_HEADS)], axis=1)   # (B8, E)
    proj = jnp.dot(attn, wo_ref[...], preferred_element_type=jnp.float32) + bo_ref[...]
    combined = ln_last + proj                        # residual on post-LN lstm_out

    # ---- feature extractor MLP + 4 heads (eval mode: dropout is a no-op) ----
    f1 = jnp.maximum(jnp.dot(combined, w1_ref[...],
                             preferred_element_type=jnp.float32) + bf1_ref[...], 0.0)
    f2 = jnp.maximum(jnp.dot(f1, w2_ref[...],
                             preferred_element_type=jnp.float32) + bf2_ref[...], 0.0)
    raw = jnp.dot(f2, wh_ref[...], preferred_element_type=jnp.float32) + bh_ref[...]
    colh = jax.lax.broadcasted_iota(jnp.int32, raw.shape, 1)
    # column 0 = value (linear); 1..3 = probability/confidence/crash_risk (sigmoid)
    o_ref[...] = jnp.where(colh == 0, raw, jax.nn.sigmoid(raw))
    # TODO(synk): training-mode dropout (LSTM inter-layer, attention, MLP) is omitted —
    # this is the eval() forward pass.


# --------------------------------- forward ----------------------------------
def jetx_lstm_forward(x, params):
    """x: (B, T, INPUT_SIZE) float32 -> dict of (B, 1) outputs (eval-mode forward)."""
    B, T, d_in = x.shape
    assert d_in == INPUT_SIZE
    B8 = max(8, ((B + 7) // 8) * 8)                  # pad batch to the 8-sublane tile
    # time-major layout: row = t*B8 + b; padded batch rows are zeros (isolated by
    # the cross-batch attention mask and sliced off at the end).
    x_tm = jnp.transpose(x, (1, 0, 2))               # (T, B, 1)
    x_tm = jnp.pad(x_tm, ((0, 0), (0, B8 - B), (0, 0))).reshape(T * B8, d_in)

    out4 = pl.pallas_call(
        functools.partial(_fused_forward_kernel, B8=B8, T=T),
        out_shape=jax.ShapeDtypeStruct((B8, 4), jnp.float32),
        scratch_shapes=[pltpu.VMEM((T * B8, E), jnp.float32),
                        pltpu.VMEM((T * B8, E), jnp.float32)],
    )(x_tm,
      params["wih0f"], params["wih0b"], params["b0f"], params["b0b"],
      params["whh0f"], params["whh0b"],
      params["wih1f"], params["wih1b"], params["b1f"], params["b1b"],
      params["whh1f"], params["whh1b"],
      params["ln_gamma"], params["ln_beta"],
      params["wq"], params["bq"], params["wkv"], params["bkv"],
      params["wo"], params["bo"],
      params["w1"], params["bf1"], params["w2"], params["bf2"],
      params["wh"], params["bh"])

    out4 = out4[:B]
    return {
        "value": out4[:, 0:1],
        "probability": out4[:, 1:2],
        "confidence": out4[:, 2:3],
        "crash_risk": out4[:, 3:4],
    }


# --------------------------- deterministic params ---------------------------
def init_params(key):
    kit = iter(jax.random.split(key, 64))

    def u(shape, scale):
        return jax.random.uniform(next(kit), shape, jnp.float32, -scale, scale)

    def reorder_gates(w_t):
        # columns in PyTorch order [i f g o] -> kernel order [i f o g]
        return jnp.concatenate([w_t[:, 0:2 * HIDDEN],
                                w_t[:, 3 * HIDDEN:4 * HIDDEN],
                                w_t[:, 2 * HIDDEN:3 * HIDDEN]], axis=1)

    params = {}
    ls = 1.0 / math.sqrt(HIDDEN)
    for layer in range(NUM_LAYERS):
        d_in = INPUT_SIZE if layer == 0 else E
        for tag in ("f", "b"):                       # forward / backward direction
            w_ih = u((4 * HIDDEN, d_in), ls)         # PyTorch layout (4H, D), rows i,f,g,o
            w_hh = u((4 * HIDDEN, HIDDEN), ls)
            b_ih = u((4 * HIDDEN,), ls)
            b_hh = u((4 * HIDDEN,), ls)
            params[f"wih{layer}{tag}"] = reorder_gates(w_ih.T)                # (D, 4H)
            params[f"whh{layer}{tag}"] = reorder_gates(w_hh.T)                # (H, 4H)
            params[f"b{layer}{tag}"] = reorder_gates(
                (b_ih + b_hh).reshape(1, 4 * HIDDEN))                         # (1, 4H)

    params["ln_gamma"] = jnp.ones((1, E), jnp.float32)    # nn.LayerNorm default init
    params["ln_beta"] = jnp.zeros((1, E), jnp.float32)

    a_s = 1.0 / math.sqrt(E)
    w_in = u((3 * E, E), a_s)                             # in_proj_weight (3E, E)
    b_in = u((3 * E,), a_s)
    params["wq"] = w_in[0:E].T                            # (E, E)
    params["bq"] = b_in[0:E].reshape(1, E)
    params["wkv"] = w_in[E:3 * E].T                       # (E, 2E) -> 128-lane K/V slab
    params["bkv"] = b_in[E:3 * E].reshape(1, 2 * E)
    params["wo"] = u((E, E), a_s).T
    params["bo"] = u((E,), a_s).reshape(1, E)

    s1 = 1.0 / math.sqrt(E)
    s2 = 1.0 / math.sqrt(FEAT1)
    sh = 1.0 / math.sqrt(FEAT2)
    params["w1"] = u((FEAT1, E), s1).T
    params["bf1"] = u((FEAT1,), s1).reshape(1, FEAT1)
    params["w2"] = u((FEAT2, FEAT1), s2).T
    params["bf2"] = u((FEAT2,), s2).reshape(1, FEAT2)
    wv, wp, wc, wr = (u((1, FEAT2), sh) for _ in range(4))
    bv, bp, bc, br = (u((1,), sh) for _ in range(4))
    params["wh"] = jnp.concatenate([wv, wp, wc, wr], axis=0).T    # (FEAT2, 4)
    params["bh"] = jnp.concatenate([bv, bp, bc, br]).reshape(1, 4)
    return params


if __name__ == "__main__":
    key = jax.random.PRNGKey(0)
    pkey, xkey = jax.random.split(key)
    params = init_params(pkey)

    B, T = 2, 8
    x = jax.random.normal(xkey, (B, T, INPUT_SIZE), jnp.float32)

    fwd = jax.jit(lambda inp: jetx_lstm_forward(inp, params))
    out = jax.block_until_ready(fwd(x))

    assert out["value"].shape == (B, 1)
    assert out["probability"].shape == (B, 1)
    assert out["confidence"].shape == (B, 1)
    assert out["crash_risk"].shape == (B, 1)
    for k_, v_ in out.items():
        assert bool(jnp.all(jnp.isfinite(v_))), k_
    print("KERNEL_OK")
</pallas_src>

<mosaic_0001>
module attributes {stable_mosaic.version = 11 : i64} {
  func.func @_fused_forward_kernel(%arg0: memref<64x1xf32, #tpu.memory_space<vmem>>, %arg1: memref<1x128xf32, #tpu.memory_space<vmem>>, %arg2: memref<1x128xf32, #tpu.memory_space<vmem>>, %arg3: memref<1x128xf32, #tpu.memory_space<vmem>>, %arg4: memref<1x128xf32, #tpu.memory_space<vmem>>, %arg5: memref<32x128xf32, #tpu.memory_space<vmem>>, %arg6: memref<32x128xf32, #tpu.memory_space<vmem>>, %arg7: memref<64x128xf32, #tpu.memory_space<vmem>>, %arg8: memref<64x128xf32, #tpu.memory_space<vmem>>, %arg9: memref<1x128xf32, #tpu.memory_space<vmem>>, %arg10: memref<1x128xf32, #tpu.memory_space<vmem>>, %arg11: memref<32x128xf32, #tpu.memory_space<vmem>>, %arg12: memref<32x128xf32, #tpu.memory_space<vmem>>, %arg13: memref<1x64xf32, #tpu.memory_space<vmem>>, %arg14: memref<1x64xf32, #tpu.memory_space<vmem>>, %arg15: memref<64x64xf32, #tpu.memory_space<vmem>>, %arg16: memref<1x64xf32, #tpu.memory_space<vmem>>, %arg17: memref<64x128xf32, #tpu.memory_space<vmem>>, %arg18: memref<1x128xf32, #tpu.memory_space<vmem>>, %arg19: memref<64x64xf32, #tpu.memory_space<vmem>>, %arg20: memref<1x64xf32, #tpu.memory_space<vmem>>, %arg21: memref<64x32xf32, #tpu.memory_space<vmem>>, %arg22: memref<1x32xf32, #tpu.memory_space<vmem>>, %arg23: memref<32x16xf32, #tpu.memory_space<vmem>>, %arg24: memref<1x16xf32, #tpu.memory_space<vmem>>, %arg25: memref<16x4xf32, #tpu.memory_space<vmem>>, %arg26: memref<1x4xf32, #tpu.memory_space<vmem>>, %arg27: memref<8x4xf32, #tpu.memory_space<vmem>>, %arg28: memref<64x64xf32, #tpu.memory_space<vmem>>, %arg29: memref<64x64xf32, #tpu.memory_space<vmem>>) attributes {dimension_semantics = [], scalar_prefetch = 0 : i64, scratch_operands = 2 : i64, tpu.core_type = #tpu.core_type<tc>} {
    %c0 = arith.constant 0 : index
    %c0_0 = arith.constant 0 : index
    %0 = vector.load %arg0[%c0, %c0_0] : memref<64x1xf32, #tpu.memory_space<vmem>>, vector<64x1xf32>
    %c0_1 = arith.constant 0 : index
    %c0_2 = arith.constant 0 : index
    %1 = vector.load %arg1[%c0_1, %c0_2] : memref<1x128xf32, #tpu.memory_space<vmem>>, vector<1x128xf32>
    %2 = vector.broadcast %0 : vector<64x1xf32> to vector<64x128xf32>
    %3 = vector.broadcast %1 : vector<1x128xf32> to vector<64x128xf32>
    %4 = arith.mulf %2, %3 : vector<64x128xf32>
    %c0_3 = arith.constant 0 : index
    %c0_4 = arith.constant 0 : index
    %5 = vector.load %arg3[%c0_3, %c0_4] : memref<1x128xf32, #tpu.memory_space<vmem>>, vector<1x128xf32>
    %6 = vector.broadcast %5 : vector<1x128xf32> to vector<64x128xf32>
    %7 = arith.addf %4, %6 : vector<64x128xf32>
    %c0_5 = arith.constant 0 : index
    %c0_6 = arith.constant 0 : index
    %8 = vector.load %arg2[%c0_5, %c0_6] : memref<1x128xf32, #tpu.memory_space<vmem>>, vector<1x128xf32>
    %9 = vector.broadcast %0 : vector<64x1xf32> to vector<64x128xf32>
    %10 = vector.broadcast %8 : vector<1x128xf32> to vector<64x128xf32>
    %11 = arith.mulf %9, %10 : vector<64x128xf32>
    %c0_7 = arith.constant 0 : index
    %c0_8 = arith.constant 0 : index
    %12 = vector.load %arg4[%c0_7, %c0_8] : memref<1x128xf32, #tpu.memory_space<vmem>>, vector<1x128xf32>
    %13 = vector.broadcast %12 : vector<1x128xf32> to vector<64x128xf32>
    %14 = arith.addf %11, %13 : vector<64x128xf32>
    %c0_9 = arith.constant 0 : index
    %c0_10 = arith.constant 0 : index
    %15 = vector.load %arg5[%c0_9, %c0_10] : memref<32x128xf32, #tpu.memory_space<vmem>>, vector<32x128xf32>
    %c0_11 = arith.constant 0 : index
    %c0_12 = arith.constant 0 : index
    %16 = vector.load %arg6[%c0_11, %c0_12] : memref<32x128xf32, #tpu.memory_space<vmem>>, vector<32x128xf32>
    %cst = arith.constant 0.000000e+00 : f32
    %17 = vector.broadcast %cst : f32 to vector<8x32xf32>
    %cst_13 = arith.constant 0.000000e+00 : f32
    %18 = vector.broadcast %cst_13 : f32 to vector<8x32xf32>
    %cst_14 = arith.constant 0.000000e+00 : f32
    %19 = vector.broadcast %cst_14 : f32 to vector<8x32xf32>
    %cst_15 = arith.constant 0.000000e+00 : f32
    %20 = vector.broadcast %cst_15 : f32 to vector<8x32xf32>
    %21 = vector.extract_strided_slice %7 {offsets = [0, 0], sizes = [8, 128], strides = [1, 1]} : vector<64x128xf32> to vector<8x128xf32>
    %cst_16 = arith.constant dense<0.000000e+00> : vector<8x128xf32>
    %22 = tpu.matmul %17, %15, %cst_16 {dimension_numbers = #tpu.dot_dimension_numbers<[1], [0], [0], [1], [0, 0, 1, 1], [], []>} : vector<8x32xf32>, vector<32x128xf32>, vector<8x128xf32> -> vector<8x128xf32>
    %23 = arith.addf %21, %22 : vector<8x128xf32>
    %24 = vector.extract_strided_slice %14 {offsets = [56, 0], sizes = [8, 128], strides = [1, 1]} : vector<64x128xf32> to vector<8x128xf32>
    %cst_17 = arith.constant dense<0.000000e+00> : vector<8x128xf32>
    %25 = tpu.matmul %19, %16, %cst_17 {dimension_numbers = #tpu.dot_dimension_numbers<[1], [0], [0], [1], [0, 0, 1, 1], [], []>} : vector<8x32xf32>, vector<32x128xf32>, vector<8x128xf32> -> vector<8x128xf32>
    %26 = arith.addf %24, %25 : vector<8x128xf32>
    %27 = vector.extract_strided_slice %23 {offsets = [0, 0], sizes = [8, 96], strides = [1, 1]} : vector<8x128xf32> to vector<8x96xf32>
    %28 = arith.negf %27 : vector<8x96xf32>
    %29 = math.exp %28 : vector<8x96xf32>
    %cst_18 = arith.constant 1.000000e+00 : f32
    %30 = vector.broadcast %cst_18 : f32 to vector<8x96xf32>
    %31 = arith.addf %30, %29 : vector<8x96xf32>
    %32 = arith.divf %30, %31 : vector<8x96xf32>
    %33 = vector.extract_strided_slice %26 {offsets = [0, 0], sizes = [8, 96], strides = [1, 1]} : vector<8x128xf32> to vector<8x96xf32>
    %34 = arith.negf %33 : vector<8x96xf32>
    %35 = math.exp %34 : vector<8x96xf32>
    %cst_19 = arith.constant 1.000000e+00 : f32
    %36 = vector.broadcast %cst_19 : f32 to vector<8x96xf32>
    %37 = arith.addf %36, %35 : vector<8x96xf32>
    %38 = arith.divf %36, %37 : vector<8x96xf32>
    %39 = vector.extract_strided_slice %23 {offsets = [0, 96], sizes = [8, 32], strides = [1, 1]} : vector<8x128xf32> to vector<8x32xf32>
    %40 = math.tanh %39 : vector<8x32xf32>
    %41 = vector.extract_strided_slice %26 {offsets = [0, 96], sizes = [8, 32], strides = [1, 1]} : vector<8x128xf32> to vector<8x32xf32>
    %42 = math.tanh %41 : vector<8x32xf32>
    %43 = vector.extract_strided_slice %32 {offsets = [0, 32], sizes = [8, 32], strides = [1, 1]} : vector<8x96xf32> to vector<8x32xf32>
    %44 = arith.mulf %43, %18 : vector<8x32xf32>
    %45 = vector.extract_strided_slice %32 {offsets = [0, 0], sizes = [8, 32], strides = [1, 1]} : vector<8x96xf32> to vector<8x32xf32>
    %46 = arith.mulf %45, %40 : vector<8x32xf32>
    %47 = arith.addf %44, %46 : vector<8x32xf32>
    %48 = vector.extract_strided_slice %38 {offsets = [0, 32], sizes = [8, 32], strides = [1, 1]} : vector<8x96xf32> to vector<8x32xf32>
    %49 = arith.mulf %48, %20 : vector<8x32xf32>
    %50 = vector.extract_strided_slice %38 {offsets = [0, 0], sizes = [8, 32], strides = [1, 1]} : vector<8x96xf32> to vector<8x32xf32>
    %51 = arith.mulf %50, %42 : vector<8x32xf32>
    %52 = arith.addf %49, %51 : vector<8x32xf32>
    %53 = vector.extract_strided_slice %32 {offsets = [0, 64], sizes = [8, 32], strides = [1, 1]} : vector<8x96xf32> to vector<8x32xf32>
    %54 = math.tanh %47 : vector<8x32xf32>
    %55 = arith.mulf %53, %54 : vector<8x32xf32>
    %56 = vector.extract_strided_slice %38 {offsets = [0, 64], sizes = [8, 32], strides = [1, 1]} : vector<8x96xf32> to vector<8x32xf32>
    %57 = math.tanh %52 : vector<8x32xf32>
    %58 = arith.mulf %56, %57 : vector<8x32xf32>
    %c0_20 = arith.constant 0 : index
    %c0_21 = arith.constant 0 : index
    %59 = vector.load %arg28[%c0_20, %c0_21] : memref<64x64xf32, #tpu.memory_space<vmem>>, vector<8x32xf32>
    tpu.vector_store %arg28[%c0_20, %c0_21], %55 {strides = array<i32>} : memref<64x64xf32, #tpu.memory_space<vmem>>, vector<8x32xf32>,
    %c56 = arith.constant 56 : index
    %c32 = arith.constant 32 : index
    %60 = vector.load %arg28[%c56, %c32] : memref<64x64xf32, #tpu.memory_space<vmem>>, vector<8x32xf32>
    tpu.vector_store %arg28[%c56, %c32], %58 {strides = array<i32>} : memref<64x64xf32, #tpu.memory_space<vmem>>, vector<8x32xf32>,
    %61 = vector.extract_strided_slice %7 {offsets = [8, 0], sizes = [8, 128], strides = [1, 1]} : vector<64x128xf32> to vector<8x128xf32>
    %cst_22 = arith.constant dense<0.000000e+00> : vector<8x128xf32>
    %62 = tpu.matmul %55, %15, %cst_22 {dimension_numbers = #tpu.dot_dimension_numbers<[1], [0], [0], [1], [0, 0, 1, 1], [], []>} : vector<8x32xf32>, vector<32x128xf32>, vector<8x128xf32> -> vector<8x128xf32>
    %63 = arith.addf %61, %62 : vector<8x128xf32>
    %64 = vector.extract_strided_slice %14 {offsets = [48, 0], sizes = [8, 128], strides = [1, 1]} : vector<64x128xf32> to vector<8x128xf32>
    %cst_23 = arith.constant dense<0.000000e+00> : vector<8x128xf32>
    %65 = tpu.matmul %58, %16, %cst_23 {dimension_numbers = #tpu.dot_dimension_numbers<[1], [0], [0], [1], [0, 0, 1, 1], [], []>} : vector<8x32xf32>, vector<32x128xf32>, vector<8x128xf32> -> vector<8x128xf32>
    %66 = arith.addf %64, %65 : vector<8x128xf32>
    %67 = vector.extract_strided_slice %63 {offsets = [0, 0], sizes = [8, 96], strides = [1, 1]} : vector<8x128xf32> to vector<8x96xf32>
    %68 = arith.negf %67 : vector<8x96xf32>
    %69 = math.exp %68 : vector<8x96xf32>
    %cst_24 = arith.constant 1.000000e+00 : f32
    %70 = vector.broadcast %cst_24 : f32 to vector<8x96xf32>
    %71 = arith.addf %70, %69 : vector<8x96xf32>
    %72 = arith.divf %70, %71 : vector<8x96xf32>
    %73 = vector.extract_strided_slice %66 {offsets = [0, 0], sizes = [8, 96], strides = [1, 1]} : vector<8x128xf32> to vector<8x96xf32>
    %74 = arith.negf %73 : vector<8x96xf32>
    %75 = math.exp %74 : vector<8x96xf32>
    %cst_25 = arith.constant 1.000000e+00 : f32
    %76 = vector.broadcast %cst_25 : f32 to vector<8x96xf32>
    %77 = arith.addf %76, %75 : vector<8x96xf32>
    %78 = arith.divf %76, %77 : vector<8x96xf32>
    %79 = vector.extract_strided_slice %63 {offsets = [0, 96], sizes = [8, 32], strides = [1, 1]} : vector<8x128xf32> to vector<8x32xf32>
    %80 = math.tanh %79 : vector<8x32xf32>
    %81 = vector.extract_strided_slice %66 {offsets = [0, 96], sizes = [8, 32], strides = [1, 1]} : vector<8x128xf32> to vector<8x32xf32>
    %82 = math.tanh %81 : vector<8x32xf32>
    %83 = vector.extract_strided_slice %72 {offsets = [0, 32], sizes = [8, 32], strides = [1, 1]} : vector<8x96xf32> to vector<8x32xf32>
    %84 = arith.mulf %83, %47 : vector<8x32xf32>
    %85 = vector.extract_strided_slice %72 {offsets = [0, 0], sizes = [8, 32], strides = [1, 1]} : vector<8x96xf32> to vector<8x32xf32>
    %86 = arith.mulf %85, %80 : vector<8x32xf32>
    %87 = arith.addf %84, %86 : vector<8x32xf32>
    %88 = vector.extract_strided_slice %78 {offsets = [0, 32], sizes = [8, 32], strides = [1, 1]} : vector<8x96xf32> to vector<8x32xf32>
    %89 = arith.mulf %88, %52 : vector<8x32xf32>
    %90 = vector.extract_strided_slice %78 {offsets = [0, 0], sizes = [8, 32], strides = [1, 1]} : vector<8x96xf32> to vector<8x32xf32>
    %91 = arith.mulf %90, %82 : vector<8x32xf32>
    %92 = arith.addf %89, %91 : vector<8x32xf32>
    %93 = vector.extract_strided_slice %72 {offsets = [0, 64], sizes = [8, 32], strides = [1, 1]} : vector<8x96xf32> to vector<8x32xf32>
    %94 = math.tanh %87 : vector<8x32xf32>
    %95 = arith.mulf %93, %94 : vector<8x32xf32>
    %96 = vector.extract_strided_slice %78 {offsets = [0, 64], sizes = [8, 32], strides = [1, 1]} : vector<8x96xf32> to vector<8x32xf32>
    %97 = math.tanh %92 : vector<8x32xf32>
    %98 = arith.mulf %96, %97 : vector<8x32xf32>
    %c8 = arith.constant 8 : index
    %c0_26 = arith.constant 0 : index
    %99 = vector.load %arg28[%c8, %c0_26] : memref<64x64xf32, #tpu.memory_space<vmem>>, vector<8x32xf32>
    tpu.vector_store %arg28[%c8, %c0_26], %95 {strides = array<i32>} : memref<64x64xf32, #tpu.memory_space<vmem>>, vector<8x32xf32>,
    %c48 = arith.constant 48 : index
    %c32_27 = arith.constant 32 : index
    %100 = vector.load %arg28[%c48, %c32_27] : memref<64x64xf32, #tpu.memory_space<vmem>>, vector<8x32xf32>
    tpu.vector_store %arg28[%c48, %c32_27], %98 {strides = array<i32>} : memref<64x64xf32, #tpu.memory_space<vmem>>, vector<8x32xf32>,
    %101 = vector.extract_strided_slice %7 {offsets = [16, 0], sizes = [8, 128], strides = [1, 1]} : vector<64x128xf32> to vector<8x128xf32>
    %cst_28 = arith.constant dense<0.000000e+00> : vector<8x128xf32>
    %102 = tpu.matmul %95, %15, %cst_28 {dimension_numbers = #tpu.dot_dimension_numbers<[1], [0], [0], [1], [0, 0, 1, 1], [], []>} : vector<8x32xf32>, vector<32x128xf32>, vector<8x128xf32> -> vector<8x128xf32>
    %103 = arith.addf %101, %102 : vector<8x128xf32>
    %104 = vector.extract_strided_slice %14 {offsets = [40, 0], sizes = [8, 128], strides = [1, 1]} : vector<64x128xf32> to vector<8x128xf32>
    %cst_29 = arith.constant dense<0.000000e+00> : vector<8x128xf32>
    %105 = tpu.matmul %98, %16, %cst_29 {dimension_numbers = #tpu.dot_dimension_numbers<[1], [0], [0], [1], [0, 0, 1, 1], [], []>} : vector<8x32xf32>, vector<32x128xf32>, vector<8x128xf32> -> vector<8x128xf32>
    %106 = arith.addf %104, %105 : vector<8x128xf32>
    %107 = vector.extract_strided_slice %103 {offsets = [0, 0], sizes = [8, 96], strides = [1, 1]} : vector<8x128xf32> to vector<8x96xf32>
    %108 = arith.negf %107 : vector<8x96xf32>
    %109 = math.exp %108 : vector<8x96xf32>
    %cst_30 = arith.constant 1.000000e+00 : f32
    %110 = vector.broadcast %cst_30 : f32 to vector<8x96xf32>
    %111 = arith.addf %110, %109 : vector<8x96xf32>
    %112 = arith.divf %110, %111 : vector<8x96xf32>
    %113 = vector.extract_strided_slice %106 {offsets = [0, 0], sizes = [8, 96], strides = [1, 1]} : vector<8x128xf32> to vector<8x96xf32>
    %114 = arith.negf %113 : vector<8x96xf32>
    %115 = math.exp %114 : vector<8x96xf32>
    %cst_31 = arith.constant 1.000000e+00 : f32
    %116 = vector.broadcast %cst_31 : f32 to vector<8x96xf32>
    %117 = arith.addf %116, %115 : vector<8x96xf32>
    %118 = arith.divf %116, %117 : vector<8x96xf32>
    %119 = vector.extract_strided_slice %103 {offsets = [0, 96], sizes = [8, 32], strides = [1, 1]} : vector<8x128xf32> to vector<8x32xf32>
    %120 = math.tanh %119 : vector<8x32xf32>
    %121 = vector.extract_strided_slice %106 {offsets = [0, 96], sizes = [8, 32], strides = [1, 1]} : vector<8x128xf32> to vector<8x32xf32>
    %122 = math.tanh %121 : vector<8x32xf32>
    %123 = vector.extract_strided_slice %112 {offsets = [0, 32], sizes = [8, 32], strides = [1, 1]} : vector<8x96xf32> to vector<8x32xf32>
    %124 = arith.mulf %123, %87 : vector<8x32xf32>
    %125 = vector.extract_strided_slice %112 {offsets = [0, 0], sizes = [8, 32], strides = [1, 1]} : vector<8x96xf32> to vector<8x32xf32>
    %126 = arith.mulf %125, %120 : vector<8x32xf32>
    %127 = arith.addf %124, %126 : vector<8x32xf32>
    %128 = vector.extract_strided_slice %118 {offsets = [0, 32], sizes = [8, 32], strides = [1, 1]} : vector<8x96xf32> to vector<8x32xf32>
    %129 = arith.mulf %128, %92 : vector<8x32xf32>
    %130 = vector.extract_strided_slice %118 {offsets = [0, 0], sizes = [8, 32], strides = [1, 1]} : vector<8x96xf32> to vector<8x32xf32>
    %131 = arith.mulf %130, %122 : vector<8x32xf32>
    %132 = arith.addf %129, %131 : vector<8x32xf32>
    %133 = vector.extract_strided_slice %112 {offsets = [0, 64], sizes = [8, 32], strides = [1, 1]} : vector<8x96xf32> to vector<8x32xf32>
    %134 = math.tanh %127 : vector<8x32xf32>
    %135 = arith.mulf %133, %134 : vector<8x32xf32>
    %136 = vector.extract_strided_slice %118 {offsets = [0, 64], sizes = [8, 32], strides = [1, 1]} : vector<8x96xf32> to vector<8x32xf32>
    %137 = math.tanh %132 : vector<8x32xf32>
    %138 = arith.mulf %136, %137 : vector<8x32xf32>
    %c16 = arith.constant 16 : index
    %c0_32 = arith.constant 0 : index
    %139 = vector.load %arg28[%c16, %c0_32] : memref<64x64xf32, #tpu.memory_space<vmem>>, vector<8x32xf32>
    tpu.vector_store %arg28[%c16, %c0_32], %135 {strides = array<i32>} : memref<64x64xf32, #tpu.memory_space<vmem>>, vector<8x32xf32>,
    %c40 = arith.constant 40 : index
    %c32_33 = arith.constant 32 : index
    %140 = vector.load %arg28[%c40, %c32_33] : memref<64x64xf32, #tpu.memory_space<vmem>>, vector<8x32xf32>
    tpu.vector_store %arg28[%c40, %c32_33], %138 {strides = array<i32>} : memref<64x64xf32, #tpu.memory_space<vmem>>, vector<8x32xf32>,
    %141 = vector.extract_strided_slice %7 {offsets = [24, 0], sizes = [8, 128], strides = [1, 1]} : vector<64x128xf32> to vector<8x128xf32>
    %cst_34 = arith.constant dense<0.000000e+00> : vector<8x128xf32>
    %142 = tpu.matmul %135, %15, %cst_34 {dimension_numbers = #tpu.dot_dimension_numbers<[1], [0], [0], [1], [0, 0, 1, 1], [], []>} : vector<8x32xf32>, vector<32x128xf32>, vector<8x128xf32> -> vector<8x128xf32>
    %143 = arith.addf %141, %142 : vector<8x128xf32>
    %144 = vector.extract_strided_slice %14 {offsets = [32, 0], sizes = [8, 128], strides = [1, 1]} : vector<64x128xf32> to vector<8x128xf32>
    %cst_35 = arith.constant dense<0.000000e+00> : vector<8x128xf32>
    %145 = tpu.matmul %138, %16, %cst_35 {dimension_numbers = #tpu.dot_dimension_numbers<[1], [0], [0], [1], [0, 0, 1, 1], [], []>} : vector<8x32xf32>, vector<32x128xf32>, vector<8x128xf32> -> vector<8x128xf32>
    %146 = arith.addf %144, %145 : vector<8x128xf32>
    %147 = vector.extract_strided_slice %143 {offsets = [0, 0], sizes = [8, 96], strides = [1, 1]} : vector<8x128xf32> to vector<8x96xf32>
    %148 = arith.negf %147 : vector<8x96xf32>
    %149 = math.exp %148 : vector<8x96xf32>
    %cst_36 = arith.constant 1.000000e+00 : f32
    %150 = vector.broadcast %cst_36 : f32 to vector<8x96xf32>
    %151 = arith.addf %150, %149 : vector<8x96xf32>
    %152 = arith.divf %150, %151 : vector<8x96xf32>
    %153 = vector.extract_strided_slice %146 {offsets = [0, 0], sizes = [8, 96], strides = [1, 1]} : vector<8x128xf32> to vector<8x96xf32>
    %154 = arith.negf %153 : vector<8x96xf32>
    %155 = math.exp %154 : vector<8x96xf32>
    %cst_37 = arith.constant 1.000000e+00 : f32
    %156 = vector.broadcast %cst_37 : f32 to vector<8x96xf32>
    %157 = arith.addf %156, %155 : vector<8x96xf32>
    %158 = arith.divf %156, %157 : vector<8x96xf32>
    %159 = vector.extract_strided_slice %143 {offsets = [0, 96], sizes = [8, 32], strides = [1, 1]} : vector<8x128xf32> to vector<8x32xf32>
    %160 = math.tanh %159 : vector<8x32xf32>
    %161 = vector.extract_strided_slice %146 {offsets = [0, 96], sizes = [8, 32], strides = [1, 1]} : vector<8x128xf32> to vector<8x32xf32>
    %162 = math.tanh %161 : vector<8x32xf32>
    %163 = vector.extract_strided_slice %152 {offsets = [0, 32], sizes = [8, 32], strides = [1, 1]} : vector<8x96xf32> to vector<8x32xf32>
    %164 = arith.mulf %163, %127 : vector<8x32xf32>
    %165 = vector.extract_strided_slice %152 {offsets = [0, 0], sizes = [8, 32], strides = [1, 1]} : vector<8x96xf32> to vector<8x32xf32>
    %166 = arith.mulf %165, %160 : vector<8x32xf32>
    %167 = arith.addf %164, %166 : vector<8x32xf32>
    %168 = vector.extract_strided_slice %158 {offsets = [0, 32], sizes = [8, 32], strides = [1, 1]} : vector<8x96xf32> to vector<8x32xf32>
    %169 = arith.mulf %168, %132 : vector<8x32xf32>
    %170 = vector.extract_strided_slice %158 {offsets = [0, 0], sizes = [8, 32], strides = [1, 1]} : vector<8x96xf32> to vector<8x32xf32>
    %171 = arith.mulf %170, %162 : vector<8x32xf32>
    %172 = arith.addf %169, %171 : vector<8x32xf32>
    %173 = vector.extract_strided_slice %152 {offsets = [0, 64], sizes = [8, 32], strides = [1, 1]} : vector<8x96xf32> to vector<8x32xf32>
    %174 = math.tanh %167 : vector<8x32xf32>
    %175 = arith.mulf %173, %174 : vector<8x32xf32>
    %176 = vector.extract_strided_slice %158 {offsets = [0, 64], sizes = [8, 32], strides = [1, 1]} : vector<8x96xf32> to vector<8x32xf32>
    %177 = math.tanh %172 : vector<8x32xf32>
    %178 = arith.mulf %176, %177 : vector<8x32xf32>
    %c24 = arith.constant 24 : index
    %c0_38 = arith.constant 0 : index
    %179 = vector.load %arg28[%c24, %c0_38] : memref<64x64xf32, #tpu.memory_space<vmem>>, vector<8x32xf32>
    tpu.vector_store %arg28[%c24, %c0_38], %175 {strides = array<i32>} : memref<64x64xf32, #tpu.memory_space<vmem>>, vector<8x32xf32>,
    %c32_39 = arith.constant 32 : index
    %c32_40 = arith.constant 32 : index
    %180 = vector.load %arg28[%c32_39, %c32_40] : memref<64x64xf32, #tpu.memory_space<vmem>>, vector<8x32xf32>
    tpu.vector_store %arg28[%c32_39, %c32_40], %178 {strides = array<i32>} : memref<64x64xf32, #tpu.memory_space<vmem>>, vector<8x32xf32>,
    %181 = vector.extract_strided_slice %7 {offsets = [32, 0], sizes = [8, 128], strides = [1, 1]} : vector<64x128xf32> to vector<8x128xf32>
    %cst_41 = arith.constant dense<0.000000e+00> : vector<8x128xf32>
    %182 = tpu.matmul %175, %15, %cst_41 {dimension_numbers = #tpu.dot_dimension_numbers<[1], [0], [0], [1], [0, 0, 1, 1], [], []>} : vector<8x32xf32>, vector<32x128xf32>, vector<8x128xf32> -> vector<8x128xf32>
    %183 = arith.addf %181, %182 : vector<8x128xf32>
    %184 = vector.extract_strided_slice %14 {offsets = [24, 0], sizes = [8, 128], strides = [1, 1]} : vector<64x128xf32> to vector<8x128xf32>
    %cst_42 = arith.constant dense<0.000000e+00> : vector<8x128xf32>
    %185 = tpu.matmul %178, %16, %cst_42 {dimension_numbers = #tpu.dot_dimension_numbers<[1], [0], [0], [1], [0, 0, 1, 1], [], []>} : vector<8x32xf32>, vector<32x128xf32>, vector<8x128xf32> -> vector<8x128xf32>
    %186 = arith.addf %184, %185 : vector<8x128xf32>
    %187 = vector.extract_strided_slice %183 {offsets = [0, 0], sizes = [8, 96], strides = [1, 1]} : vector<8x128xf32> to vector<8x96xf32>
    %188 = arith.negf %187 : vector<8x96xf32>
    %189 = math.exp %188 : vector<8x96xf32>
    %cst_43 = arith.constant 1.000000e+00 : f32
    %190 = vector.broadcast %cst_43 : f32 to vector<8x96xf32>
    %191 = arith.addf %190, %189 : vector<8x96xf32>
    %192 = arith.divf %190, %191 : vector<8x96xf32>
    %193 = vector.extract_strided_slice %186 {offsets = [0, 0], sizes = [8, 96], strides = [1, 1]} : vector<8x128xf32> to vector<8x96xf32>
    %194 = arith.negf %193 : vector<8x96xf32>
    %195 = math.exp %194 : vector<8x96xf32>
    %cst_44 = arith.constant 1.000000e+00 : f32
    %196 = vector.broadcast %cst_44 : f32 to vector<8x96xf32>
    %197 = arith.addf %196, %195 : vector<8x96xf32>
    %198 = arith.divf %196, %197 : vector<8x96xf32>
    %199 = vector.extract_strided_slice %183 {offsets = [0, 96], sizes = [8, 32], strides = [1, 1]} : vector<8x128xf32> to vector<8x32xf32>
    %200 = math.tanh %199 : vector<8x32xf32>
    %201 = vector.extract_strided_slice %186 {offsets = [0, 96], sizes = [8, 32], strides = [1, 1]} : vector<8x128xf32> to vector<8x32xf32>
    %202 = math.tanh %201 : vector<8x32xf32>
    %203 = vector.extract_strided_slice %192 {offsets = [0, 32], sizes = [8, 32], strides = [1, 1]} : vector<8x96xf32> to vector<8x32xf32>
    %204 = arith.mulf %203, %167 : vector<8x32xf32>
    %205 = vector.extract_strided_slice %192 {offsets = [0, 0], sizes = [8, 32], strides = [1, 1]} : vector<8x96xf32> to vector<8x32xf32>
    %206 = arith.mulf %205, %200 : vector<8x32xf32>
    %207 = arith.addf %204, %206 : vector<8x32xf32>
    %208 = vector.extract_strided_slice %198 {offsets = [0, 32], sizes = [8, 32], strides = [1, 1]} : vector<8x96xf32> to vector<8x32xf32>
    %209 = arith.mulf %208, %172 : vector<8x32xf32>
    %210 = vector.extract_strided_slice %198 {offsets = [0, 0], sizes = [8, 32], strides = [1, 1]} : vector<8x96xf32> to vector<8x32xf32>
    %211 = arith.mulf %210, %202 : vector<8x32xf32>
    %212 = arith.addf %209, %211 : vector<8x32xf32>
    %213 = vector.extract_strided_slice %192 {offsets = [0, 64], sizes = [8, 32], strides = [1, 1]} : vector<8x96xf32> to vector<8x32xf32>
    %214 = math.tanh %207 : vector<8x32xf32>
    %215 = arith.mulf %213, %214 : vector<8x32xf32>
    %216 = vector.extract_strided_slice %198 {offsets = [0, 64], sizes = [8, 32], strides = [1, 1]} : vector<8x96xf32> to vector<8x32xf32>
    %217 = math.tanh %212 : vector<8x32xf32>
    %218 = arith.mulf %216, %217 : vector<8x32xf32>
    %c32_45 = arith.constant 32 : index
    %c0_46 = arith.constant 0 : index
    %219 = vector.load %arg28[%c32_45, %c0_46] : memref<64x64xf32, #tpu.memory_space<vmem>>, vector<8x32xf32>
    tpu.vector_store %arg28[%c32_45, %c0_46], %215 {strides = array<i32>} : memref<64x64xf32, #tpu.memory_space<vmem>>, vector<8x32xf32>,
    %c24_47 = arith.constant 24 : index
    %c32_48 = arith.constant 32 : index
    %220 = vector.load %arg28[%c24_47, %c32_48] : memref<64x64xf32, #tpu.memory_space<vmem>>, vector<8x32xf32>
    tpu.vector_store %arg28[%c24_47, %c32_48], %218 {strides = array<i32>} : memref<64x64xf32, #tpu.memory_space<vmem>>, vector<8x32xf32>,
    %221 = vector.extract_strided_slice %7 {offsets = [40, 0], sizes = [8, 128], strides = [1, 1]} : vector<64x128xf32> to vector<8x128xf32>
    %cst_49 = arith.constant dense<0.000000e+00> : vector<8x128xf32>
    %222 = tpu.matmul %215, %15, %cst_49 {dimension_numbers = #tpu.dot_dimension_numbers<[1], [0], [0], [1], [0, 0, 1, 1], [], []>} : vector<8x32xf32>, vector<32x128xf32>, vector<8x128xf32> -> vector<8x128xf32>
    %223 = arith.addf %221, %222 : vector<8x128xf32>
    %224 = vector.extract_strided_slice %14 {offsets = [16, 0], sizes = [8, 128], strides = [1, 1]} : vector<64x128xf32> to vector<8x128xf32>
    %cst_50 = arith.constant dense<0.000000e+00> : vector<8x128xf32>
    %225 = tpu.matmul %218, %16, %cst_50 {dimension_numbers = #tpu.dot_dimension_numbers<[1], [0], [0], [1], [0, 0, 1, 1], [], []>} : vector<8x32xf32>, vector<32x128xf32>, vector<8x128xf32> -> vector<8x128xf32>
    %226 = arith.addf %224, %225 : vector<8x128xf32>
    %227 = vector.extract_strided_slice %223 {offsets = [0, 0], sizes = [8, 96], strides = [1, 1]} : vector<8x128xf32> to vector<8x96xf32>
    %228 = arith.negf %227 : vector<8x96xf32>
    %229 = math.exp %228 : vector<8x96xf32>
    %cst_51 = arith.constant 1.000000e+00 : f32
    %230 = vector.broadcast %cst_51 : f32 to vector<8x96xf32>
    %231 = arith.addf %230, %229 : vector<8x96xf32>
    %232 = arith.divf %230, %231 : vector<8x96xf32>
    %233 = vector.extract_strided_slice %226 {offsets = [0, 0], sizes = [8, 96], strides = [1, 1]} : vector<8x128xf32> to vector<8x96xf32>
    %234 = arith.negf %233 : vector<8x96xf32>
    %235 = math.exp %234 : vector<8x96xf32>
    %cst_52 = arith.constant 1.000000e+00 : f32
    %236 = vector.broadcast %cst_52 : f32 to vector<8x96xf32>
    %237 = arith.addf %236, %235 : vector<8x96xf32>
    %238 = arith.divf %236, %237 : vector<8x96xf32>
    %239 = vector.extract_strided_slice %223 {offsets = [0, 96], sizes = [8, 32], strides = [1, 1]} : vector<8x128xf32> to vector<8x32xf32>
    %240 = math.tanh %239 : vector<8x32xf32>
    %241 = vector.extract_strided_slice %226 {offsets = [0, 96], sizes = [8, 32], strides = [1, 1]} : vector<8x128xf32> to vector<8x32xf32>
    %242 = math.tanh %241 : vector<8x32xf32>
    %243 = vector.extract_strided_slice %232 {offsets = [0, 32], sizes = [8, 32], strides = [1, 1]} : vector<8x96xf32> to vector<8x32xf32>
    %244 = arith.mulf %243, %207 : vector<8x32xf32>
    %245 = vector.extract_strided_slice %232 {offsets = [0, 0], sizes = [8, 32], strides = [1, 1]} : vector<8x96xf32> to vector<8x32xf32>
    %246 = arith.mulf %245, %240 : vector<8x32xf32>
    %247 = arith.addf %244, %246 : vector<8x32xf32>
    %248 = vector.extract_strided_slice %238 {offsets = [0, 32], sizes = [8, 32], strides = [1, 1]} : vector<8x96xf32> to vector<8x32xf32>
    %249 = arith.mulf %248, %212 : vector<8x32xf32>
    %250 = vector.extract_strided_slice %238 {offsets = [0, 0], sizes = [8, 32], strides = [1, 1]} : vector<8x96xf32> to vector<8x32xf32>
    %251 = arith.mulf %250, %242 : vector<8x32xf32>
    %252 = arith.addf %249, %251 : vector<8x32xf32>
    %253 = vector.extract_strided_slice %232 {offsets = [0, 64], sizes = [8, 32], strides = [1, 1]} : vector<8x96xf32> to vector<8x32xf32>
    %254 = math.tanh %247 : vector<8x32xf32>
    %255 = arith.mulf %253, %254 : vector<8x32xf32>
    %256 = vector.extract_strided_slice %238 {offsets = [0, 64], sizes = [8, 32], strides = [1, 1]} : vector<8x96xf32> to vector<8x32xf32>
    %257 = math.tanh %252 : vector<8x32xf32>
    %258 = arith.mulf %256, %257 : vector<8x32xf32>
    %c40_53 = arith.constant 40 : index
    %c0_54 = arith.constant 0 : index
    %259 = vector.load %arg28[%c40_53, %c0_54] : memref<64x64xf32, #tpu.memory_space<vmem>>, vector<8x32xf32>
    tpu.vector_store %arg28[%c40_53, %c0_54], %255 {strides = array<i32>} : memref<64x64xf32, #tpu.memory_space<vmem>>, vector<8x32xf32>,
    %c16_55 = arith.constant 16 : index
    %c32_56 = arith.constant 32 : index
    %260 = vector.load %arg28[%c16_55, %c32_56] : memref<64x64xf32, #tpu.memory_space<vmem>>, vector<8x32xf32>
    tpu.vector_store %arg28[%c16_55, %c32_56], %258 {strides = array<i32>} : memref<64x64xf32, #tpu.memory_space<vmem>>, vector<8x32xf32>,
    %261 = vector.extract_strided_slice %7 {offsets = [48, 0], sizes = [8, 128], strides = [1, 1]} : vector<64x128xf32> to vector<8x128xf32>
    %cst_57 = arith.constant dense<0.000000e+00> : vector<8x128xf32>
    %262 = tpu.matmul %255, %15, %cst_57 {dimension_numbers = #tpu.dot_dimension_numbers<[1], [0], [0], [1], [0, 0, 1, 1], [], []>} : vector<8x32xf32>, vector<32x128xf32>, vector<8x128xf32> -> vector<8x128xf32>
    %263 = arith.addf %261, %262 : vector<8x128xf32>
    %264 = vector.extract_strided_slice %14 {offsets = [8, 0], sizes = [8, 128], strides = [1, 1]} : vector<64x128xf32> to vector<8x128xf32>
    %cst_58 = arith.constant dense<0.000000e+00> : vector<8x128xf32>
    %265 = tpu.matmul %258, %16, %cst_58 {dimension_numbers = #tpu.dot_dimension_numbers<[1], [0], [0], [1], [0, 0, 1, 1], [], []>} : vector<8x32xf32>, vector<32x128xf32>, vector<8x128xf32> -> vector<8x128xf32>
    %266 = arith.addf %264, %265 : vector<8x128xf32>
    %267 = vector.extract_strided_slice %263 {offsets = [0, 0], sizes = [8, 96], strides = [1, 1]} : vector<8x128xf32> to vector<8x96xf32>
    %268 = arith.negf %267 : vector<8x96xf32>
    %269 = math.exp %268 : vector<8x96xf32>
    %cst_59 = arith.constant 1.000000e+00 : f32
    %270 = vector.broadcast %cst_59 : f32 to vector<8x96xf32>
    %271 = arith.addf %270, %269 : vector<8x96xf32>
    %272 = arith.divf %270, %271 : vector<8x96xf32>
    %273 = vector.extract_strided_slice %266 {offsets = [0, 0], sizes = [8, 96], strides = [1, 1]} : vector<8x128xf32> to vector<8x96xf32>
    %274 = arith.negf %273 : vector<8x96xf32>
    %275 = math.exp %274 : vector<8x96xf32>
    %cst_60 = arith.constant 1.000000e+00 : f32
    %276 = vector.broadcast %cst_60 : f32 to vector<8x96xf32>
    %277 = arith.addf %276, %275 : vector<8x96xf32>
    %278 = arith.divf %276, %277 : vector<8x96xf32>
    %279 = vector.extract_strided_slice %263 {offsets = [0, 96], sizes = [8, 32], strides = [1, 1]} : vector<8x128xf32> to vector<8x32xf32>
    %280 = math.tanh %279 : vector<8x32xf32>
    %281 = vector.extract_strided_slice %266 {offsets = [0, 96], sizes = [8, 32], strides = [1, 1]} : vector<8x128xf32> to vector<8x32xf32>
    %282 = math.tanh %281 : vector<8x32xf32>
    %283 = vector.extract_strided_slice %272 {offsets = [0, 32], sizes = [8, 32], strides = [1, 1]} : vector<8x96xf32> to vector<8x32xf32>
    %284 = arith.mulf %283, %247 : vector<8x32xf32>
    %285 = vector.extract_strided_slice %272 {offsets = [0, 0], sizes = [8, 32], strides = [1, 1]} : vector<8x96xf32> to vector<8x32xf32>
    %286 = arith.mulf %285, %280 : vector<8x32xf32>
    %287 = arith.addf %284, %286 : vector<8x32xf32>
    %288 = vector.extract_strided_slice %278 {offsets = [0, 32], sizes = [8, 32], strides = [1, 1]} : vector<8x96xf32> to vector<8x32xf32>
    %289 = arith.mulf %288, %252 : vector<8x32xf32>
    %290 = vector.extract_strided_slice %278 {offsets = [0, 0], sizes = [8, 32], strides = [1, 1]} : vector<8x96xf32> to vector<8x32xf32>
    %291 = arith.mulf %290, %282 : vector<8x32xf32>
    %292 = arith.addf %289, %291 : vector<8x32xf32>
    %293 = vector.extract_strided_slice %272 {offsets = [0, 64], sizes = [8, 32], strides = [1, 1]} : vector<8x96xf32> to vector<8x32xf32>
    %294 = math.tanh %287 : vector<8x32xf32>
    %295 = arith.mulf %293, %294 : vector<8x32xf32>
    %296 = vector.extract_strided_slice %278 {offsets = [0, 64], sizes = [8, 32], strides = [1, 1]} : vector<8x96xf32> to vector<8x32xf32>
    %297 = math.tanh %292 : vector<8x32xf32>
    %298 = arith.mulf %296, %297 : vector<8x32xf32>
    %c48_61 = arith.constant 48 : index
    %c0_62 = arith.constant 0 : index
    %299 = vector.load %arg28[%c48_61, %c0_62] : memref<64x64xf32, #tpu.memory_space<vmem>>, vector<8x32xf32>
    tpu.vector_store %arg28[%c48_61, %c0_62], %295 {strides = array<i32>} : memref<64x64xf32, #tpu.memory_space<vmem>>, vector<8x32xf32>,
    %c8_63 = arith.constant 8 : index
    %c32_64 = arith.constant 32 : index
    %300 = vector.load %arg28[%c8_63, %c32_64] : memref<64x64xf32, #tpu.memory_space<vmem>>, vector<8x32xf32>
    tpu.vector_store %arg28[%c8_63, %c32_64], %298 {strides = array<i32>} : memref<64x64xf32, #tpu.memory_space<vmem>>, vector<8x32xf32>,
    %301 = vector.extract_strided_slice %7 {offsets = [56, 0], sizes = [8, 128], strides = [1, 1]} : vector<64x128xf32> to vector<8x128xf32>
    %cst_65 = arith.constant dense<0.000000e+00> : vector<8x128xf32>
    %302 = tpu.matmul %295, %15, %cst_65 {dimension_numbers = #tpu.dot_dimension_numbers<[1], [0], [0], [1], [0, 0, 1, 1], [], []>} : vector<8x32xf32>, vector<32x128xf32>, vector<8x128xf32> -> vector<8x128xf32>
    %303 = arith.addf %301, %302 : vector<8x128xf32>
    %304 = vector.extract_strided_slice %14 {offsets = [0, 0], sizes = [8, 128], strides = [1, 1]} : vector<64x128xf32> to vector<8x128xf32>
    %cst_66 = arith.constant dense<0.000000e+00> : vector<8x128xf32>
    %305 = tpu.matmul %298, %16, %cst_66 {dimension_numbers = #tpu.dot_dimension_numbers<[1], [0], [0], [1], [0, 0, 1, 1], [], []>} : vector<8x32xf32>, vector<32x128xf32>, vector<8x128xf32> -> vector<8x128xf32>
    %306 = arith.addf %304, %305 : vector<8x128xf32>
    %307 = vector.extract_strided_slice %303 {offsets = [0, 0], sizes = [8, 96], strides = [1, 1]} : vector<8x128xf32> to vector<8x96xf32>
    %308 = arith.negf %307 : vector<8x96xf32>
    %309 = math.exp %308 : vector<8x96xf32>
    %cst_67 = arith.constant 1.000000e+00 : f32
    %310 = vector.broadcast %cst_67 : f32 to vector<8x96xf32>
    %311 = arith.addf %310, %309 : vector<8x96xf32>
    %312 = arith.divf %310, %311 : vector<8x96xf32>
    %313 = vector.extract_strided_slice %306 {offsets = [0, 0], sizes = [8, 96], strides = [1, 1]} : vector<8x128xf32> to vector<8x96xf32>
    %314 = arith.negf %313 : vector<8x96xf32>
    %315 = math.exp %314 : vector<8x96xf32>
    %cst_68 = arith.constant 1.000000e+00 : f32
    %316 = vector.broadcast %cst_68 : f32 to vector<8x96xf32>
    %317 = arith.addf %316, %315 : vector<8x96xf32>
    %318 = arith.divf %316, %317 : vector<8x96xf32>
    %319 = vector.extract_strided_slice %303 {offsets = [0, 96], sizes = [8, 32], strides = [1, 1]} : vector<8x128xf32> to vector<8x32xf32>
    %320 = math.tanh %319 : vector<8x32xf32>
    %321 = vector.extract_strided_slice %306 {offsets = [0, 96], sizes = [8, 32], strides = [1, 1]} : vector<8x128xf32> to vector<8x32xf32>
    %322 = math.tanh %321 : vector<8x32xf32>
    %323 = vector.extract_strided_slice %312 {offsets = [0, 32], sizes = [8, 32], strides = [1, 1]} : vector<8x96xf32> to vector<8x32xf32>
    %324 = arith.mulf %323, %287 : vector<8x32xf32>
    %325 = vector.extract_strided_slice %312 {offsets = [0, 0], sizes = [8, 32], strides = [1, 1]} : vector<8x96xf32> to vector<8x32xf32>
    %326 = arith.mulf %325, %320 : vector<8x32xf32>
    %327 = arith.addf %324, %326 : vector<8x32xf32>
    %328 = vector.extract_strided_slice %318 {offsets = [0, 32], sizes = [8, 32], strides = [1, 1]} : vector<8x96xf32> to vector<8x32xf32>
    %329 = arith.mulf %328, %292 : vector<8x32xf32>
    %330 = vector.extract_strided_slice %318 {offsets = [0, 0], sizes = [8, 32], strides = [1, 1]} : vector<8x96xf32> to vector<8x32xf32>
    %331 = arith.mulf %330, %322 : vector<8x32xf32>
    %332 = arith.addf %329, %331 : vector<8x32xf32>
    %333 = vector.extract_strided_slice %312 {offsets = [0, 64], sizes = [8, 32], strides = [1, 1]} : vector<8x96xf32> to vector<8x32xf32>
    %334 = math.tanh %327 : vector<8x32xf32>
    %335 = arith.mulf %333, %334 : vector<8x32xf32>
    %336 = vector.extract_strided_slice %318 {offsets = [0, 64], sizes = [8, 32], strides = [1, 1]} : vector<8x96xf32> to vector<8x32xf32>
    %337 = math.tanh %332 : vector<8x32xf32>
    %338 = arith.mulf %336, %337 : vector<8x32xf32>
    %c56_69 = arith.constant 56 : index
    %c0_70 = arith.constant 0 : index
    %339 = vector.load %arg28[%c56_69, %c0_70] : memref<64x64xf32, #tpu.memory_space<vmem>>, vector<8x32xf32>
    tpu.vector_store %arg28[%c56_69, %c0_70], %335 {strides = array<i32>} : memref<64x64xf32, #tpu.memory_space<vmem>>, vector<8x32xf32>,
    %c0_71 = arith.constant 0 : index
    %c32_72 = arith.constant 32 : index
    %340 = vector.load %arg28[%c0_71, %c32_72] : memref<64x64xf32, #tpu.memory_space<vmem>>, vector<8x32xf32>
    tpu.vector_store %arg28[%c0_71, %c32_72], %338 {strides = array<i32>} : memref<64x64xf32, #tpu.memory_space<vmem>>, vector<8x32xf32>,
    %c0_73 = arith.constant 0 : index
    %c0_74 = arith.constant 0 : index
    %341 = vector.load %arg28[%c0_73, %c0_74] : memref<64x64xf32, #tpu.memory_space<vmem>>, vector<64x64xf32>
    %c0_75 = arith.constant 0 : index
    %c0_76 = arith.constant 0 : index
    %342 = vector.load %arg7[%c0_75, %c0_76] : memref<64x128xf32, #tpu.memory_space<vmem>>, vector<64x128xf32>
    %cst_77 = arith.constant dense<0.000000e+00> : vector<64x128xf32>
    %343 = tpu.matmul %341, %342, %cst_77 {dimension_numbers = #tpu.dot_dimension_numbers<[1], [0], [0], [1], [0, 0, 1, 1], [], []>} : vector<64x64xf32>, vector<64x128xf32>, vector<64x128xf32> -> vector<64x128xf32>
    %c0_78 = arith.constant 0 : index
    %c0_79 = arith.constant 0 : index
    %344 = vector.load %arg9[%c0_78, %c0_79] : memref<1x128xf32, #tpu.memory_space<vmem>>, vector<1x128xf32>
    %345 = vector.broadcast %344 : vector<1x128xf32> to vector<64x128xf32>
    %346 = arith.addf %343, %345 : vector<64x128xf32>
    %c0_80 = arith.constant 0 : index
    %c0_81 = arith.constant 0 : index
    %347 = vector.load %arg8[%c0_80, %c0_81] : memref<64x128xf32, #tpu.memory_space<vmem>>, vector<64x128xf32>
    %cst_82 = arith.constant dense<0.000000e+00> : vector<64x128xf32>
    %348 = tpu.matmul %341, %347, %cst_82 {dimension_numbers = #tpu.dot_dimension_numbers<[1], [0], [0], [1], [0, 0, 1, 1], [], []>} : vector<64x64xf32>, vector<64x128xf32>, vector<64x128xf32> -> vector<64x128xf32>
    %c0_83 = arith.constant 0 : index
    %c0_84 = arith.constant 0 : index
    %349 = vector.load %arg10[%c0_83, %c0_84] : memref<1x128xf32, #tpu.memory_space<vmem>>, vector<1x128xf32>
    %350 = vector.broadcast %349 : vector<1x128xf32> to vector<64x128xf32>
    %351 = arith.addf %348, %350 : vector<64x128xf32>
    %c0_85 = arith.constant 0 : index
    %c0_86 = arith.constant 0 : index
    %352 = vector.load %arg11[%c0_85, %c0_86] : memref<32x128xf32, #tpu.memory_space<vmem>>, vector<32x128xf32>
    %c0_87 = arith.constant 0 : index
    %c0_88 = arith.constant 0 : index
    %353 = vector.load %arg12[%c0_87, %c0_88] : memref<32x128xf32, #tpu.memory_space<vmem>>, vector<32x128xf32>
    %cst_89 = arith.constant 0.000000e+00 : f32
    %354 = vector.broadcast %cst_89 : f32 to vector<8x32xf32>
    %cst_90 = arith.constant 0.000000e+00 : f32
    %355 = vector.broadcast %cst_90 : f32 to vector<8x32xf32>
    %cst_91 = arith.constant 0.000000e+00 : f32
    %356 = vector.broadcast %cst_91 : f32 to vector<8x32xf32>
    %cst_92 = arith.constant 0.000000e+00 : f32
    %357 = vector.broadcast %cst_92 : f32 to vector<8x32xf32>
    %358 = vector.extract_strided_slice %346 {offsets = [0, 0], sizes = [8, 128], strides = [1, 1]} : vector<64x128xf32> to vector<8x128xf32>
    %cst_93 = arith.constant dense<0.000000e+00> : vector<8x128xf32>
    %359 = tpu.matmul %354, %352, %cst_93 {dimension_numbers = #tpu.dot_dimension_numbers<[1], [0], [0], [1], [0, 0, 1, 1], [], []>} : vector<8x32xf32>, vector<32x128xf32>, vector<8x128xf32> -> vector<8x128xf32>
    %360 = arith.addf %358, %359 : vector<8x128xf32>
    %361 = vector.extract_strided_slice %351 {offsets = [56, 0], sizes = [8, 128], strides = [1, 1]} : vector<64x128xf32> to vector<8x128xf32>
    %cst_94 = arith.constant dense<0.000000e+00> : vector<8x128xf32>
    %362 = tpu.matmul %356, %353, %cst_94 {dimension_numbers = #tpu.dot_dimension_numbers<[1], [0], [0], [1], [0, 0, 1, 1], [], []>} : vector<8x32xf32>, vector<32x128xf32>, vector<8x128xf32> -> vector<8x128xf32>
    %363 = arith.addf %361, %362 : vector<8x128xf32>
    %364 = vector.extract_strided_slice %360 {offsets = [0, 0], sizes = [8, 96], strides = [1, 1]} : vector<8x128xf32> to vector<8x96xf32>
    %365 = arith.negf %364 : vector<8x96xf32>
    %366 = math.exp %365 : vector<8x96xf32>
    %cst_95 = arith.constant 1.000000e+00 : f32
    %367 = vector.broadcast %cst_95 : f32 to vector<8x96xf32>
    %368 = arith.addf %367, %366 : vector<8x96xf32>
    %369 = arith.divf %367, %368 : vector<8x96xf32>
    %370 = vector.extract_strided_slice %363 {offsets = [0, 0], sizes = [8, 96], strides = [1, 1]} : vector<8x128xf32> to vector<8x96xf32>
    %371 = arith.negf %370 : vector<8x96xf32>
    %372 = math.exp %371 : vector<8x96xf32>
    %cst_96 = arith.constant 1.000000e+00 : f32
    %373 = vector.broadcast %cst_96 : f32 to vector<8x96xf32>
    %374 = arith.addf %373, %372 : vector<8x96xf32>
    %375 = arith.divf %373, %374 : vector<8x96xf32>
    %376 = vector.extract_strided_slice %360 {offsets = [0, 96], sizes = [8, 32], strides = [1, 1]} : vector<8x128xf32> to vector<8x32xf32>
    %377 = math.tanh %376 : vector<8x32xf32>
    %378 = vector.extract_strided_slice %363 {offsets = [0, 96], sizes = [8, 32], strides = [1, 1]} : vector<8x128xf32> to vector<8x32xf32>
    %379 = math.tanh %378 : vector<8x32xf32>
    %380 = vector.extract_strided_slice %369 {offsets = [0, 32], sizes = [8, 32], strides = [1, 1]} : vector<8x96xf32> to vector<8x32xf32>
    %381 = arith.mulf %380, %355 : vector<8x32xf32>
    %382 = vector.extract_strided_slice %369 {offsets = [0, 0], sizes = [8, 32], strides = [1, 1]} : vector<8x96xf32> to vector<8x32xf32>
    %383 = arith.mulf %382, %377 : vector<8x32xf32>
    %384 = arith.addf %381, %383 : vector<8x32xf32>
    %385 = vector.extract_strided_slice %375 {offsets = [0, 32], sizes = [8, 32], strides = [1, 1]} : vector<8x96xf32> to vector<8x32xf32>
    %386 = arith.mulf %385, %357 : vector<8x32xf32>
    %387 = vector.extract_strided_slice %375 {offsets = [0, 0], sizes = [8, 32], strides = [1, 1]} : vector<8x96xf32> to vector<8x32xf32>
    %388 = arith.mulf %387, %379 : vector<8x32xf32>
    %389 = arith.addf %386, %388 : vector<8x32xf32>
    %390 = vector.extract_strided_slice %369 {offsets = [0, 64], sizes = [8, 32], strides = [1, 1]} : vector<8x96xf32> to vector<8x32xf32>
    %391 = math.tanh %384 : vector<8x32xf32>
    %392 = arith.mulf %390, %391 : vector<8x32xf32>
    %393 = vector.extract_strided_slice %375 {offsets = [0, 64], sizes = [8, 32], strides = [1, 1]} : vector<8x96xf32> to vector<8x32xf32>
    %394 = math.tanh %389 : vector<8x32xf32>
    %395 = arith.mulf %393, %394 : vector<8x32xf32>
    %c0_97 = arith.constant 0 : index
    %c0_98 = arith.constant 0 : index
    %396 = vector.load %arg29[%c0_97, %c0_98] : memref<64x64xf32, #tpu.memory_space<vmem>>, vector<8x32xf32>
    tpu.vector_store %arg29[%c0_97, %c0_98], %392 {strides = array<i32>} : memref<64x64xf32, #tpu.memory_space<vmem>>, vector<8x32xf32>,
    %c56_99 = arith.constant 56 : index
    %c32_100 = arith.constant 32 : index
    %397 = vector.load %arg29[%c56_99, %c32_100] : memref<64x64xf32, #tpu.memory_space<vmem>>, vector<8x32xf32>
    tpu.vector_store %arg29[%c56_99, %c32_100], %395 {strides = array<i32>} : memref<64x64xf32, #tpu.memory_space<vmem>>, vector<8x32xf32>,
    %398 = vector.extract_strided_slice %346 {offsets = [8, 0], sizes = [8, 128], strides = [1, 1]} : vector<64x128xf32> to vector<8x128xf32>
    %cst_101 = arith.constant dense<0.000000e+00> : vector<8x128xf32>
    %399 = tpu.matmul %392, %352, %cst_101 {dimension_numbers = #tpu.dot_dimension_numbers<[1], [0], [0], [1], [0, 0, 1, 1], [], []>} : vector<8x32xf32>, vector<32x128xf32>, vector<8x128xf32> -> vector<8x128xf32>
    %400 = arith.addf %398, %399 : vector<8x128xf32>
    %401 = vector.extract_strided_slice %351 {offsets = [48, 0], sizes = [8, 128], strides = [1, 1]} : vector<64x128xf32> to vector<8x128xf32>
    %cst_102 = arith.constant dense<0.000000e+00> : vector<8x128xf32>
    %402 = tpu.matmul %395, %353, %cst_102 {dimension_numbers = #tpu.dot_dimension_numbers<[1], [0], [0], [1], [0, 0, 1, 1], [], []>} : vector<8x32xf32>, vector<32x128xf32>, vector<8x128xf32> -> vector<8x128xf32>
    %403 = arith.addf %401, %402 : vector<8x128xf32>
    %404 = vector.extract_strided_slice %400 {offsets = [0, 0], sizes = [8, 96], strides = [1, 1]} : vector<8x128xf32> to vector<8x96xf32>
    %405 = arith.negf %404 : vector<8x96xf32>
    %406 = math.exp %405 : vector<8x96xf32>
    %cst_103 = arith.constant 1.000000e+00 : f32
    %407 = vector.broadcast %cst_103 : f32 to vector<8x96xf32>
    %408 = arith.addf %407, %406 : vector<8x96xf32>
    %409 = arith.divf %407, %408 : vector<8x96xf32>
    %410 = vector.extract_strided_slice %403 {offsets = [0, 0], sizes = [8, 96], strides = [1, 1]} : vector<8x128xf32> to vector<8x96xf32>
    %411 = arith.negf %410 : vector<8x96xf32>
    %412 = math.exp %411 : vector<8x96xf32>
    %cst_104 = arith.constant 1.000000e+00 : f32
    %413 = vector.broadcast %cst_104 : f32 to vector<8x96xf32>
    %414 = arith.addf %413, %412 : vector<8x96xf32>
    %415 = arith.divf %413, %414 : vector<8x96xf32>
    %416 = vector.extract_strided_slice %400 {offsets = [0, 96], sizes = [8, 32], strides = [1, 1]} : vector<8x128xf32> to vector<8x32xf32>
    %417 = math.tanh %416 : vector<8x32xf32>
    %418 = vector.extract_strided_slice %403 {offsets = [0, 96], sizes = [8, 32], strides = [1, 1]} : vector<8x128xf32> to vector<8x32xf32>
    %419 = math.tanh %418 : vector<8x32xf32>
    %420 = vector.extract_strided_slice %409 {offsets = [0, 32], sizes = [8, 32], strides = [1, 1]} : vector<8x96xf32> to vector<8x32xf32>
    %421 = arith.mulf %420, %384 : vector<8x32xf32>
    %422 = vector.extract_strided_slice %409 {offsets = [0, 0], sizes = [8, 32], strides = [1, 1]} : vector<8x96xf32> to vector<8x32xf32>
    %423 = arith.mulf %422, %417 : vector<8x32xf32>
    %424 = arith.addf %421, %423 : vector<8x32xf32>
    %425 = vector.extract_strided_slice %415 {offsets = [0, 32], sizes = [8, 32], strides = [1, 1]} : vector<8x96xf32> to vector<8x32xf32>
    %426 = arith.mulf %425, %389 : vector<8x32xf32>
    %427 = vector.extract_strided_slice %415 {offsets = [0, 0], sizes = [8, 32], strides = [1, 1]} : vector<8x96xf32> to vector<8x32xf32>
    %428 = arith.mulf %427, %419 : vector<8x32xf32>
    %429 = arith.addf %426, %428 : vector<8x32xf32>
    %430 = vector.extract_strided_slice %409 {offsets = [0, 64], sizes = [8, 32], strides = [1, 1]} : vector<8x96xf32> to vector<8x32xf32>
    %431 = math.tanh %424 : vector<8x32xf32>
    %432 = arith.mulf %430, %431 : vector<8x32xf32>
    %433 = vector.extract_strided_slice %415 {offsets = [0, 64], sizes = [8, 32], strides = [1, 1]} : vector<8x96xf32> to vector<8x32xf32>
    %434 = math.tanh %429 : vector<8x32xf32>
    %435 = arith.mulf %433, %434 : vector<8x32xf32>
    %c8_105 = arith.constant 8 : index
    %c0_106 = arith.constant 0 : index
    %436 = vector.load %arg29[%c8_105, %c0_106] : memref<64x64xf32, #tpu.memory_space<vmem>>, vector<8x32xf32>
    tpu.vector_store %arg29[%c8_105, %c0_106], %432 {strides = array<i32>} : memref<64x64xf32, #tpu.memory_space<vmem>>, vector<8x32xf32>,
    %c48_107 = arith.constant 48 : index
    %c32_108 = arith.constant 32 : index
    %437 = vector.load %arg29[%c48_107, %c32_108] : memref<64x64xf32, #tpu.memory_space<vmem>>, vector<8x32xf32>
    tpu.vector_store %arg29[%c48_107, %c32_108], %435 {strides = array<i32>} : memref<64x64xf32, #tpu.memory_space<vmem>>, vector<8x32xf32>,
    %438 = vector.extract_strided_slice %346 {offsets = [16, 0], sizes = [8, 128], strides = [1, 1]} : vector<64x128xf32> to vector<8x128xf32>
    %cst_109 = arith.constant dense<0.000000e+00> : vector<8x128xf32>
    %439 = tpu.matmul %432, %352, %cst_109 {dimension_numbers = #tpu.dot_dimension_numbers<[1], [0], [0], [1], [0, 0, 1, 1], [], []>} : vector<8x32xf32>, vector<32x128xf32>, vector<8x128xf32> -> vector<8x128xf32>
    %440 = arith.addf %438, %439 : vector<8x128xf32>
    %441 = vector.extract_strided_slice %351 {offsets = [40, 0], sizes = [8, 128], strides = [1, 1]} : vector<64x128xf32> to vector<8x128xf32>
    %cst_110 = arith.constant dense<0.000000e+00> : vector<8x128xf32>
    %442 = tpu.matmul %435, %353, %cst_110 {dimension_numbers = #tpu.dot_dimension_numbers<[1], [0], [0], [1], [0, 0, 1, 1], [], []>} : vector<8x32xf32>, vector<32x128xf32>, vector<8x128xf32> -> vector<8x128xf32>
    %443 = arith.addf %441, %442 : vector<8x128xf32>
    %444 = vector.extract_strided_slice %440 {offsets = [0, 0], sizes = [8, 96], strides = [1, 1]} : vector<8x128xf32> to vector<8x96xf32>
    %445 = arith.negf %444 : vector<8x96xf32>
    %446 = math.exp %445 : vector<8x96xf32>
    %cst_111 = arith.constant 1.000000e+00 : f32
    %447 = vector.broadcast %cst_111 : f32 to vector<8x96xf32>
    %448 = arith.addf %447, %446 : vector<8x96xf32>
    %449 = arith.divf %447, %448 : vector<8x96xf32>
    %450 = vector.extract_strided_slice %443 {offsets = [0, 0], sizes = [8, 96], strides = [1, 1]} : vector<8x128xf32> to vector<8x96xf32>
    %451 = arith.negf %450 : vector<8x96xf32>
    %452 = math.exp %451 : vector<8x96xf32>
    %cst_112 = arith.constant 1.000000e+00 : f32
    %453 = vector.broadcast %cst_112 : f32 to vector<8x96xf32>
    %454 = arith.addf %453, %452 : vector<8x96xf32>
    %455 = arith.divf %453, %454 : vector<8x96xf32>
    %456 = vector.extract_strided_slice %440 {offsets = [0, 96], sizes = [8, 32], strides = [1, 1]} : vector<8x128xf32> to vector<8x32xf32>
    %457 = math.tanh %456 : vector<8x32xf32>
    %458 = vector.extract_strided_slice %443 {offsets = [0, 96], sizes = [8, 32], strides = [1, 1]} : vector<8x128xf32> to vector<8x32xf32>
    %459 = math.tanh %458 : vector<8x32xf32>
    %460 = vector.extract_strided_slice %449 {offsets = [0, 32], sizes = [8, 32], strides = [1, 1]} : vector<8x96xf32> to vector<8x32xf32>
    %461 = arith.mulf %460, %424 : vector<8x32xf32>
    %462 = vector.extract_strided_slice %449 {offsets = [0, 0], sizes = [8, 32], strides = [1, 1]} : vector<8x96xf32> to vector<8x32xf32>
    %463 = arith.mulf %462, %457 : vector<8x32xf32>
    %464 = arith.addf %461, %463 : vector<8x32xf32>
    %465 = vector.extract_strided_slice %455 {offsets = [0, 32], sizes = [8, 32], strides = [1, 1]} : vector<8x96xf32> to vector<8x32xf32>
    %466 = arith.mulf %465, %429 : vector<8x32xf32>
    %467 = vector.extract_strided_slice %455 {offsets = [0, 0], sizes = [8, 32], strides = [1, 1]} : vector<8x96xf32> to vector<8x32xf32>
    %468 = arith.mulf %467, %459 : vector<8x32xf32>
    %469 = arith.addf %466, %468 : vector<8x32xf32>
    %470 = vector.extract_strided_slice %449 {offsets = [0, 64], sizes = [8, 32], strides = [1, 1]} : vector<8x96xf32> to vector<8x32xf32>
    %471 = math.tanh %464 : vector<8x32xf32>
    %472 = arith.mulf %470, %471 : vector<8x32xf32>
    %473 = vector.extract_strided_slice %455 {offsets = [0, 64], sizes = [8, 32], strides = [1, 1]} : vector<8x96xf32> to vector<8x32xf32>
    %474 = math.tanh %469 : vector<8x32xf32>
    %475 = arith.mulf %473, %474 : vector<8x32xf32>
    %c16_113 = arith.constant 16 : index
    %c0_114 = arith.constant 0 : index
    %476 = vector.load %arg29[%c16_113, %c0_114] : memref<64x64xf32, #tpu.memory_space<vmem>>, vector<8x32xf32>
    tpu.vector_store %arg29[%c16_113, %c0_114], %472 {strides = array<i32>} : memref<64x64xf32, #tpu.memory_space<vmem>>, vector<8x32xf32>,
    %c40_115 = arith.constant 40 : index
    %c32_116 = arith.constant 32 : index
    %477 = vector.load %arg29[%c40_115, %c32_116] : memref<64x64xf32, #tpu.memory_space<vmem>>, vector<8x32xf32>
    tpu.vector_store %arg29[%c40_115, %c32_116], %475 {strides = array<i32>} : memref<64x64xf32, #tpu.memory_space<vmem>>, vector<8x32xf32>,
    %478 = vector.extract_strided_slice %346 {offsets = [24, 0], sizes = [8, 128], strides = [1, 1]} : vector<64x128xf32> to vector<8x128xf32>
    %cst_117 = arith.constant dense<0.000000e+00> : vector<8x128xf32>
    %479 = tpu.matmul %472, %352, %cst_117 {dimension_numbers = #tpu.dot_dimension_numbers<[1], [0], [0], [1], [0, 0, 1, 1], [], []>} : vector<8x32xf32>, vector<32x128xf32>, vector<8x128xf32> -> vector<8x128xf32>
    %480 = arith.addf %478, %479 : vector<8x128xf32>
    %481 = vector.extract_strided_slice %351 {offsets = [32, 0], sizes = [8, 128], strides = [1, 1]} : vector<64x128xf32> to vector<8x128xf32>
    %cst_118 = arith.constant dense<0.000000e+00> : vector<8x128xf32>
    %482 = tpu.matmul %475, %353, %cst_118 {dimension_numbers = #tpu.dot_dimension_numbers<[1], [0], [0], [1], [0, 0, 1, 1], [], []>} : vector<8x32xf32>, vector<32x128xf32>, vector<8x128xf32> -> vector<8x128xf32>
    %483 = arith.addf %481, %482 : vector<8x128xf32>
    %484 = vector.extract_strided_slice %480 {offsets = [0, 0], sizes = [8, 96], strides = [1, 1]} : vector<8x128xf32> to vector<8x96xf32>
    %485 = arith.negf %484 : vector<8x96xf32>
    %486 = math.exp %485 : vector<8x96xf32>
    %cst_119 = arith.constant 1.000000e+00 : f32
    %487 = vector.broadcast %cst_119 : f32 to vector<8x96xf32>
    %488 = arith.addf %487, %486 : vector<8x96xf32>
    %489 = arith.divf %487, %488 : vector<8x96xf32>
    %490 = vector.extract_strided_slice %483 {offsets = [0, 0], sizes = [8, 96], strides = [1, 1]} : vector<8x128xf32> to vector<8x96xf32>
    %491 = arith.negf %490 : vector<8x96xf32>
    %492 = math.exp %491 : vector<8x96xf32>
    %cst_120 = arith.constant 1.000000e+00 : f32
    %493 = vector.broadcast %cst_120 : f32 to vector<8x96xf32>
    %494 = arith.addf %493, %492 : vector<8x96xf32>
    %495 = arith.divf %493, %494 : vector<8x96xf32>
    %496 = vector.extract_strided_slice %480 {offsets = [0, 96], sizes = [8, 32], strides = [1, 1]} : vector<8x128xf32> to vector<8x32xf32>
    %497 = math.tanh %496 : vector<8x32xf32>
    %498 = vector.extract_strided_slice %483 {offsets = [0, 96], sizes = [8, 32], strides = [1, 1]} : vector<8x128xf32> to vector<8x32xf32>
    %499 = math.tanh %498 : vector<8x32xf32>
    %500 = vector.extract_strided_slice %489 {offsets = [0, 32], sizes = [8, 32], strides = [1, 1]} : vector<8x96xf32> to vector<8x32xf32>
    %501 = arith.mulf %500, %464 : vector<8x32xf32>
    %502 = vector.extract_strided_slice %489 {offsets = [0, 0], sizes = [8, 32], strides = [1, 1]} : vector<8x96xf32> to vector<8x32xf32>
    %503 = arith.mulf %502, %497 : vector<8x32xf32>
    %504 = arith.addf %501, %503 : vector<8x32xf32>
    %505 = vector.extract_strided_slice %495 {offsets = [0, 32], sizes = [8, 32], strides = [1, 1]} : vector<8x96xf32> to vector<8x32xf32>
    %506 = arith.mulf %505, %469 : vector<8x32xf32>
    %507 = vector.extract_strided_slice %495 {offsets = [0, 0], sizes = [8, 32], strides = [1, 1]} : vector<8x96xf32> to vector<8x32xf32>
    %508 = arith.mulf %507, %499 : vector<8x32xf32>
    %509 = arith.addf %506, %508 : vector<8x32xf32>
    %510 = vector.extract_strided_slice %489 {offsets = [0, 64], sizes = [8, 32], strides = [1, 1]} : vector<8x96xf32> to vector<8x32xf32>
    %511 = math.tanh %504 : vector<8x32xf32>
    %512 = arith.mulf %510, %511 : vector<8x32xf32>
    %513 = vector.extract_strided_slice %495 {offsets = [0, 64], sizes = [8, 32], strides = [1, 1]} : vector<8x96xf32> to vector<8x32xf32>
    %514 = math.tanh %509 : vector<8x32xf32>
    %515 = arith.mulf %513, %514 : vector<8x32xf32>
    %c24_121 = arith.constant 24 : index
    %c0_122 = arith.constant 0 : index
    %516 = vector.load %arg29[%c24_121, %c0_122] : memref<64x64xf32, #tpu.memory_space<vmem>>, vector<8x32xf32>
    tpu.vector_store %arg29[%c24_121, %c0_122], %512 {strides = array<i32>} : memref<64x64xf32, #tpu.memory_space<vmem>>, vector<8x32xf32>,
    %c32_123 = arith.constant 32 : index
    %c32_124 = arith.constant 32 : index
    %517 = vector.load %arg29[%c32_123, %c32_124] : memref<64x64xf32, #tpu.memory_space<vmem>>, vector<8x32xf32>
    tpu.vector_store %arg29[%c32_123, %c32_124], %515 {strides = array<i32>} : memref<64x64xf32, #tpu.memory_space<vmem>>, vector<8x32xf32>,
    %518 = vector.extract_strided_slice %346 {offsets = [32, 0], sizes = [8, 128], strides = [1, 1]} : vector<64x128xf32> to vector<8x128xf32>
    %cst_125 = arith.constant dense<0.000000e+00> : vector<8x128xf32>
    %519 = tpu.matmul %512, %352, %cst_125 {dimension_numbers = #tpu.dot_dimension_numbers<[1], [0], [0], [1], [0, 0, 1, 1], [], []>} : vector<8x32xf32>, vector<32x128xf32>, vector<8x128xf32> -> vector<8x128xf32>
    %520 = arith.addf %518, %519 : vector<8x128xf32>
    %521 = vector.extract_strided_slice %351 {offsets = [24, 0], sizes = [8, 128], strides = [1, 1]} : vector<64x128xf32> to vector<8x128xf32>
    %cst_126 = arith.constant dense<0.000000e+00> : vector<8x128xf32>
    %522 = tpu.matmul %515, %353, %cst_126 {dimension_numbers = #tpu.dot_dimension_numbers<[1], [0], [0], [1], [0, 0, 1, 1], [], []>} : vector<8x32xf32>, vector<32x128xf32>, vector<8x128xf32> -> vector<8x128xf32>
    %523 = arith.addf %521, %522 : vector<8x128xf32>
    %524 = vector.extract_strided_slice %520 {offsets = [0, 0], sizes = [8, 96], strides = [1, 1]} : vector<8x128xf32> to vector<8x96xf32>
    %525 = arith.negf %524 : vector<8x96xf32>
    %526 = math.exp %525 : vector<8x96xf32>
    %cst_127 = arith.constant 1.000000e+00 : f32
    %527 = vector.broadcast %cst_127 : f32 to vector<8x96xf32>
    %528 = arith.addf %527, %526 : vector<8x96xf32>
    %529 = arith.divf %527, %528 : vector<8x96xf32>
    %530 = vector.extract_strided_slice %523 {offsets = [0, 0], sizes = [8, 96], strides = [1, 1]} : vector<8x128xf32> to vector<8x96xf32>
    %531 = arith.negf %530 : vector<8x96xf32>
    %532 = math.exp %531 : vector<8x96xf32>
    %cst_128 = arith.constant 1.000000e+00 : f32
    %533 = vector.broadcast %cst_128 : f32 to vector<8x96xf32>
    %534 = arith.addf %533, %532 : vector<8x96xf32>
    %535 = arith.divf %533, %534 : vector<8x96xf32>
    %536 = vector.extract_strided_slice %520 {offsets = [0, 96], sizes = [8, 32], strides = [1, 1]} : vector<8x128xf32> to vector<8x32xf32>
    %537 = math.tanh %536 : vector<8x32xf32>
    %538 = vector.extract_strided_slice %523 {offsets = [0, 96], sizes = [8, 32], strides = [1, 1]} : vector<8x128xf32> to vector<8x32xf32>
    %539 = math.tanh %538 : vector<8x32xf32>
    %540 = vector.extract_strided_slice %529 {offsets = [0, 32], sizes = [8, 32], strides = [1, 1]} : vector<8x96xf32> to vector<8x32xf32>
    %541 = arith.mulf %540, %504 : vector<8x32xf32>
    %542 = vector.extract_strided_slice %529 {offsets = [0, 0], sizes = [8, 32], strides = [1, 1]} : vector<8x96xf32> to vector<8x32xf32>
    %543 = arith.mulf %542, %537 : vector<8x32xf32>
    %544 = arith.addf %541, %543 : vector<8x32xf32>
    %545 = vector.extract_strided_slice %535 {offsets = [0, 32], sizes = [8, 32], strides = [1, 1]} : vector<8x96xf32> to vector<8x32xf32>
    %546 = arith.mulf %545, %509 : vector<8x32xf32>
    %547 = vector.extract_strided_slice %535 {offsets = [0, 0], sizes = [8, 32], strides = [1, 1]} : vector<8x96xf32> to vector<8x32xf32>
    %548 = arith.mulf %547, %539 : vector<8x32xf32>
    %549 = arith.addf %546, %548 : vector<8x32xf32>
    %550 = vector.extract_strided_slice %529 {offsets = [0, 64], sizes = [8, 32], strides = [1, 1]} : vector<8x96xf32> to vector<8x32xf32>
    %551 = math.tanh %544 : vector<8x32xf32>
    %552 = arith.mulf %550, %551 : vector<8x32xf32>
    %553 = vector.extract_strided_slice %535 {offsets = [0, 64], sizes = [8, 32], strides = [1, 1]} : vector<8x96xf32> to vector<8x32xf32>
    %554 = math.tanh %549 : vector<8x32xf32>
    %555 = arith.mulf %553, %554 : vector<8x32xf32>
    %c32_129 = arith.constant 32 : index
    %c0_130 = arith.constant 0 : index
    %556 = vector.load %arg29[%c32_129, %c0_130] : memref<64x64xf32, #tpu.memory_space<vmem>>, vector<8x32xf32>
    tpu.vector_store %arg29[%c32_129, %c0_130], %552 {strides = array<i32>} : memref<64x64xf32, #tpu.memory_space<vmem>>, vector<8x32xf32>,
    %c24_131 = arith.constant 24 : index
    %c32_132 = arith.constant 32 : index
    %557 = vector.load %arg29[%c24_131, %c32_132] : memref<64x64xf32, #tpu.memory_space<vmem>>, vector<8x32xf32>
    tpu.vector_store %arg29[%c24_131, %c32_132], %555 {strides = array<i32>} : memref<64x64xf32, #tpu.memory_space<vmem>>, vector<8x32xf32>,
    %558 = vector.extract_strided_slice %346 {offsets = [40, 0], sizes = [8, 128], strides = [1, 1]} : vector<64x128xf32> to vector<8x128xf32>
    %cst_133 = arith.constant dense<0.000000e+00> : vector<8x128xf32>
    %559 = tpu.matmul %552, %352, %cst_133 {dimension_numbers = #tpu.dot_dimension_numbers<[1], [0], [0], [1], [0, 0, 1, 1], [], []>} : vector<8x32xf32>, vector<32x128xf32>, vector<8x128xf32> -> vector<8x128xf32>
    %560 = arith.addf %558, %559 : vector<8x128xf32>
    %561 = vector.extract_strided_slice %351 {offsets = [16, 0], sizes = [8, 128], strides = [1, 1]} : vector<64x128xf32> to vector<8x128xf32>
    %cst_134 = arith.constant dense<0.000000e+00> : vector<8x128xf32>
    %562 = tpu.matmul %555, %353, %cst_134 {dimension_numbers = #tpu.dot_dimension_numbers<[1], [0], [0], [1], [0, 0, 1, 1], [], []>} : vector<8x32xf32>, vector<32x128xf32>, vector<8x128xf32> -> vector<8x128xf32>
    %563 = arith.addf %561, %562 : vector<8x128xf32>
    %564 = vector.extract_strided_slice %560 {offsets = [0, 0], sizes = [8, 96], strides = [1, 1]} : vector<8x128xf32> to vector<8x96xf32>
    %565 = arith.negf %564 : vector<8x96xf32>
    %566 = math.exp %565 : vector<8x96xf32>
    %cst_135 = arith.constant 1.000000e+00 : f32
    %567 = vector.broadcast %cst_135 : f32 to vector<8x96xf32>
    %568 = arith.addf %567, %566 : vector<8x96xf32>
    %569 = arith.divf %567, %568 : vector<8x96xf32>
    %570 = vector.extract_strided_slice %563 {offsets = [0, 0], sizes = [8, 96], strides = [1, 1]} : vector<8x128xf32> to vector<8x96xf32>
    %571 = arith.negf %570 : vector<8x96xf32>
    %572 = math.exp %571 : vector<8x96xf32>
    %cst_136 = arith.constant 1.000000e+00 : f32
    %573 = vector.broadcast %cst_136 : f32 to vector<8x96xf32>
    %574 = arith.addf %573, %572 : vector<8x96xf32>
    %575 = arith.divf %573, %574 : vector<8x96xf32>
    %576 = vector.extract_strided_slice %560 {offsets = [0, 96], sizes = [8, 32], strides = [1, 1]} : vector<8x128xf32> to vector<8x32xf32>
    %577 = math.tanh %576 : vector<8x32xf32>
    %578 = vector.extract_strided_slice %563 {offsets = [0, 96], sizes = [8, 32], strides = [1, 1]} : vector<8x128xf32> to vector<8x32xf32>
    %579 = math.tanh %578 : vector<8x32xf32>
    %580 = vector.extract_strided_slice %569 {offsets = [0, 32], sizes = [8, 32], strides = [1, 1]} : vector<8x96xf32> to vector<8x32xf32>
    %581 = arith.mulf %580, %544 : vector<8x32xf32>
    %582 = vector.extract_strided_slice %569 {offsets = [0, 0], sizes = [8, 32], strides = [1, 1]} : vector<8x96xf32> to vector<8x32xf32>
    %583 = arith.mulf %582, %577 : vector<8x32xf32>
    %584 = arith.addf %581, %583 : vector<8x32xf32>
    %585 = vector.extract_strided_slice %575 {offsets = [0, 32], sizes = [8, 32], strides = [1, 1]} : vector<8x96xf32> to vector<8x32xf32>
    %586 = arith.mulf %585, %549 : vector<8x32xf32>
    %587 = vector.extract_strided_slice %575 {offsets = [0, 0], sizes = [8, 32], strides = [1, 1]} : vector<8x96xf32> to vector<8x32xf32>
    %588 = arith.mulf %587, %579 : vector<8x32xf32>
    %589 = arith.addf %586, %588 : vector<8x32xf32>
    %590 = vector.extract_strided_slice %569 {offsets = [0, 64], sizes = [8, 32], strides = [1, 1]} : vector<8x96xf32> to vector<8x32xf32>
    %591 = math.tanh %584 : vector<8x32xf32>
    %592 = arith.mulf %590, %591 : vector<8x32xf32>
    %593 = vector.extract_strided_slice %575 {offsets = [0, 64], sizes = [8, 32], strides = [1, 1]} : vector<8x96xf32> to vector<8x32xf32>
    %594 = math.tanh %589 : vector<8x32xf32>
    %595 = arith.mulf %593, %594 : vector<8x32xf32>
    %c40_137 = arith.constant 40 : index
    %c0_138 = arith.constant 0 : index
    %596 = vector.load %arg29[%c40_137, %c0_138] : memref<64x64xf32, #tpu.memory_space<vmem>>, vector<8x32xf32>
    tpu.vector_store %arg29[%c40_137, %c0_138], %592 {strides = array<i32>} : memref<64x64xf32, #tpu.memory_space<vmem>>, vector<8x32xf32>,
    %c16_139 = arith.constant 16 : index
    %c32_140 = arith.constant 32 : index
    %597 = vector.load %arg29[%c16_139, %c32_140] : memref<64x64xf32, #tpu.memory_space<vmem>>, vector<8x32xf32>
    tpu.vector_store %arg29[%c16_139, %c32_140], %595 {strides = array<i32>} : memref<64x64xf32, #tpu.memory_space<vmem>>, vector<8x32xf32>,
    %598 = vector.extract_strided_slice %346 {offsets = [48, 0], sizes = [8, 128], strides = [1, 1]} : vector<64x128xf32> to vector<8x128xf32>
    %cst_141 = arith.constant dense<0.000000e+00> : vector<8x128xf32>
    %599 = tpu.matmul %592, %352, %cst_141 {dimension_numbers = #tpu.dot_dimension_numbers<[1], [0], [0], [1], [0, 0, 1, 1], [], []>} : vector<8x32xf32>, vector<32x128xf32>, vector<8x128xf32> -> vector<8x128xf32>
    %600 = arith.addf %598, %599 : vector<8x128xf32>
    %601 = vector.extract_strided_slice %351 {offsets = [8, 0], sizes = [8, 128], strides = [1, 1]} : vector<64x128xf32> to vector<8x128xf32>
    %cst_142 = arith.constant dense<0.000000e+00> : vector<8x128xf32>
    %602 = tpu.matmul %595, %353, %cst_142 {dimension_numbers = #tpu.dot_dimension_numbers<[1], [0], [0], [1], [0, 0, 1, 1], [], []>} : vector<8x32xf32>, vector<32x128xf32>, vector<8x128xf32> -> vector<8x128xf32>
    %603 = arith.addf %601, %602 : vector<8x128xf32>
    %604 = vector.extract_strided_slice %600 {offsets = [0, 0], sizes = [8, 96], strides = [1, 1]} : vector<8x128xf32> to vector<8x96xf32>
    %605 = arith.negf %604 : vector<8x96xf32>
    %606 = math.exp %605 : vector<8x96xf32>
    %cst_143 = arith.constant 1.000000e+00 : f32
    %607 = vector.broadcast %cst_143 : f32 to vector<8x96xf32>
    %608 = arith.addf %607, %606 : vector<8x96xf32>
    %609 = arith.divf %607, %608 : vector<8x96xf32>
    %610 = vector.extract_strided_slice %603 {offsets = [0, 0], sizes = [8, 96], strides = [1, 1]} : vector<8x128xf32> to vector<8x96xf32>
    %611 = arith.negf %610 : vector<8x96xf32>
    %612 = math.exp %611 : vector<8x96xf32>
    %cst_144 = arith.constant 1.000000e+00 : f32
    %613 = vector.broadcast %cst_144 : f32 to vector<8x96xf32>
    %614 = arith.addf %613, %612 : vector<8x96xf32>
    %615 = arith.divf %613, %614 : vector<8x96xf32>
    %616 = vector.extract_strided_slice %600 {offsets = [0, 96], sizes = [8, 32], strides = [1, 1]} : vector<8x128xf32> to vector<8x32xf32>
    %617 = math.tanh %616 : vector<8x32xf32>
    %618 = vector.extract_strided_slice %603 {offsets = [0, 96], sizes = [8, 32], strides = [1, 1]} : vector<8x128xf32> to vector<8x32xf32>
    %619 = math.tanh %618 : vector<8x32xf32>
    %620 = vector.extract_strided_slice %609 {offsets = [0, 32], sizes = [8, 32], strides = [1, 1]} : vector<8x96xf32> to vector<8x32xf32>
    %621 = arith.mulf %620, %584 : vector<8x32xf32>
    %622 = vector.extract_strided_slice %609 {offsets = [0, 0], sizes = [8, 32], strides = [1, 1]} : vector<8x96xf32> to vector<8x32xf32>
    %623 = arith.mulf %622, %617 : vector<8x32xf32>
    %624 = arith.addf %621, %623 : vector<8x32xf32>
    %625 = vector.extract_strided_slice %615 {offsets = [0, 32], sizes = [8, 32], strides = [1, 1]} : vector<8x96xf32> to vector<8x32xf32>
    %626 = arith.mulf %625, %589 : vector<8x32xf32>
    %627 = vector.extract_strided_slice %615 {offsets = [0, 0], sizes = [8, 32], strides = [1, 1]} : vector<8x96xf32> to vector<8x32xf32>
    %628 = arith.mulf %627, %619 : vector<8x32xf32>
    %629 = arith.addf %626, %628 : vector<8x32xf32>
    %630 = vector.extract_strided_slice %609 {offsets = [0, 64], sizes = [8, 32], strides = [1, 1]} : vector<8x96xf32> to vector<8x32xf32>
    %631 = math.tanh %624 : vector<8x32xf32>
    %632 = arith.mulf %630, %631 : vector<8x32xf32>
    %633 = vector.extract_strided_slice %615 {offsets = [0, 64], sizes = [8, 32], strides = [1, 1]} : vector<8x96xf32> to vector<8x32xf32>
    %634 = math.tanh %629 : vector<8x32xf32>
    %635 = arith.mulf %633, %634 : vector<8x32xf32>
    %c48_145 = arith.constant 48 : index
    %c0_146 = arith.constant 0 : index
    %636 = vector.load %arg29[%c48_145, %c0_146] : memref<64x64xf32, #tpu.memory_space<vmem>>, vector<8x32xf32>
    tpu.vector_store %arg29[%c48_145, %c0_146], %632 {strides = array<i32>} : memref<64x64xf32, #tpu.memory_space<vmem>>, vector<8x32xf32>,
    %c8_147 = arith.constant 8 : index
    %c32_148 = arith.constant 32 : index
    %637 = vector.load %arg29[%c8_147, %c32_148] : memref<64x64xf32, #tpu.memory_space<vmem>>, vector<8x32xf32>
    tpu.vector_store %arg29[%c8_147, %c32_148], %635 {strides = array<i32>} : memref<64x64xf32, #tpu.memory_space<vmem>>, vector<8x32xf32>,
    %638 = vector.extract_strided_slice %346 {offsets = [56, 0], sizes = [8, 128], strides = [1, 1]} : vector<64x128xf32> to vector<8x128xf32>
    %cst_149 = arith.constant dense<0.000000e+00> : vector<8x128xf32>
    %639 = tpu.matmul %632, %352, %cst_149 {dimension_numbers = #tpu.dot_dimension_numbers<[1], [0], [0], [1], [0, 0, 1, 1], [], []>} : vector<8x32xf32>, vector<32x128xf32>, vector<8x128xf32> -> vector<8x128xf32>
    %640 = arith.addf %638, %639 : vector<8x128xf32>
    %641 = vector.extract_strided_slice %351 {offsets = [0, 0], sizes = [8, 128], strides = [1, 1]} : vector<64x128xf32> to vector<8x128xf32>
    %cst_150 = arith.constant dense<0.000000e+00> : vector<8x128xf32>
    %642 = tpu.matmul %635, %353, %cst_150 {dimension_numbers = #tpu.dot_dimension_numbers<[1], [0], [0], [1], [0, 0, 1, 1], [], []>} : vector<8x32xf32>, vector<32x128xf32>, vector<8x128xf32> -> vector<8x128xf32>
    %643 = arith.addf %641, %642 : vector<8x128xf32>
    %644 = vector.extract_strided_slice %640 {offsets = [0, 0], sizes = [8, 96], strides = [1, 1]} : vector<8x128xf32> to vector<8x96xf32>
    %645 = arith.negf %644 : vector<8x96xf32>
    %646 = math.exp %645 : vector<8x96xf32>
    %cst_151 = arith.constant 1.000000e+00 : f32
    %647 = vector.broadcast %cst_151 : f32 to vector<8x96xf32>
    %648 = arith.addf %647, %646 : vector<8x96xf32>
    %649 = arith.divf %647, %648 : vector<8x96xf32>
    %650 = vector.extract_strided_slice %643 {offsets = [0, 0], sizes = [8, 96], strides = [1, 1]} : vector<8x128xf32> to vector<8x96xf32>
    %651 = arith.negf %650 : vector<8x96xf32>
    %652 = math.exp %651 : vector<8x96xf32>
    %cst_152 = arith.constant 1.000000e+00 : f32
    %653 = vector.broadcast %cst_152 : f32 to vector<8x96xf32>
    %654 = arith.addf %653, %652 : vector<8x96xf32>
    %655 = arith.divf %653, %654 : vector<8x96xf32>
    %656 = vector.extract_strided_slice %640 {offsets = [0, 96], sizes = [8, 32], strides = [1, 1]} : vector<8x128xf32> to vector<8x32xf32>
    %657 = math.tanh %656 : vector<8x32xf32>
    %658 = vector.extract_strided_slice %643 {offsets = [0, 96], sizes = [8, 32], strides = [1, 1]} : vector<8x128xf32> to vector<8x32xf32>
    %659 = math.tanh %658 : vector<8x32xf32>
    %660 = vector.extract_strided_slice %649 {offsets = [0, 32], sizes = [8, 32], strides = [1, 1]} : vector<8x96xf32> to vector<8x32xf32>
    %661 = arith.mulf %660, %624 : vector<8x32xf32>
    %662 = vector.extract_strided_slice %649 {offsets = [0, 0], sizes = [8, 32], strides = [1, 1]} : vector<8x96xf32> to vector<8x32xf32>
    %663 = arith.mulf %662, %657 : vector<8x32xf32>
    %664 = arith.addf %661, %663 : vector<8x32xf32>
    %665 = vector.extract_strided_slice %655 {offsets = [0, 32], sizes = [8, 32], strides = [1, 1]} : vector<8x96xf32> to vector<8x32xf32>
    %666 = arith.mulf %665, %629 : vector<8x32xf32>
    %667 = vector.extract_strided_slice %655 {offsets = [0, 0], sizes = [8, 32], strides = [1, 1]} : vector<8x96xf32> to vector<8x32xf32>
    %668 = arith.mulf %667, %659 : vector<8x32xf32>
    %669 = arith.addf %666, %668 : vector<8x32xf32>
    %670 = vector.extract_strided_slice %649 {offsets = [0, 64], sizes = [8, 32], strides = [1, 1]} : vector<8x96xf32> to vector<8x32xf32>
    %671 = math.tanh %664 : vector<8x32xf32>
    %672 = arith.mulf %670, %671 : vector<8x32xf32>
    %673 = vector.extract_strided_slice %655 {offsets = [0, 64], sizes = [8, 32], strides = [1, 1]} : vector<8x96xf32> to vector<8x32xf32>
    %674 = math.tanh %669 : vector<8x32xf32>
    %675 = arith.mulf %673, %674 : vector<8x32xf32>
    %c56_153 = arith.constant 56 : index
    %c0_154 = arith.constant 0 : index
    %676 = vector.load %arg29[%c56_153, %c0_154] : memref<64x64xf32, #tpu.memory_space<vmem>>, vector<8x32xf32>
    tpu.vector_store %arg29[%c56_153, %c0_154], %672 {strides = array<i32>} : memref<64x64xf32, #tpu.memory_space<vmem>>, vector<8x32xf32>,
    %c0_155 = arith.constant 0 : index
    %c32_156 = arith.constant 32 : index
    %677 = vector.load %arg29[%c0_155, %c32_156] : memref<64x64xf32, #tpu.memory_space<vmem>>, vector<8x32xf32>
    tpu.vector_store %arg29[%c0_155, %c32_156], %675 {strides = array<i32>} : memref<64x64xf32, #tpu.memory_space<vmem>>, vector<8x32xf32>,
    %c0_157 = arith.constant 0 : index
    %c0_158 = arith.constant 0 : index
    %678 = vector.load %arg29[%c0_157, %c0_158] : memref<64x64xf32, #tpu.memory_space<vmem>>, vector<64x64xf32>
    %cst_159 = arith.constant dense<0.000000e+00> : vector<64xf32>
    %679 = vector.multi_reduction <add>, %678, %cst_159 [1] : vector<64x64xf32> to vector<64xf32>
    %680 = vector.shape_cast %679 : vector<64xf32> to vector<64x1xf32>
    %cst_160 = arith.constant 6.400000e+01 : f32
    %681 = vector.broadcast %cst_160 : f32 to vector<64x1xf32>
    %682 = arith.divf %680, %681 : vector<64x1xf32>
    %683 = vector.broadcast %682 : vector<64x1xf32> to vector<64x64xf32>
    %684 = arith.subf %678, %683 : vector<64x64xf32>
    %685 = arith.mulf %684, %684 : vector<64x64xf32>
    %cst_161 = arith.constant dense<0.000000e+00> : vector<64xf32>
    %686 = vector.multi_reduction <add>, %685, %cst_161 [1] : vector<64x64xf32> to vector<64xf32>
    %687 = vector.shape_cast %686 : vector<64xf32> to vector<64x1xf32>
    %cst_162 = arith.constant 6.400000e+01 : f32
    %688 = vector.broadcast %cst_162 : f32 to vector<64x1xf32>
    %689 = arith.divf %687, %688 : vector<64x1xf32>
    %690 = vector.broadcast %682 : vector<64x1xf32> to vector<64x64xf32>
    %691 = arith.subf %678, %690 : vector<64x64xf32>
    %cst_163 = arith.constant 9.99999974E-6 : f32
    %692 = vector.broadcast %cst_163 : f32 to vector<64x1xf32>
    %693 = arith.addf %689, %692 : vector<64x1xf32>
    %694 = math.rsqrt %693 : vector<64x1xf32>
    %695 = vector.broadcast %694 : vector<64x1xf32> to vector<64x64xf32>
    %696 = arith.mulf %691, %695 : vector<64x64xf32>
    %c0_164 = arith.constant 0 : index
    %c0_165 = arith.constant 0 : index
    %697 = vector.load %arg13[%c0_164, %c0_165] : memref<1x64xf32, #tpu.memory_space<vmem>>, vector<1x64xf32>
    %698 = vector.broadcast %697 : vector<1x64xf32> to vector<64x64xf32>
    %699 = arith.mulf %696, %698 : vector<64x64xf32>
    %c0_166 = arith.constant 0 : index
    %c0_167 = arith.constant 0 : index
    %700 = vector.load %arg14[%c0_166, %c0_167] : memref<1x64xf32, #tpu.memory_space<vmem>>, vector<1x64xf32>
    %701 = vector.broadcast %700 : vector<1x64xf32> to vector<64x64xf32>
    %702 = arith.addf %699, %701 : vector<64x64xf32>
    %703 = vector.extract_strided_slice %702 {offsets = [56, 0], sizes = [8, 64], strides = [1, 1]} : vector<64x64xf32> to vector<8x64xf32>
    %c0_168 = arith.constant 0 : index
    %c0_169 = arith.constant 0 : index
    %704 = vector.load %arg15[%c0_168, %c0_169] : memref<64x64xf32, #tpu.memory_space<vmem>>, vector<64x64xf32>
    %cst_170 = arith.constant dense<0.000000e+00> : vector<8x64xf32>
    %705 = tpu.matmul %703, %704, %cst_170 {dimension_numbers = #tpu.dot_dimension_numbers<[1], [0], [0], [1], [0, 0, 1, 1], [], []>} : vector<8x64xf32>, vector<64x64xf32>, vector<8x64xf32> -> vector<8x64xf32>
    %c0_171 = arith.constant 0 : index
    %c0_172 = arith.constant 0 : index
    %706 = vector.load %arg16[%c0_171, %c0_172] : memref<1x64xf32, #tpu.memory_space<vmem>>, vector<1x64xf32>
    %707 = vector.broadcast %706 : vector<1x64xf32> to vector<8x64xf32>
    %708 = arith.addf %705, %707 : vector<8x64xf32>
    %c0_173 = arith.constant 0 : index
    %c0_174 = arith.constant 0 : index
    %709 = vector.load %arg17[%c0_173, %c0_174] : memref<64x128xf32, #tpu.memory_space<vmem>>, vector<64x128xf32>
    %cst_175 = arith.constant dense<0.000000e+00> : vector<64x128xf32>
    %710 = tpu.matmul %702, %709, %cst_175 {dimension_numbers = #tpu.dot_dimension_numbers<[1], [0], [0], [1], [0, 0, 1, 1], [], []>} : vector<64x64xf32>, vector<64x128xf32>, vector<64x128xf32> -> vector<64x128xf32>
    %c0_176 = arith.constant 0 : index
    %c0_177 = arith.constant 0 : index
    %711 = vector.load %arg18[%c0_176, %c0_177] : memref<1x128xf32, #tpu.memory_space<vmem>>, vector<1x128xf32>
    %712 = vector.broadcast %711 : vector<1x128xf32> to vector<64x128xf32>
    %713 = arith.addf %710, %712 : vector<64x128xf32>
    %714 = vector.extract_strided_slice %713 {offsets = [0, 0], sizes = [64, 64], strides = [1, 1]} : vector<64x128xf32> to vector<64x64xf32>
    %715 = vector.extract_strided_slice %713 {offsets = [0, 64], sizes = [64, 64], strides = [1, 1]} : vector<64x128xf32> to vector<64x64xf32>
    %716 = vector.extract_strided_slice %708 {offsets = [0, 0], sizes = [8, 8], strides = [1, 1]} : vector<8x64xf32> to vector<8x8xf32>
    %717 = vector.extract_strided_slice %708 {offsets = [0, 8], sizes = [8, 8], strides = [1, 1]} : vector<8x64xf32> to vector<8x8xf32>
    %718 = vector.extract_strided_slice %708 {offsets = [0, 16], sizes = [8, 8], strides = [1, 1]} : vector<8x64xf32> to vector<8x8xf32>
    %719 = vector.extract_strided_slice %708 {offsets = [0, 24], sizes = [8, 8], strides = [1, 1]} : vector<8x64xf32> to vector<8x8xf32>
    %720 = vector.extract_strided_slice %708 {offsets = [0, 32], sizes = [8, 8], strides = [1, 1]} : vector<8x64xf32> to vector<8x8xf32>
    %721 = vector.extract_strided_slice %708 {offsets = [0, 40], sizes = [8, 8], strides = [1, 1]} : vector<8x64xf32> to vector<8x8xf32>
    %722 = vector.extract_strided_slice %708 {offsets = [0, 48], sizes = [8, 8], strides = [1, 1]} : vector<8x64xf32> to vector<8x8xf32>
    %723 = vector.extract_strided_slice %708 {offsets = [0, 56], sizes = [8, 8], strides = [1, 1]} : vector<8x64xf32> to vector<8x8xf32>
    %724 = vector.shape_cast %716 : vector<8x8xf32> to vector<1x8x8xf32>
    %725 = vector.shape_cast %717 : vector<8x8xf32> to vector<1x8x8xf32>
    %726 = vector.shape_cast %718 : vector<8x8xf32> to vector<1x8x8xf32>
    %727 = vector.shape_cast %719 : vector<8x8xf32> to vector<1x8x8xf32>
    %728 = vector.shape_cast %720 : vector<8x8xf32> to vector<1x8x8xf32>
    %729 = vector.shape_cast %721 : vector<8x8xf32> to vector<1x8x8xf32>
    %730 = vector.shape_cast %722 : vector<8x8xf32> to vector<1x8x8xf32>
    %731 = vector.shape_cast %723 : vector<8x8xf32> to vector<1x8x8xf32>
    %732 = tpu.concatenate %724, %725, %726, %727, %728, %729, %730, %731 in 0 : vector<1x8x8xf32>, vector<1x8x8xf32>, vector<1x8x8xf32>, vector<1x8x8xf32>, vector<1x8x8xf32>, vector<1x8x8xf32>, vector<1x8x8xf32>, vector<1x8x8xf32> -> vector<8x8x8xf32>
    %733 = vector.extract_strided_slice %714 {offsets = [0, 0], sizes = [64, 8], strides = [1, 1]} : vector<64x64xf32> to vector<64x8xf32>
    %734 = vector.extract_strided_slice %714 {offsets = [0, 8], sizes = [64, 8], strides = [1, 1]} : vector<64x64xf32> to vector<64x8xf32>
    %735 = vector.extract_strided_slice %714 {offsets = [0, 16], sizes = [64, 8], strides = [1, 1]} : vector<64x64xf32> to vector<64x8xf32>
    %736 = vector.extract_strided_slice %714 {offsets = [0, 24], sizes = [64, 8], strides = [1, 1]} : vector<64x64xf32> to vector<64x8xf32>
    %737 = vector.extract_strided_slice %714 {offsets = [0, 32], sizes = [64, 8], strides = [1, 1]} : vector<64x64xf32> to vector<64x8xf32>
    %738 = vector.extract_strided_slice %714 {offsets = [0, 40], sizes = [64, 8], strides = [1, 1]} : vector<64x64xf32> to vector<64x8xf32>
    %739 = vector.extract_strided_slice %714 {offsets = [0, 48], sizes = [64, 8], strides = [1, 1]} : vector<64x64xf32> to vector<64x8xf32>
    %740 = vector.extract_strided_slice %714 {offsets = [0, 56], sizes = [64, 8], strides = [1, 1]} : vector<64x64xf32> to vector<64x8xf32>
    %741 = vector.shape_cast %733 : vector<64x8xf32> to vector<1x64x8xf32>
    %742 = vector.shape_cast %734 : vector<64x8xf32> to vector<1x64x8xf32>
    %743 = vector.shape_cast %735 : vector<64x8xf32> to vector<1x64x8xf32>
    %744 = vector.shape_cast %736 : vector<64x8xf32> to vector<1x64x8xf32>
    %745 = vector.shape_cast %737 : vector<64x8xf32> to vector<1x64x8xf32>
    %746 = vector.shape_cast %738 : vector<64x8xf32> to vector<1x64x8xf32>
    %747 = vector.shape_cast %739 : vector<64x8xf32> to vector<1x64x8xf32>
    %748 = vector.shape_cast %740 : vector<64x8xf32> to vector<1x64x8xf32>
    %749 = tpu.concatenate %741, %742, %743, %744, %745, %746, %747, %748 in 0 : vector<1x64x8xf32>, vector<1x64x8xf32>, vector<1x64x8xf32>, vector<1x64x8xf32>, vector<1x64x8xf32>, vector<1x64x8xf32>, vector<1x64x8xf32>, vector<1x64x8xf32> -> vector<8x64x8xf32>
    %750 = vector.extract_strided_slice %715 {offsets = [0, 0], sizes = [64, 8], strides = [1, 1]} : vector<64x64xf32> to vector<64x8xf32>
    %751 = vector.extract_strided_slice %715 {offsets = [0, 8], sizes = [64, 8], strides = [1, 1]} : vector<64x64xf32> to vector<64x8xf32>
    %752 = vector.extract_strided_slice %715 {offsets = [0, 16], sizes = [64, 8], strides = [1, 1]} : vector<64x64xf32> to vector<64x8xf32>
    %753 = vector.extract_strided_slice %715 {offsets = [0, 24], sizes = [64, 8], strides = [1, 1]} : vector<64x64xf32> to vector<64x8xf32>
    %754 = vector.extract_strided_slice %715 {offsets = [0, 32], sizes = [64, 8], strides = [1, 1]} : vector<64x64xf32> to vector<64x8xf32>
    %755 = vector.extract_strided_slice %715 {offsets = [0, 40], sizes = [64, 8], strides = [1, 1]} : vector<64x64xf32> to vector<64x8xf32>
    %756 = vector.extract_strided_slice %715 {offsets = [0, 48], sizes = [64, 8], strides = [1, 1]} : vector<64x64xf32> to vector<64x8xf32>
    %757 = vector.extract_strided_slice %715 {offsets = [0, 56], sizes = [64, 8], strides = [1, 1]} : vector<64x64xf32> to vector<64x8xf32>
    %758 = vector.shape_cast %750 : vector<64x8xf32> to vector<1x64x8xf32>
    %759 = vector.shape_cast %751 : vector<64x8xf32> to vector<1x64x8xf32>
    %760 = vector.shape_cast %752 : vector<64x8xf32> to vector<1x64x8xf32>
    %761 = vector.shape_cast %753 : vector<64x8xf32> to vector<1x64x8xf32>
    %762 = vector.shape_cast %754 : vector<64x8xf32> to vector<1x64x8xf32>
    %763 = vector.shape_cast %755 : vector<64x8xf32> to vector<1x64x8xf32>
    %764 = vector.shape_cast %756 : vector<64x8xf32> to vector<1x64x8xf32>
    %765 = vector.shape_cast %757 : vector<64x8xf32> to vector<1x64x8xf32>
    %766 = tpu.concatenate %758, %759, %760, %761, %762, %763, %764, %765 in 0 : vector<1x64x8xf32>, vector<1x64x8xf32>, vector<1x64x8xf32>, vector<1x64x8xf32>, vector<1x64x8xf32>, vector<1x64x8xf32>, vector<1x64x8xf32>, vector<1x64x8xf32> -> vector<8x64x8xf32>
    %767 = tpu.iota {dimensions = array<i32: 1>} : vector<8x64xi32>
    %768 = tpu.iota {dimensions = array<i32: 0>} : vector<8x64xi32>
    %c8_i32 = arith.constant 8 : i32
    %c0_i32 = arith.constant 0 : i32
    %769 = arith.cmpi eq, %c8_i32, %c0_i32 : i32
    %c1_i32 = arith.constant 1 : i32
    %770 = arith.select %769, %c1_i32, %c8_i32 : i32
    %771 = vector.broadcast %770 : i32 to vector<8x64xi32>
    %772 = arith.remsi %767, %771 : vector<8x64xi32>
    %c0_i32_178 = arith.constant 0 : i32
    %773 = vector.broadcast %c0_i32_178 : i32 to vector<8x64xi32>
    %774 = arith.cmpi ne, %772, %773 : vector<8x64xi32>
    %c0_i32_179 = arith.constant 0 : i32
    %775 = vector.broadcast %c0_i32_179 : i32 to vector<8x64xi32>
    %776 = arith.cmpi slt, %772, %775 : vector<8x64xi32>
    %c0_i32_180 = arith.constant 0 : i32
    %777 = arith.cmpi slt, %770, %c0_i32_180 : i32
    %778 = vector.broadcast %777 : i1 to vector<8x64xi1>
    %779 = vector.broadcast %778 : vector<8x64xi1> to vector<8x64xi1>
    %780 = arith.xori %776, %779 : vector<8x64xi1>
    %781 = arith.andi %780, %774 : vector<8x64xi1>
    %782 = vector.broadcast %770 : i32 to vector<8x64xi32>
    %783 = arith.addi %772, %782 : vector<8x64xi32>
    %784 = arith.select %781, %783, %772 : vector<8x64xi1>, vector<8x64xi32>
    %785 = arith.cmpi eq, %784, %768 : vector<8x64xi32>
    %cst_181 = arith.constant 0.000000e+00 : f32
    %cst_182 = arith.constant -1.000000e+30 : f32
    %786 = vector.broadcast %cst_181 : f32 to vector<8x64xf32>
    %787 = vector.broadcast %cst_182 : f32 to vector<8x64xf32>
    %788 = arith.select %785, %786, %787 : vector<8x64xi1>, vector<8x64xf32>
    %cst_183 = arith.constant dense<0.000000e+00> : vector<8x8x64xf32>
    %789 = tpu.matmul %732, %749, %cst_183 {dimension_numbers = #tpu.dot_dimension_numbers<[2], [2], [1], [1], [0, 0, 0, 1, 1, 1], [0], [0]>} : vector<8x8x8xf32>, vector<8x64x8xf32>, vector<8x8x64xf32> -> vector<8x8x64xf32>
    %cst_184 = arith.constant 0.353553385 : f32
    %790 = vector.broadcast %cst_184 : f32 to vector<8x8x64xf32>
    %791 = arith.mulf %789, %790 : vector<8x8x64xf32>
    %792 = vector.shape_cast %788 : vector<8x64xf32> to vector<1x8x64xf32>
    %793 = vector.broadcast %792 : vector<1x8x64xf32> to vector<8x8x64xf32>
    %794 = arith.addf %791, %793 : vector<8x8x64xf32>
    %cst_185 = arith.constant dense<0xFF800000> : vector<8x8xf32>
    %795 = vector.multi_reduction <maximumf>, %794, %cst_185 [2] : vector<8x8x64xf32> to vector<8x8xf32>
    %796 = vector.shape_cast %795 : vector<8x8xf32> to vector<8x8x1xf32>
    %797 = vector.broadcast %796 : vector<8x8x1xf32> to vector<8x8x64xf32>
    %798 = arith.subf %794, %797 : vector<8x8x64xf32>
    %799 = math.exp %798 : vector<8x8x64xf32>
    %cst_186 = arith.constant dense<0.000000e+00> : vector<8x8xf32>
    %800 = vector.multi_reduction <add>, %799, %cst_186 [2] : vector<8x8x64xf32> to vector<8x8xf32>
    %801 = vector.shape_cast %800 : vector<8x8xf32> to vector<8x8x1xf32>
    %802 = vector.broadcast %801 : vector<8x8x1xf32> to vector<8x8x64xf32>
    %803 = arith.divf %799, %802 : vector<8x8x64xf32>
    %cst_187 = arith.constant dense<0.000000e+00> : vector<8x8x8xf32>
    %804 = tpu.matmul %803, %766, %cst_187 {dimension_numbers = #tpu.dot_dimension_numbers<[2], [1], [1], [2], [0, 0, 0, 1, 1, 2], [0], [0]>} : vector<8x8x64xf32>, vector<8x64x8xf32>, vector<8x8x8xf32> -> vector<8x8x8xf32>
    %805 = vector.extract_strided_slice %804 {offsets = [0, 0, 0], sizes = [1, 8, 8], strides = [1, 1, 1]} : vector<8x8x8xf32> to vector<1x8x8xf32>
    %806 = vector.shape_cast %805 : vector<1x8x8xf32> to vector<8x8xf32>
    %807 = vector.extract_strided_slice %804 {offsets = [1, 0, 0], sizes = [1, 8, 8], strides = [1, 1, 1]} : vector<8x8x8xf32> to vector<1x8x8xf32>
    %808 = vector.shape_cast %807 : vector<1x8x8xf32> to vector<8x8xf32>
    %809 = vector.extract_strided_slice %804 {offsets = [2, 0, 0], sizes = [1, 8, 8], strides = [1, 1, 1]} : vector<8x8x8xf32> to vector<1x8x8xf32>
    %810 = vector.shape_cast %809 : vector<1x8x8xf32> to vector<8x8xf32>
    %811 = vector.extract_strided_slice %804 {offsets = [3, 0, 0], sizes = [1, 8, 8], strides = [1, 1, 1]} : vector<8x8x8xf32> to vector<1x8x8xf32>
    %812 = vector.shape_cast %811 : vector<1x8x8xf32> to vector<8x8xf32>
    %813 = vector.extract_strided_slice %804 {offsets = [4, 0, 0], sizes = [1, 8, 8], strides = [1, 1, 1]} : vector<8x8x8xf32> to vector<1x8x8xf32>
    %814 = vector.shape_cast %813 : vector<1x8x8xf32> to vector<8x8xf32>
    %815 = vector.extract_strided_slice %804 {offsets = [5, 0, 0], sizes = [1, 8, 8], strides = [1, 1, 1]} : vector<8x8x8xf32> to vector<1x8x8xf32>
    %816 = vector.shape_cast %815 : vector<1x8x8xf32> to vector<8x8xf32>
    %817 = vector.extract_strided_slice %804 {offsets = [6, 0, 0], sizes = [1, 8, 8], strides = [1, 1, 1]} : vector<8x8x8xf32> to vector<1x8x8xf32>
    %818 = vector.shape_cast %817 : vector<1x8x8xf32> to vector<8x8xf32>
    %819 = vector.extract_strided_slice %804 {offsets = [7, 0, 0], sizes = [1, 8, 8], strides = [1, 1, 1]} : vector<8x8x8xf32> to vector<1x8x8xf32>
    %820 = vector.shape_cast %819 : vector<1x8x8xf32> to vector<8x8xf32>
    %821 = tpu.concatenate %806, %808, %810, %812, %814, %816, %818, %820 in 1 : vector<8x8xf32>, vector<8x8xf32>, vector<8x8xf32>, vector<8x8xf32>, vector<8x8xf32>, vector<8x8xf32>, vector<8x8xf32>, vector<8x8xf32> -> vector<8x64xf32>
    %c0_188 = arith.constant 0 : index
    %c0_189 = arith.constant 0 : index
    %822 = vector.load %arg19[%c0_188, %c0_189] : memref<64x64xf32, #tpu.memory_space<vmem>>, vector<64x64xf32>
    %cst_190 = arith.constant dense<0.000000e+00> : vector<8x64xf32>
    %823 = tpu.matmul %821, %822, %cst_190 {dimension_numbers = #tpu.dot_dimension_numbers<[1], [0], [0], [1], [0, 0, 1, 1], [], []>} : vector<8x64xf32>, vector<64x64xf32>, vector<8x64xf32> -> vector<8x64xf32>
    %c0_191 = arith.constant 0 : index
    %c0_192 = arith.constant 0 : index
    %824 = vector.load %arg20[%c0_191, %c0_192] : memref<1x64xf32, #tpu.memory_space<vmem>>, vector<1x64xf32>
    %825 = vector.broadcast %824 : vector<1x64xf32> to vector<8x64xf32>
    %826 = arith.addf %823, %825 : vector<8x64xf32>
    %827 = arith.addf %703, %826 : vector<8x64xf32>
    %c0_193 = arith.constant 0 : index
    %c0_194 = arith.constant 0 : index
    %828 = vector.load %arg21[%c0_193, %c0_194] : memref<64x32xf32, #tpu.memory_space<vmem>>, vector<64x32xf32>
    %cst_195 = arith.constant dense<0.000000e+00> : vector<8x32xf32>
    %829 = tpu.matmul %827, %828, %cst_195 {dimension_numbers = #tpu.dot_dimension_numbers<[1], [0], [0], [1], [0, 0, 1, 1], [], []>} : vector<8x64xf32>, vector<64x32xf32>, vector<8x32xf32> -> vector<8x32xf32>
    %c0_196 = arith.constant 0 : index
    %c0_197 = arith.constant 0 : index
    %830 = vector.load %arg22[%c0_196, %c0_197] : memref<1x32xf32, #tpu.memory_space<vmem>>, vector<1x32xf32>
    %831 = vector.broadcast %830 : vector<1x32xf32> to vector<8x32xf32>
    %832 = arith.addf %829, %831 : vector<8x32xf32>
    %cst_198 = arith.constant 0.000000e+00 : f32
    %833 = vector.broadcast %cst_198 : f32 to vector<8x32xf32>
    %834 = arith.maximumf %832, %833 : vector<8x32xf32>
    %c0_199 = arith.constant 0 : index
    %c0_200 = arith.constant 0 : index
    %835 = vector.load %arg23[%c0_199, %c0_200] : memref<32x16xf32, #tpu.memory_space<vmem>>, vector<32x16xf32>
    %cst_201 = arith.constant dense<0.000000e+00> : vector<8x16xf32>
    %836 = tpu.matmul %834, %835, %cst_201 {dimension_numbers = #tpu.dot_dimension_numbers<[1], [0], [0], [1], [0, 0, 1, 1], [], []>} : vector<8x32xf32>, vector<32x16xf32>, vector<8x16xf32> -> vector<8x16xf32>
    %c0_202 = arith.constant 0 : index
    %c0_203 = arith.constant 0 : index
    %837 = vector.load %arg24[%c0_202, %c0_203] : memref<1x16xf32, #tpu.memory_space<vmem>>, vector<1x16xf32>
    %838 = vector.broadcast %837 : vector<1x16xf32> to vector<8x16xf32>
    %839 = arith.addf %836, %838 : vector<8x16xf32>
    %cst_204 = arith.constant 0.000000e+00 : f32
    %840 = vector.broadcast %cst_204 : f32 to vector<8x16xf32>
    %841 = arith.maximumf %839, %840 : vector<8x16xf32>
    %c0_205 = arith.constant 0 : index
    %c0_206 = arith.constant 0 : index
    %842 = vector.load %arg25[%c0_205, %c0_206] : memref<16x4xf32, #tpu.memory_space<vmem>>, vector<16x4xf32>
    %cst_207 = arith.constant dense<0.000000e+00> : vector<8x4xf32>
    %843 = tpu.matmul %841, %842, %cst_207 {dimension_numbers = #tpu.dot_dimension_numbers<[1], [0], [0], [1], [0, 0, 1, 1], [], []>} : vector<8x16xf32>, vector<16x4xf32>, vector<8x4xf32> -> vector<8x4xf32>
    %c0_208 = arith.constant 0 : index
    %c0_209 = arith.constant 0 : index
    %844 = vector.load %arg26[%c0_208, %c0_209] : memref<1x4xf32, #tpu.memory_space<vmem>>, vector<1x4xf32>
    %845 = vector.broadcast %844 : vector<1x4xf32> to vector<8x4xf32>
    %846 = arith.addf %843, %845 : vector<8x4xf32>
    %847 = tpu.iota {dimensions = array<i32: 1>} : vector<8x4xi32>
    %c0_i32_210 = arith.constant 0 : i32
    %848 = vector.broadcast %c0_i32_210 : i32 to vector<8x4xi32>
    %849 = arith.cmpi eq, %847, %848 : vector<8x4xi32>
    %850 = arith.negf %846 : vector<8x4xf32>
    %851 = math.exp %850 : vector<8x4xf32>
    %cst_211 = arith.constant 1.000000e+00 : f32
    %852 = vector.broadcast %cst_211 : f32 to vector<8x4xf32>
    %853 = arith.addf %852, %851 : vector<8x4xf32>
    %854 = arith.divf %852, %853 : vector<8x4xf32>
    %855 = arith.select %849, %846, %854 : vector<8x4xi1>, vector<8x4xf32>
    %c0_212 = arith.constant 0 : index
    %c0_213 = arith.constant 0 : index
    %856 = vector.load %arg27[%c0_212, %c0_213] : memref<8x4xf32, #tpu.memory_space<vmem>>, vector<8x4xf32>
    tpu.vector_store %arg27[%c0_212, %c0_213], %855 {strides = array<i32>} : memref<8x4xf32, #tpu.memory_space<vmem>>, vector<8x4xf32>,
    return
  }
}

</mosaic_0001>

<bundles_post_ra>
// kernel: _lambda_.1
= control target key start
LH: loop header
LB: loop body
LE: loop exit
PB: predicated region body
PF: predicated region fallthrough
CT: control target
= control target key end

     0   :  { %s11252_s0 = inlined_call_operand.vmem [shape: f32[64,1], index: 0, kind: input, shape index: {}]   ;;  %s11253_s1 = inlined_call_operand.hbm [shape: f32[1,128], index: 1, kind: input, shape index: {}]   ;;  %s11254_s2 = inlined_call_operand.hbm [shape: f32[1,128], index: 2, kind: input, shape index: {}]   ;;  %s11255_s3 = inlined_call_operand.hbm [shape: f32[1,128], index: 3, kind: input, shape index: {}]   ;;  %s11256_s4 = inlined_call_operand.hbm [shape: f32[1,128], index: 4, kind: input, shape index: {}]   ;;  %s11257_s5 = inlined_call_operand.hbm [shape: f32[32,128], index: 5, kind: input, shape index: {}]   ;;  %s11258_s6 = inlined_call_operand.hbm [shape: f32[32,128], index: 6, kind: input, shape index: {}]   ;;  %s11259_s7 = inlined_call_operand.hbm [shape: f32[64,128], index: 7, kind: input, shape index: {}]   ;;  %s11260_s8 = inlined_call_operand.hbm [shape: f32[64,128], index: 8, kind: input, shape index: {}]   ;;  %s11261_s9 = inlined_call_operand.hbm [shape: f32[1,128], index: 9, kind: input, shape index: {}]   ;;  %s11262_s10 = inlined_call_operand.hbm [shape: f32[1,128], index: 10, kind: input, shape index: {}]   ;;  %s11263_s11 = inlined_call_operand.hbm [shape: f32[32,128], index: 11, kind: input, shape index: {}]   ;;  %s11264_s12 = inlined_call_operand.hbm [shape: f32[32,128], index: 12, kind: input, shape index: {}]   ;;  %s11265_s13 = inlined_call_operand.vmem [shape: f32[1,64], index: 13, kind: input, shape index: {}]   ;;  %s11266_s14 = inlined_call_operand.vmem [shape: f32[1,64], index: 14, kind: input, shape index: {}]   ;;  %s11267_s15 = inlined_call_operand.hbm [shape: f32[64,64], index: 15, kind: input, shape index: {}]   ;;  %s11268_s16 = inlined_call_operand.hbm [shape: f32[1,64], index: 16, kind: input, shape index: {}]   ;;  %s11269_s17 = inlined_call_operand.hbm [shape: f32[64,128], index: 17, kind: input, shape index: {}]   ;;  %s11270_s18 = inlined_call_operand.hbm [shape: f32[1,128], index: 18, kind: input, shape index: {}]   ;;  %s11271_s19 = inlined_call_operand.vmem [shape: f32[64,64], index: 19, kind: input, shape index: {}]   ;;  %s11272_s20 = inlined_call_operand.vmem [shape: f32[1,64], index: 20, kind: input, shape index: {}]   ;;  %s11273_s21 = inlined_call_operand.vmem [shape: f32[64,32], index: 21, kind: input, shape index: {}]   ;;  %s11274_s22 = inlined_call_operand.vmem [shape: f32[1,32], index: 22, kind: input, shape index: {}]   ;;  %s11275_s23 = inlined_call_operand.vmem [shape: f32[32,16], index: 23, kind: input, shape index: {}]   ;;  %s11276_s24 = inlined_call_operand.vmem [shape: f32[1,16], index: 24, kind: input, shape index: {}]   ;;  %s11277_s25 = inlined_call_operand.vmem [shape: f32[16,4], index: 25, kind: input, shape index: {}]   ;;  %s11278_s26 = inlined_call_operand.vmem [shape: f32[1,4], index: 26, kind: input, shape index: {}]   ;;  %s11279_s27 = inlined_call_operand.vmem [shape: f32[8,4], index: 27, kind: output, shape index: {}]  }
   0x1   :  { %11292 = sst [smem:[#allocation38_spill]] %s11252_s0 }
   0x2   :  { %11293 = sst [smem:[#allocation39_spill]] %s11253_s1 }
   0x3   :  { %11294 = sst [smem:[#allocation40_spill]] %s11254_s2 }
   0x4   :  { %11295 = sst [smem:[#allocation41_spill]] %s11255_s3 }
   0x5   :  { %11296 = sst [smem:[#allocation42_spill]] %s11256_s4 }
   0x6   :  { %11297 = sst [smem:[#allocation43_spill]] %s11257_s5 }
   0x7   :  { %11298 = sst [smem:[#allocation44_spill]] %s11258_s6 }
   0x8   :  { %11299 = sst [smem:[#allocation45_spill]] %s11259_s7 }
   0x9   :  { %11300 = sst [smem:[#allocation46_spill]] %s11260_s8 }
   0xa   :  { %11301 = sst [smem:[#allocation47_spill]] %s11261_s9 }
   0xb   :  { %11302 = sst [smem:[#allocation48_spill]] %s11262_s10 }
   0xc   :  { %11303 = sst [smem:[#allocation49_spill]] %s11263_s11 }
   0xd   :  { %11304 = sst [smem:[#allocation50_spill]] %s11276_s24 }
   0xe   :  { %11305 = sst [smem:[#allocation51_spill]] %s11278_s26 }
   0xf   :  { %11306 = sst [smem:[#allocation52_spill]] %s11279_s27 }
  0x10   :  { %32 = vsyncpa [#allocation5], 0 }
  0x11   :  { %33 = vsyncpa [#allocation7], 0 }
  0x12   :  { %34 = vsyncpa [#allocation10], 0 }
  0x13   :  { %35 = vsyncpa [#allocation13], 0 }
  0x14   :  { %36 = vsyncpa [#allocation16], 0 }
  0x15   :  { %37 = vsyncpa [#allocation19], 0 }
  0x16   :  { %38 = vsyncpa [#allocation22], 0 }
  0x17   :  { %39 = vsyncpa [#allocation25], 0 }
  0x18   :  { %40 = vsyncpa [#allocation28], 0  ;;  %s9403_s7 = smov [#allocation6]   ;;  %s9404_s8 = smov [#allocation9]  }
  0x19   :  { %s59_s4 = sshll.u32 %s9403_s7, 4  ;;  %s79_s30 = sshll.u32 %s9404_s8, 4  ;;  %s60_s4 = int_to_ptr.vmem [resolvable:$true] %s59_s4  ;;  %s80_s30 = int_to_ptr.vmem [resolvable:$true] %s79_s30 }
  0x1a   :  { %s11307_s28 = sld [smem:[#allocation40_spill]] }
  0x20   :  { %s9033_s0 = scalar_lea.hbm %s11307_s28, 16 }
  0x21   :  { %p9034_p0 = scmp.ne.s32.totalorder %s11307_s28, %s9033_s0  ;;  %p9037_p1 = scmp.lt.u32.totalorder %s9033_s0, %s11307_s28 }
  0x23   :  { %p9039_p2 = pnand %p9037_p1, %p9034_p0 }
  0x25   :  { %9042 = shalt.err (!%p9039_p2)
}
  0x26   :  { %s9043_s11 = scalar_lea.vmem %s60_s4, 16  ;;  %s9047_s2 = scalar_lea.vmem %s60_s4, 32 }
  0x27   :  { %p9044_p3 = scmp.ne.s32.totalorder %s60_s4, %s9043_s11  ;;  %p9048_p4 = scmp.lt.s32.totalorder %s60_s4, %s60_s4 }
  0x28   :  { %p9049_p5 = scmp.lt.s32.totalorder %s9047_s2, %s9043_s11 }
  0x2a   :  { %p9050_p6 = por %p9049_p5, %p9048_p4 }
  0x2c   :  { %p9051_p7 = pnand %p9050_p6, %p9044_p3 }
  0x2e   :  { %9054 = shalt.err (!%p9051_p7)
}
  0x2f   :  { %62 = dma.hbm_to_vmem [thread:$0]  %s11307_s28, 16, %s60_s4, [#allocation7]  }
  0x30   :  { %s11308_s5 = sld [smem:[#allocation42_spill]] }
  0x36   :  { %s9055_s10 = scalar_lea.hbm %s11308_s5, 16 }
  0x37   :  { %p9056_p8 = scmp.ne.s32.totalorder %s11308_s5, %s9055_s10  ;;  %p9059_p9 = scmp.lt.u32.totalorder %s9055_s10, %s11308_s5 }
  0x39   :  { %p9061_p10 = pnand %p9059_p9, %p9056_p8 }
  0x3b   :  { %9064 = shalt.err (!%p9061_p10)
}
  0x3c   :  { %s9065_s11 = scalar_lea.vmem %s80_s30, 16  ;;  %s9069_s2 = scalar_lea.vmem %s80_s30, 32 }
  0x3d   :  { %p9066_p11 = scmp.ne.s32.totalorder %s80_s30, %s9065_s11  ;;  %p9070_p12 = scmp.lt.s32.totalorder %s80_s30, %s80_s30 }
  0x3e   :  { %p9071_p13 = scmp.lt.s32.totalorder %s9069_s2, %s9065_s11 }
  0x40   :  { %p9072_p0 = por %p9071_p13, %p9070_p12 }
  0x42   :  { %p9073_p1 = pnand %p9072_p0, %p9066_p11 }
  0x44   :  { %9076 = shalt.err (!%p9073_p1)
}
  0x45   :  { %82 = dma.hbm_to_vmem [thread:$0]  %s11308_s5, 16, %s80_s30, [#allocation10]  }
  0x46   :  { %s9405_s3 = smov [#allocation12]   ;;  %s9406_s8 = smov [#allocation15]  }
  0x47   :  { %s100_s7 = sshll.u32 %s9405_s3, 4  ;;  %s124_s9 = sshll.u32 %s9406_s8, 4  ;;  %s101_s7 = int_to_ptr.vmem [resolvable:$true] %s100_s7  ;;  %s9604_s9 = int_to_ptr.vmem [resolvable:$true] %s124_s9 }
  0x48   :  { %s11309_s0 = sld [smem:[#allocation44_spill]] }
  0x4e   :  { %s9077_s1 = scalar_lea.hbm %s11309_s0, 512 }
  0x4f   :  { %p9078_p2 = scmp.ne.s32.totalorder %s11309_s0, %s9077_s1  ;;  %p9081_p3 = scmp.lt.u32.totalorder %s9077_s1, %s11309_s0 }
  0x51   :  { %p9083_p4 = pnand %p9081_p3, %p9078_p2 }
  0x53   :  { %9086 = shalt.err (!%p9083_p4)
}
  0x54   :  { %s9087_s30 = scalar_lea.vmem %s101_s7, 512  ;;  %p9092_p6 = scmp.lt.s32.totalorder %s101_s7, %s101_s7 }
  0x55   :  { %p9088_p5 = scmp.ne.s32.totalorder %s101_s7, %s9087_s30  ;;  %p9093_p7 = scmp.lt.s32.totalorder %s9087_s30, %s9087_s30 }
  0x57   :  { %p9094_p8 = por %p9093_p7, %p9092_p6 }
  0x59   :  { %p9095_p9 = pnand %p9094_p8, %p9088_p5 }
  0x5b   :  { %9098 = shalt.err (!%p9095_p9)
}
  0x5c   :  { %s9407_s5 = smov 128   ;;  %s9408_s4 = smov 8  }
  0x5d   :  { %106 = dma.hbm_to_vmem [thread:$0]  %s11309_s0, 512, %s101_s7, [#allocation13], %s9407_s5, %s9407_s5, %s9408_s4  }
  0x5e   :  { %s11310_s10 = sld [smem:[#allocation46_spill]] }
  0x64   :  { %s9099_s29 = scalar_lea.hbm %s11310_s10, 1024 }
  0x65   :  { %p9100_p10 = scmp.ne.s32.totalorder %s11310_s10, %s9099_s29  ;;  %p9103_p11 = scmp.lt.u32.totalorder %s9099_s29, %s11310_s10 }
  0x67   :  { %p9105_p12 = pnand %p9103_p11, %p9100_p10 }
  0x69   :  { %9108 = shalt.err (!%p9105_p12)
}
  0x6a   :  { %s9109_s30 = scalar_lea.vmem %s9604_s9, 1024  ;;  %p9114_p0 = scmp.lt.s32.totalorder %s9604_s9, %s9604_s9 }
  0x6b   :  { %p9110_p13 = scmp.ne.s32.totalorder %s9604_s9, %s9109_s30  ;;  %p9115_p1 = scmp.lt.s32.totalorder %s9109_s30, %s9109_s30 }
  0x6d   :  { %p9116_p2 = por %p9115_p1, %p9114_p0 }
  0x6f   :  { %p9117_p3 = pnand %p9116_p2, %p9110_p13 }
  0x71   :  { %9120 = shalt.err (!%p9117_p3)
}
  0x72   :  { %130 = dma.hbm_to_vmem [thread:$0]  %s11310_s10, 1024, %s9604_s9, [#allocation16], %s9407_s5, %s9407_s5, %s9408_s4  }
  0x73   :  { %s9409_s28 = smov [#allocation18]   ;;  %s9410_s27 = smov [#allocation21]  }
  0x74   :  { %s147_s3 = sshll.u32 %s9409_s28, 4  ;;  %s168_s8 = sshll.u32 %s9410_s27, 4  ;;  %s148_s3 = int_to_ptr.vmem [resolvable:$true] %s147_s3  ;;  %s9641_s8 = int_to_ptr.vmem [resolvable:$true] %s168_s8 }
  0x75   :  { %s11311_s6 = sld [smem:[#allocation48_spill]] }
  0x7b   :  { %s9121_s11 = scalar_lea.hbm %s11311_s6, 16 }
  0x7c   :  { %p9122_p4 = scmp.ne.s32.totalorder %s11311_s6, %s9121_s11  ;;  %p9125_p5 = scmp.lt.u32.totalorder %s9121_s11, %s11311_s6 }
  0x7e   :  { %p9127_p6 = pnand %p9125_p5, %p9122_p4 }
  0x80   :  { %9130 = shalt.err (!%p9127_p6)
}
  0x81   :  { %s9131_s9 = scalar_lea.vmem %s148_s3, 16  ;;  %s9135_s10 = scalar_lea.vmem %s148_s3, 32 }
  0x82   :  { %p9132_p7 = scmp.ne.s32.totalorder %s148_s3, %s9131_s9  ;;  %p9136_p8 = scmp.lt.s32.totalorder %s148_s3, %s148_s3 }
  0x83   :  { %p9137_p9 = scmp.lt.s32.totalorder %s9135_s10, %s9131_s9 }
  0x85   :  { %p9138_p10 = por %p9137_p9, %p9136_p8 }
  0x87   :  { %p9139_p11 = pnand %p9138_p10, %p9132_p7 }
  0x89   :  { %9142 = shalt.err (!%p9139_p11)
}
  0x8a   :  { %150 = dma.hbm_to_vmem [thread:$0]  %s11311_s6, 16, %s148_s3, [#allocation19]  }
  0x8b   :  { %s9143_s29 = scalar_lea.hbm %s11264_s12, 512 }
  0x8c   :  { %p9144_p12 = scmp.ne.s32.totalorder %s11264_s12, %s9143_s29  ;;  %p9147_p13 = scmp.lt.u32.totalorder %s9143_s29, %s11264_s12 }
  0x8e   :  { %p9149_p0 = pnand %p9147_p13, %p9144_p12 }
  0x90   :  { %9152 = shalt.err (!%p9149_p0)
}
  0x91   :  { %s9153_s2 = scalar_lea.vmem %s9641_s8, 512  ;;  %p9158_p2 = scmp.lt.s32.totalorder %s9641_s8, %s9641_s8 }
  0x92   :  { %p9154_p1 = scmp.ne.s32.totalorder %s9641_s8, %s9153_s2  ;;  %p9159_p3 = scmp.lt.s32.totalorder %s9153_s2, %s9153_s2 }
  0x94   :  { %p9160_p4 = por %p9159_p3, %p9158_p2 }
  0x96   :  { %p9161_p5 = pnand %p9160_p4, %p9154_p1 }
  0x98   :  { %9164 = shalt.err (!%p9161_p5)
}
  0x99   :  { %174 = dma.hbm_to_vmem [thread:$0]  %s11264_s12, 512, %s9641_s8, [#allocation22], %s9407_s5, %s9407_s5, %s9408_s4  }
  0x9a   :  { %s9411_s30 = smov [#allocation24]   ;;  %s9412_s10 = smov [#allocation4]  }
  0x9b   :  { %s197_s9 = sshll.u32 %s9411_s30, 4  ;;  %s49_s7 = sshll.u32 %s9412_s10, 4  ;;  %s198_s9 = int_to_ptr.vmem [resolvable:$true] %s197_s9  ;;  %s50_s7 = int_to_ptr.vmem [resolvable:$true] %s49_s7 }
  0x9c   :  { %s9165_s27 = scalar_lea.hbm %s11268_s16, 16 }
  0x9d   :  { %p9166_p6 = scmp.ne.s32.totalorder %s11268_s16, %s9165_s27  ;;  %p9169_p7 = scmp.lt.u32.totalorder %s9165_s27, %s11268_s16 }
  0x9f   :  { %p9171_p8 = pnand %p9169_p7, %p9166_p6 }
  0xa1   :  { %9174 = shalt.err (!%p9171_p8)
}
  0xa2   :  { %s9175_s12 = scalar_lea.vmem %s198_s9, 16  ;;  %s9179_s8 = scalar_lea.vmem %s198_s9, 32 }
  0xa3   :  { %p9176_p9 = scmp.ne.s32.totalorder %s198_s9, %s9175_s12  ;;  %p9180_p10 = scmp.lt.s32.totalorder %s198_s9, %s198_s9 }
  0xa4   :  { %p9181_p11 = scmp.lt.s32.totalorder %s9179_s8, %s9175_s12 }
  0xa6   :  { %p9182_p12 = por %p9181_p11, %p9180_p10 }
  0xa8   :  { %p9183_p13 = pnand %p9182_p12, %p9176_p9 }
  0xaa   :  { %9186 = shalt.err (!%p9183_p13)
}
  0xab   :  { %200 = dma.hbm_to_vmem [thread:$0]  %s11268_s16, 16, %s198_s9, [#allocation25]  }
  0xac   :  { %s11312_s30 = sld [smem:[#allocation39_spill]] }
  0xb2   :  { %s9187_s10 = scalar_lea.hbm %s11312_s30, 16 }
  0xb3   :  { %p9188_p0 = scmp.ne.s32.totalorder %s11312_s30, %s9187_s10  ;;  %p9191_p1 = scmp.lt.u32.totalorder %s9187_s10, %s11312_s30 }
  0xb5   :  { %p9193_p2 = pnand %p9191_p1, %p9188_p0 }
  0xb7   :  { %9196 = shalt.err (!%p9193_p2)
}
  0xb8   :  { %s9197_s24 = scalar_lea.vmem %s50_s7, 16  ;;  %s9201_s26 = scalar_lea.vmem %s50_s7, 32 }
  0xb9   :  { %p9198_p3 = scmp.ne.s32.totalorder %s50_s7, %s9197_s24  ;;  %p9202_p4 = scmp.lt.s32.totalorder %s50_s7, %s50_s7 }
  0xba   :  { %p9203_p5 = scmp.lt.s32.totalorder %s9201_s26, %s9197_s24 }
  0xbc   :  { %p9204_p6 = por %p9203_p5, %p9202_p4 }
  0xbe   :  { %p9205_p7 = pnand %p9204_p6, %p9198_p3 }
  0xc0   :  { %9208 = shalt.err (!%p9205_p7)
}
  0xc1   :  { %52 = dma.hbm_to_vmem [thread:$0]  %s11312_s30, 16, %s50_s7, [#allocation5]  }
  0xc2   :  { %s9413_s1 = smov [#allocation8]   ;;  %s9414_s8 = smov [#allocation11]  }
  0xc3   :  { %s69_s12 = sshll.u32 %s9413_s1, 4  ;;  %s88_s11 = sshll.u32 %s9414_s8, 4  ;;  %s70_s12 = int_to_ptr.vmem [resolvable:$true] %s69_s12  ;;  %s9699_s11 = int_to_ptr.vmem [resolvable:$true] %s88_s11 }
  0xc4   :  { %s11313_s6 = sld [smem:[#allocation41_spill]] }
  0xca   :  { %s9209_s10 = scalar_lea.hbm %s11313_s6, 16 }
  0xcb   :  { %p9210_p8 = scmp.ne.s32.totalorder %s11313_s6, %s9209_s10  ;;  %p9213_p9 = scmp.lt.u32.totalorder %s9209_s10, %s11313_s6 }
  0xcd   :  { %p9215_p10 = pnand %p9213_p9, %p9210_p8 }
  0xcf   :  { %9218 = shalt.err (!%p9215_p10)
}
  0xd0   :  { %s9219_s7 = scalar_lea.vmem %s70_s12, 16  ;;  %s9223_s30 = scalar_lea.vmem %s70_s12, 32 }
  0xd1   :  { %p9220_p11 = scmp.ne.s32.totalorder %s70_s12, %s9219_s7  ;;  %p9224_p12 = scmp.lt.s32.totalorder %s70_s12, %s70_s12 }
  0xd2   :  { %p9225_p13 = scmp.lt.s32.totalorder %s9223_s30, %s9219_s7 }
  0xd4   :  { %p9226_p0 = por %p9225_p13, %p9224_p12 }
  0xd6   :  { %p9227_p1 = pnand %p9226_p0, %p9220_p11 }
  0xd8   :  { %9230 = shalt.err (!%p9227_p1)
}
  0xd9   :  { %72 = dma.hbm_to_vmem [thread:$0]  %s11313_s6, 16, %s70_s12, [#allocation7]  }
  0xda   :  { %s11314_s1 = sld [smem:[#allocation43_spill]] }
  0xe0   :  { %s9231_s8 = scalar_lea.hbm %s11314_s1, 512 }
  0xe1   :  { %p9232_p2 = scmp.ne.s32.totalorder %s11314_s1, %s9231_s8  ;;  %p9235_p3 = scmp.lt.u32.totalorder %s9231_s8, %s11314_s1 }
  0xe3   :  { %p9237_p4 = pnand %p9235_p3, %p9232_p2 }
  0xe5   :  { %9240 = shalt.err (!%p9237_p4)
}
  0xe6   :  { %s9241_s28 = scalar_lea.vmem %s9699_s11, 512  ;;  %p9246_p6 = scmp.lt.s32.totalorder %s9699_s11, %s9699_s11 }
  0xe7   :  { %p9242_p5 = scmp.ne.s32.totalorder %s9699_s11, %s9241_s28  ;;  %p9247_p7 = scmp.lt.s32.totalorder %s9241_s28, %s9241_s28 }
  0xe9   :  { %p9248_p8 = por %p9247_p7, %p9246_p6 }
  0xeb   :  { %p9249_p9 = pnand %p9248_p8, %p9242_p5 }
  0xed   :  { %9252 = shalt.err (!%p9249_p9)
}
  0xee   :  { %94 = dma.hbm_to_vmem [thread:$0]  %s11314_s1, 512, %s9699_s11, [#allocation10], %s9407_s5, %s9407_s5, %s9408_s4  }
  0xef   :  { %s9415_s27 = smov [#allocation14]   ;;  %s9416_s7 = smov [#allocation17]  }
  0xf0   :  { %s112_s29 = sshll.u32 %s9415_s27, 4  ;;  %s137_s30 = sshll.u32 %s9416_s7, 4  ;;  %s113_s29 = int_to_ptr.vmem [resolvable:$true] %s112_s29  ;;  %s138_s30 = int_to_ptr.vmem [resolvable:$true] %s137_s30 }
  0xf1   :  { %s11315_s16 = sld [smem:[#allocation45_spill]] }
  0xf7   :  { %s9253_s9 = scalar_lea.hbm %s11315_s16, 1024 }
  0xf8   :  { %p9254_p10 = scmp.ne.s32.totalorder %s11315_s16, %s9253_s9  ;;  %p9257_p11 = scmp.lt.u32.totalorder %s9253_s9, %s11315_s16 }
  0xfa   :  { %p9259_p12 = pnand %p9257_p11, %p9254_p10 }
  0xfc   :  { %9262 = shalt.err (!%p9259_p12)
}
  0xfd   :  { %s9263_s11 = scalar_lea.vmem %s113_s29, 1024  ;;  %p9268_p0 = scmp.lt.s32.totalorder %s113_s29, %s113_s29 }
  0xfe   :  { %p9264_p13 = scmp.ne.s32.totalorder %s113_s29, %s9263_s11  ;;  %p9269_p1 = scmp.lt.s32.totalorder %s9263_s11, %s9263_s11 }
 0x100   :  { %p9270_p2 = por %p9269_p1, %p9268_p0 }
 0x102   :  { %p9271_p3 = pnand %p9270_p2, %p9264_p13 }
 0x104   :  { %9274 = shalt.err (!%p9271_p3)
}
 0x105   :  { %118 = dma.hbm_to_vmem [thread:$0]  %s11315_s16, 1024, %s113_s29, [#allocation13], %s9407_s5, %s9407_s5, %s9408_s4  }
 0x106   :  { %s11316_s6 = sld [smem:[#allocation47_spill]] }
 0x10c   :  { %s9275_s27 = scalar_lea.hbm %s11316_s6, 16 }
 0x10d   :  { %p9276_p4 = scmp.ne.s32.totalorder %s11316_s6, %s9275_s27  ;;  %p9279_p5 = scmp.lt.u32.totalorder %s9275_s27, %s11316_s6 }
 0x10f   :  { %p9281_p6 = pnand %p9279_p5, %p9276_p4 }
 0x111   :  { %9284 = shalt.err (!%p9281_p6)
}
 0x112   :  { %s9285_s8 = scalar_lea.vmem %s138_s30, 16  ;;  %s9289_s2 = scalar_lea.vmem %s138_s30, 32 }
 0x113   :  { %p9286_p7 = scmp.ne.s32.totalorder %s138_s30, %s9285_s8  ;;  %p9290_p8 = scmp.lt.s32.totalorder %s138_s30, %s138_s30 }
 0x114   :  { %p9291_p9 = scmp.lt.s32.totalorder %s9289_s2, %s9285_s8 }
 0x116   :  { %p9292_p10 = por %p9291_p9, %p9290_p8 }
 0x118   :  { %p9293_p11 = pnand %p9292_p10, %p9286_p7 }
 0x11a   :  { %9296 = shalt.err (!%p9293_p11)
}
 0x11b   :  { %140 = dma.hbm_to_vmem [thread:$0]  %s11316_s6, 16, %s138_s30, [#allocation16]  }
 0x11c   :  { %s9417_s3 = smov [#allocation20]   ;;  %s9418_s11 = smov [#allocation23]  }
 0x11d   :  { %s156_s10 = sshll.u32 %s9417_s3, 4  ;;  %s184_s1 = sshll.u32 %s9418_s11, 4  ;;  %s157_s10 = int_to_ptr.vmem [resolvable:$true] %s156_s10  ;;  %s9760_s1 = int_to_ptr.vmem [resolvable:$true] %s184_s1 }
 0x11e   :  { %s11317_s12 = sld [smem:[#allocation49_spill]] }
 0x124   :  { %s9297_s27 = scalar_lea.hbm %s11317_s12, 512 }
 0x125   :  { %p9298_p12 = scmp.ne.s32.totalorder %s11317_s12, %s9297_s27  ;;  %p9301_p13 = scmp.lt.u32.totalorder %s9297_s27, %s11317_s12 }
 0x127   :  { %p9303_p0 = pnand %p9301_p13, %p9298_p12 }
 0x129   :  { %9306 = shalt.err (!%p9303_p0)
}
 0x12a   :  { %s9307_s30 = scalar_lea.vmem %s157_s10, 512  ;;  %p9312_p2 = scmp.lt.s32.totalorder %s157_s10, %s157_s10 }
 0x12b   :  { %p9308_p1 = scmp.ne.s32.totalorder %s157_s10, %s9307_s30  ;;  %p9313_p3 = scmp.lt.s32.totalorder %s9307_s30, %s9307_s30 }
 0x12d   :  { %p9314_p4 = por %p9313_p3, %p9312_p2 }
 0x12f   :  { %p9315_p5 = pnand %p9314_p4, %p9308_p1 }
 0x131   :  { %9318 = shalt.err (!%p9315_p5)
}
 0x132   :  { %162 = dma.hbm_to_vmem [thread:$0]  %s11317_s12, 512, %s157_s10, [#allocation19], %s9407_s5, %s9407_s5, %s9408_s4  }
 0x133   :  { %s9319_s16 = scalar_lea.hbm %s11267_s15, 1024 }
 0x134   :  { %p9320_p6 = scmp.ne.s32.totalorder %s11267_s15, %s9319_s16  ;;  %p9323_p7 = scmp.lt.u32.totalorder %s9319_s16, %s11267_s15 }
 0x136   :  { %p9325_p8 = pnand %p9323_p7, %p9320_p6 }
 0x138   :  { %9328 = shalt.err (!%p9325_p8)
}
 0x139   :  { %s9329_s27 = scalar_lea.vmem %s9760_s1, 1024  ;;  %p9334_p10 = scmp.lt.s32.totalorder %s9760_s1, %s9760_s1 }
 0x13a   :  { %p9330_p9 = scmp.ne.s32.totalorder %s9760_s1, %s9329_s27  ;;  %p9335_p11 = scmp.lt.s32.totalorder %s9329_s27, %s9329_s27 }
 0x13c   :  { %p9336_p12 = por %p9335_p11, %p9334_p10 }
 0x13e   :  { %p9337_p13 = pnand %p9336_p12, %p9330_p9 }
 0x140   :  { %9340 = shalt.err (!%p9337_p13)
}
 0x141   :  { %190 = dma.hbm_to_vmem [thread:$0]  %s11267_s15, 1024, %s9760_s1, [#allocation22], %s9407_s5, %s9407_s5, %s9408_s4  }
 0x142   :  { %s9419_s7 = smov [#allocation26]   ;;  %s9420_s26 = smov [#allocation27]  }
 0x143   :  { %s206_s24 = sshll.u32 %s9419_s7, 4  ;;  %s219_s9 = sshll.u32 %s9420_s26, 4  ;;  %s207_s24 = int_to_ptr.vmem [resolvable:$true] %s206_s24  ;;  %s220_s9 = int_to_ptr.vmem [resolvable:$true] %s219_s9 }
 0x144   :  { %s9341_s8 = scalar_lea.hbm %s11269_s17, 1024 }
 0x145   :  { %p9342_p0 = scmp.ne.s32.totalorder %s11269_s17, %s9341_s8  ;;  %p9345_p1 = scmp.lt.u32.totalorder %s9341_s8, %s11269_s17 }
 0x147   :  { %p9347_p2 = pnand %p9345_p1, %p9342_p0 }
 0x149   :  { %9350 = shalt.err (!%p9347_p2)
}
 0x14a   :  { %s9351_s15 = scalar_lea.vmem %s207_s24, 1024  ;;  %p9356_p4 = scmp.lt.s32.totalorder %s207_s24, %s207_s24 }
 0x14b   :  { %p9352_p3 = scmp.ne.s32.totalorder %s207_s24, %s9351_s15  ;;  %p9357_p5 = scmp.lt.s32.totalorder %s9351_s15, %s9351_s15 }
 0x14d   :  { %p9358_p6 = por %p9357_p5, %p9356_p4 }
 0x14f   :  { %p9359_p7 = pnand %p9358_p6, %p9352_p3 }
 0x151   :  { %9362 = shalt.err (!%p9359_p7)
}
 0x152   :  { %212 = dma.hbm_to_vmem [thread:$0]  %s11269_s17, 1024, %s207_s24, [#allocation25], %s9407_s5, %s9407_s5, %s9408_s4  }
 0x153   :  { %s9363_s27 = scalar_lea.hbm %s11270_s18, 16 }
 0x154   :  { %p9364_p8 = scmp.ne.s32.totalorder %s11270_s18, %s9363_s27  ;;  %p9367_p9 = scmp.lt.u32.totalorder %s9363_s27, %s11270_s18 }
 0x156   :  { %p9369_p10 = pnand %p9367_p9, %p9364_p8 }
 0x158   :  { %9372 = shalt.err (!%p9369_p10)
}
 0x159   :  { %s9373_s30 = scalar_lea.vmem %s220_s9, 16  ;;  %s9377_s6 = scalar_lea.vmem %s220_s9, 32 }
 0x15a   :  { %p9374_p11 = scmp.ne.s32.totalorder %s220_s9, %s9373_s30  ;;  %p9378_p12 = scmp.lt.s32.totalorder %s220_s9, %s220_s9 }
 0x15b   :  { %p9379_p13 = scmp.lt.s32.totalorder %s9377_s6, %s9373_s30 }
 0x15d   :  { %p9380_p0 = por %p9379_p13, %p9378_p12 }
 0x15f   :  { %p9381_p1 = pnand %p9380_p0, %p9374_p11 }
 0x161   :  { %9384 = shalt.err (!%p9381_p1)
}
 0x162   :  { %222 = dma.hbm_to_vmem [thread:$0]  %s11270_s18, 16, %s220_s9, [#allocation28]  }
 0x163   :  { %9385 = dma.done.wait [#allocation5], 16  }
 0x164   :  { %9386 = vsyncadd [#allocation5], 4294967280 }
 0x165   :  { %9387 = dma.done.wait [#allocation7], 32  }
 0x166   :  { %9388 = vsyncadd [#allocation7], 4294967264 }
 0x167   :  { %9389 = dma.done.wait [#allocation10], 528  }
 0x168   :  { %9390 = vsyncadd [#allocation10], 4294966768 }
 0x169   :  { %9391 = dma.done.wait [#allocation13], 1536  }
 0x16a   :  { %9392 = vsyncadd [#allocation13], 4294965760 }
 0x16b   :  { %9393 = dma.done.wait [#allocation16], 1040  }
 0x16c   :  { %9394 = vsyncadd [#allocation16], 4294966256 }
 0x16d   :  { %9395 = dma.done.wait [#allocation19], 528  }
 0x16e   :  { %9396 = vsyncadd [#allocation19], 4294966768 }
 0x16f   :  { %9397 = dma.done.wait [#allocation22], 1536  }
 0x170   :  { %9398 = vsyncadd [#allocation22], 4294965760 }
 0x171   :  { %9399 = dma.done.wait [#allocation25], 1040  }
 0x172   :  { %9400 = vsyncadd [#allocation25], 4294966256 }
 0x173   :  { %9401 = dma.done.wait [#allocation28], 16  }
 0x174   :  { %9402 = vsyncadd [#allocation28], 4294967280  ;;  %v9421_v0 = vmov 0.0|0.0   ;;  %vm9422_vm0 = vmmov 0   ;;  %v9423_v1 = vmov 0.0   ;;  %v9424_v2 = vmov 0  }
 0x175   :  { %7877 = vmatprep.subr.bf16.mxu0 %v9421_v0  ;;  %7883 = vmatprep.subr.bf16.mxu1 %v9421_v0  ;;  %v395_v3 = vld [vmem:[#allocation11] sm:$0xff]  ;;  %v396_v4 = vld [vmem:[#allocation11 + $0x8] sm:$0xff]  ;;  %v397_v8 = vld [vmem:[#allocation11 + $0x10] sm:$0xff]  ;;  %s11318_s9 = sld [smem:[#allocation38_spill]]  ;;  %s9425_s29 = smov 32   ;;  %vm403_vm1 = vcmask 261120  }
 0x176   :  { %7070 = vmatprep.mubr.msk.f32.mxu0 %vm9422_vm0, %v9423_v1  ;;  %7081 = vmatprep.mubr.msk.f32.mxu1 %vm9422_vm0, %v9423_v1  ;;  %v399_v5 = vld [vmem:[#allocation12] sm:$0xff]  ;;  %v9830_v6 = vpack.c.bf16 %v396_v4, %v395_v3  ;;  %v400_v7 = vld [vmem:[#allocation12 + $0x8] sm:$0xff]  ;;  %v398_v9 = vld [vmem:[#allocation11 + $0x18] sm:$0xff]  ;;  %s9426_s16 = smov 64   ;;  %s9427_s6 = smov 96   ;;  %vm606_vm2 = vcmask 523520  }
 0x177   :  { %8423 = vset.pattern.permute.xlu0 %v9424_v2  ;;  %8424 = vset.pattern.permute.xlu1 %v9424_v2  ;;  %v9832_v10 = vpack.c.bf16 %v400_v7, %v399_v5  ;;  %v401_v11 = vld [vmem:[#allocation12 + $0x10] sm:$0xff]  ;;  %v402_v12 = vld [vmem:[#allocation12 + $0x18] sm:$0xff]  ;;  %v9838_v14 = vpack.c.bf16 %v398_v9, %v397_v8  ;;  %vm2073_vm3 = vcmask 523264   ;;  %vm4498_vm4 = vcmask 64512   ;;  %s9431_s8 = smov 88   ;;  %s9432_s2 = smov 72  }
 0x178   :  { %7879 = vmatpush3.bf16.msra.mxu0 %v9830_v6  ;;  %v9842_v15 = vpack.c.bf16 %v402_v12, %v401_v11  ;;  %v9868_v18 = vld [vmem:[#allocation6] ss:$0 sm:$0xff]  ;;  %v9870_v19 = vld [vmem:[#allocation4] ss:$0 sm:$0xff]  ;;  %v9876_v22 = vld [vmem:[#allocation9] ss:$0 sm:$0xff] }
 0x179   :  { %7885 = vmatpush3.bf16.msra.mxu1 %v9832_v10  ;;  %7880 = vmatprep.subr.bf16.mxu0 %v9421_v0  ;;  %v9880_v24 = vld [vmem:[#allocation8] ss:$0 sm:$0xff]  ;;  %vm10603_vm5 = vmpackc.low %vm4498_vm4, %vm4498_vm4  ;;  %s9433_s3 = smov 80   ;;  %s9436_s15 = smov 24   ;;  %vm6112_vm7 = vcmask 130048   ;;  %vm6114_vm8 = vcmask 195584  }
 0x17a   :  { %7886 = vmatprep.subr.bf16.mxu1 %v9421_v0  ;;  %s9437_s1 = smov 40   ;;  %s9439_s28 = smov 56   ;;  %vm6117_vm9 = vcmask 326656   ;;  %vm6119_vm10 = vcmask 392192   ;;  %vm6121_vm11 = vcmask 457728   ;;  %vm6476_vm13 = vcmask 31744  }
 0x17b   :  { %v294_v13 = vld [vmem:[%s11318_s9 + $0x38] sm:$0xff]  ;;  %v287_v16 = vld [vmem:[%s11318_s9] sm:$0xff]  ;;  %v293_v58 = vld [vmem:[%s11318_s9 + $0x30] sm:$0xff]  ;;  %s11323_s0 = sld [smem:[#allocation52_spill]] }
 0x17c   :  { %333 = vperm.xlu0 %8423, %v294_v13   ;;  %7882 = vmatpush3.bf16.msra.mxu0 %v9838_v14  ;;  %v288_v60 = vld [vmem:[%s11318_s9 + $0x8] sm:$0xff] }
 0x17d   :  { %7888 = vmatpush3.bf16.msra.mxu1 %v9842_v15  ;;  %7889 = vmatprep.subr.bf16.mxu0 %v9421_v0 }
 0x17e   :  { %7895 = vmatprep.subr.bf16.mxu1 %v9421_v0 }
 0x17f   :  { %7071 = vmatmul.mubr.f32.vlgmr.msra.gmra.mrb[0].mxu0 %v9423_v1 }
 0x180   :  { %298 = vperm.xlu0 %8423, %v287_v16   ;;  %7082 = vmatmul.mubr.f32.vlgmr.msra.gmra.mrb[0].mxu1 %v9423_v1 }
 0x181   :  { %7891 = vmatpush3.bf16.msra.mxu0 %v9830_v6  ;;  %7897 = vmatpush3.bf16.msra.mxu1 %v9832_v10 }
 0x182   :  { %7103 = vmatprep.mubr.msk.f32.mxu1 %vm9422_vm0, %v9423_v1  ;;  %7898 = vmatprep.subr.bf16.mxu1 %v9421_v0 }
 0x183   :  { %7892 = vmatprep.subr.bf16.mxu0 %v9421_v0  ;;  %7092 = vmatprep.mubr.msk.f32.mxu0 %vm9422_vm0, %v9423_v1 }
 0x185   :  { %7894 = vmatpush3.bf16.msra.mxu0 %v9838_v14  ;;  %7900 = vmatpush3.bf16.msra.mxu1 %v9842_v15 }
 0x186   :  { %7901 = vmatprep.subr.bf16.mxu0 %v9421_v0  ;;  %7907 = vmatprep.subr.bf16.mxu1 %v9421_v0 }
 0x1fb   :  { %v9866_v17 = vpop.permute.xlu0 %333 }
 0x1fc   :  { %v379_v21 = vmul.f32 %v9868_v18, %v9866_v17 }
 0x1fe   :  { %v394_v25 = vadd.f32 %v9876_v22, %v379_v21 }
 0x1ff   :  { %v9872_v20 = vpop.permute.xlu0 %298 }
 0x200   :  { %v342_v23 = vmul.f32 %v9870_v19, %v9872_v20 }
 0x202   :  { %v357_v26 = vadd.f32 %v9880_v24, %v342_v23 }
 0x252   :  { %v473_v27 = vpop.f32.mrb[0].mxu0 }
 0x253   :  { %v544_v28 = vpop.f32.mrb[0].mxu1  ;;  %v7072_v29 = vpop.f32.mrb[1].mxu0  ;;  %v477_v32 = vadd.f32 %v473_v27, %v357_v26 }
 0x254   :  { %v548_v30 = vadd.f32 %v544_v28, %v394_v25  ;;  %v7083_v31 = vpop.f32.mrb[1].mxu1 }
 0x255   :  { %v6495_v36 = vmul.f32 -1.442695, %v477_v32 }
 0x256   :  { %8725 = vtanh.f32 %v548_v30  ;;  %v6496_v35 = vmul.f32 -1.442695, %v548_v30 }
 0x257   :  { %8727 = vtanh.f32 %v477_v32 }
 0x258   :  { %8729 = vpow2.f32 %v6496_v35 }
 0x259   :  { %8731 = vpow2.f32 %v6495_v36 }
 0x260   :  { %v8726_v33 = vpop.eup %8725 }
 0x261   :  { %576 = vrot.lane.b32.xlu1 %v8726_v33, %s9425_s29  ;;  %v8728_v34 = vpop.eup %8727 }
 0x262   :  { %v8730_v37 = vpop.eup %8729 }
 0x263   :  { %v558_v38 = vadd.f32 1.0, %v8730_v37  ;;  %v8732_v39 = vpop.eup %8731 }
 0x264   :  { %v552_v40 = vadd.f32 1.0, %v8732_v39 }
 0x265   :  { %565 = vrot.lane.b32.xlu1 %v8728_v34, %s9425_s29  ;;  %8733 = vrcp.f32 %v558_v38 }
 0x266   :  { %8735 = vrcp.f32 %v552_v40 }
 0x26f   :  { %v8734_v41 = vpop.eup %8733 }
 0x270   :  { %v8736_v44 = vpop.eup %8735  ;;  %v574_v47 = vmul.f32 0.0, %v8734_v41 }
 0x271   :  { %v563_v50 = vmul.f32 0.0, %v8736_v44 }
 0x2d3   :  { %v577_v42 = vpop.permute.xlu1 %576 }
 0x2d4   :  { %v579_v43 = vmul.f32 %v8734_v41, %v577_v42 }
 0x2d6   :  { %581 = vrot.lane.b32.xlu0 %v579_v43, %s9425_s29 }
 0x2d7   :  { %v566_v45 = vpop.permute.xlu1 %565 }
 0x2d8   :  { %v568_v46 = vmul.f32 %v8736_v44, %v566_v45 }
 0x2da   :  { %570 = vrot.lane.b32.xlu1 %v568_v46, %s9425_s29 }
 0x348   :  { %v582_v48 = vpop.permute.xlu0 %581 }
 0x349   :  { %v9888_v49 = vadd.f32 %v582_v48, %v574_v47  ;;  %v292_v48 = vld [vmem:[%s11318_s9 + $0x28] sm:$0xff] }
 0x34b   :  { %8737 = vtanh.f32 %v9888_v49 }
 0x34c   :  { %v571_v51 = vpop.permute.xlu1 %570 }
 0x34d   :  { %v9891_v52 = vadd.f32 %v571_v51, %v563_v50  ;;  %v289_v50 = vld [vmem:[%s11318_s9 + $0x10] sm:$0xff] }
 0x34f   :  { %8739 = vtanh.f32 %v9891_v52 }
 0x355   :  { %v8738_v53 = vpop.eup %8737 }
 0x356   :  { %593 = vrot.lane.b32.xlu0 %v8738_v53, %s9425_s29 }
 0x359   :  { %v8740_v54 = vpop.eup %8739 }
 0x35a   :  { %587 = vrot.lane.b32.xlu1 %v8740_v54, %s9425_s29 }
 0x3c8   :  { %v594_v55 = vpop.permute.xlu0 %593 }
 0x3c9   :  { %v9896_v56 = vmul.f32 %v8734_v41, %v594_v55 }
 0x3cb   :  { %681 = vrot.lane.b32.xlu0 %v9896_v56, %s9426_s16 }
 0x3cc   :  { %v588_v57 = vpop.permute.xlu1 %587 }
 0x3cd   :  { %v590_v59 = vmul.f32 %v8736_v44, %v588_v57 }
 0x3cf   :  { %598 = vrot.lane.b32.xlu1 %v590_v59, %s9426_s16  ;;  %328 = vperm.xlu0 %8423, %v293_v58  }
 0x3d3   :  { %303 = vperm.xlu1 %8424, %v288_v60  }
 0x43d   :  { %v682_v61 = vpop.permute.xlu0 %681 }
 0x43e   :  { %7104 = vmatmul.mubr.msk.f32.vlgmr.msra.gmra.mrb[2].mxu1 %vm403_vm1, %v682_v61 }
 0x43f   :  { %7909 = vmatpush3.bf16.msra.mxu1 %v9832_v10  ;;  %7125 = vmatprep.mubr.msk.f32.mxu1 %vm9422_vm0, %v9423_v1 }
 0x440   :  { %7910 = vmatprep.subr.bf16.mxu1 %v9421_v0 }
 0x441   :  { %v599_v62 = vpop.permute.xlu1 %598 }
 0x442   :  { %601 = vst.msk [vmem:[#allocation2] sm:$0xff] %vm403_vm1, %v599_v62  ;;  %7093 = vmatmul.mubr.msk.f32.vlgmr.msra.gmra.mrb[2].mxu0 %vm403_vm1, %v599_v62 }
 0x443   :  { %7903 = vmatpush3.bf16.msra.mxu0 %v9830_v6  ;;  %7912 = vmatpush3.bf16.msra.mxu1 %v9842_v15 }
 0x444   :  { %7904 = vmatprep.subr.bf16.mxu0 %v9421_v0  ;;  %7114 = vmatprep.mubr.msk.f32.mxu0 %vm9422_vm0, %v9423_v1 }
 0x445   :  { %7919 = vmatprep.subr.bf16.mxu1 %v9421_v0 }
 0x447   :  { %7906 = vmatpush3.bf16.msra.mxu0 %v9838_v14 }
 0x448   :  { %7913 = vmatprep.subr.bf16.mxu0 %v9421_v0 }
 0x44e   :  { %v9922_v63 = vpop.permute.xlu0 %328 }
 0x44f   :  { %v378_v3 = vmul.f32 %v9868_v18, %v9922_v63 }
 0x451   :  { %v393_v5 = vadd.f32 %v9876_v22, %v378_v3 }
 0x452   :  { %v9924_v2 = vpop.permute.xlu1 %303 }
 0x453   :  { %v343_v4 = vmul.f32 %v9870_v19, %v9924_v2 }
 0x455   :  { %v358_v11 = vadd.f32 %v9880_v24, %v343_v4 }
 0x511   :  { %v751_v7 = vpop.f32.mrb[2].mxu1 }
 0x512   :  { %v755_v8 = vadd.f32 %v751_v7, %v393_v5  ;;  %v7105_v9 = vpop.f32.mrb[3].mxu1 }
 0x514   :  { %8741 = vtanh.f32 %v755_v8  ;;  %v6500_v25 = vmul.f32 -1.442695, %v755_v8 }
 0x515   :  { %v676_v12 = vpop.f32.mrb[2].mxu0 }
 0x516   :  { %v680_v13 = vadd.f32 %v676_v12, %v358_v11  ;;  %v7094_v16 = vpop.f32.mrb[3].mxu0 }
 0x518   :  { %8743 = vtanh.f32 %v680_v13  ;;  %v6499_v26 = vmul.f32 -1.442695, %v680_v13 }
 0x519   :  { %8745 = vpow2.f32 %v6500_v25 }
 0x51a   :  { %8747 = vpow2.f32 %v6499_v26 }
 0x51e   :  { %v8742_v21 = vpop.eup %8741 }
 0x51f   :  { %783 = vrot.lane.b32.xlu0 %v8742_v21, %s9425_s29 }
 0x522   :  { %v8744_v23 = vpop.eup %8743 }
 0x523   :  { %772 = vrot.lane.b32.xlu1 %v8744_v23, %s9425_s29  ;;  %v8746_v27 = vpop.eup %8745 }
 0x524   :  { %v765_v28 = vadd.f32 1.0, %v8746_v27  ;;  %v8748_v29 = vpop.eup %8747 }
 0x525   :  { %v759_v30 = vadd.f32 1.0, %v8748_v29 }
 0x526   :  { %8749 = vrcp.f32 %v765_v28 }
 0x527   :  { %8751 = vrcp.f32 %v759_v30 }
 0x530   :  { %v8750_v31 = vpop.eup %8749 }
 0x531   :  { %v8752_v34 = vpop.eup %8751  ;;  %v781_v37 = vmul.f32 %v8750_v31, %v9888_v49 }
 0x532   :  { %v770_v40 = vmul.f32 %v8752_v34, %v9891_v52 }
 0x591   :  { %v784_v32 = vpop.permute.xlu0 %783 }
 0x592   :  { %v786_v33 = vmul.f32 %v8750_v31, %v784_v32 }
 0x594   :  { %788 = vrot.lane.b32.xlu0 %v786_v33, %s9425_s29 }
 0x595   :  { %v773_v35 = vpop.permute.xlu1 %772 }
 0x596   :  { %v775_v36 = vmul.f32 %v8752_v34, %v773_v35 }
 0x598   :  { %777 = vrot.lane.b32.xlu1 %v775_v36, %s9425_s29 }
 0x606   :  { %v789_v38 = vpop.permute.xlu0 %788 }
 0x607   :  { %v9937_v39 = vadd.f32 %v789_v38, %v781_v37 }
 0x609   :  { %8753 = vtanh.f32 %v9937_v39 }
 0x60a   :  { %v778_v41 = vpop.permute.xlu1 %777 }
 0x60b   :  { %v9941_v42 = vadd.f32 %v778_v41, %v770_v40  ;;  %v291_v41 = vld [vmem:[%s11318_s9 + $0x20] sm:$0xff] }
 0x60d   :  { %8755 = vtanh.f32 %v9941_v42 }
 0x613   :  { %v8754_v43 = vpop.eup %8753 }
 0x614   :  { %800 = vrot.lane.b32.xlu0 %v8754_v43, %s9425_s29  ;;  %v290_v43 = vld [vmem:[%s11318_s9 + $0x18] sm:$0xff]  ;;  %s9430_s9 = smov 104  }
 0x617   :  { %v8756_v44 = vpop.eup %8755 }
 0x618   :  { %794 = vrot.lane.b32.xlu1 %v8756_v44, %s9425_s29 }
 0x686   :  { %v801_v45 = vpop.permute.xlu0 %800 }
 0x687   :  { %v9946_v46 = vmul.f32 %v8750_v31, %v801_v45 }
 0x689   :  { %887 = vrot.lane.b32.xlu0 %v9946_v46, %s9426_s16 }
 0x68a   :  { %v795_v47 = vpop.permute.xlu1 %794 }
 0x68b   :  { %v797_v49 = vmul.f32 %v8752_v34, %v795_v47 }
 0x68d   :  { %805 = vrot.lane.b32.xlu1 %v797_v49, %s9426_s16  ;;  %323 = vperm.xlu0 %8423, %v292_v48  }
 0x691   :  { %308 = vperm.xlu1 %8424, %v289_v50  }
 0x6fb   :  { %v888_v51 = vpop.permute.xlu0 %887 }
 0x6fc   :  { %7126 = vmatmul.mubr.msk.f32.vlgmr.msra.gmra.mrb[4].mxu1 %vm403_vm1, %v888_v51 }
 0x6fd   :  { %7921 = vmatpush3.bf16.msra.mxu1 %v9832_v10  ;;  %7147 = vmatprep.mubr.msk.f32.mxu1 %vm9422_vm0, %v9423_v1 }
 0x6fe   :  { %7922 = vmatprep.subr.bf16.mxu1 %v9421_v0 }
 0x6ff   :  { %v806_v52 = vpop.permute.xlu1 %805 }
 0x700   :  { %808 = vst.msk [vmem:[#allocation2 + $0x8] sm:$0xff] %vm403_vm1, %v806_v52  ;;  %7115 = vmatmul.mubr.msk.f32.vlgmr.msra.gmra.mrb[4].mxu0 %vm403_vm1, %v806_v52 }
 0x701   :  { %7915 = vmatpush3.bf16.msra.mxu0 %v9830_v6  ;;  %7924 = vmatpush3.bf16.msra.mxu1 %v9842_v15 }
 0x702   :  { %7916 = vmatprep.subr.bf16.mxu0 %v9421_v0  ;;  %7136 = vmatprep.mubr.msk.f32.mxu0 %vm9422_vm0, %v9423_v1 }
 0x703   :  { %7931 = vmatprep.subr.bf16.mxu1 %v9421_v0 }
 0x705   :  { %7918 = vmatpush3.bf16.msra.mxu0 %v9838_v14 }
 0x706   :  { %7925 = vmatprep.subr.bf16.mxu0 %v9421_v0 }
 0x70c   :  { %v9972_v53 = vpop.permute.xlu0 %323 }
 0x70d   :  { %v377_v54 = vmul.f32 %v9868_v18, %v9972_v53 }
 0x70f   :  { %v392_v58 = vadd.f32 %v9876_v22, %v377_v54 }
 0x710   :  { %v9976_v55 = vpop.permute.xlu1 %308 }
 0x711   :  { %v344_v57 = vmul.f32 %v9870_v19, %v9976_v55 }
 0x713   :  { %v359_v62 = vadd.f32 %v9880_v24, %v344_v57 }
 0x7cf   :  { %v957_v59 = vpop.f32.mrb[4].mxu1 }
 0x7d0   :  { %v961_v60 = vadd.f32 %v957_v59, %v392_v58  ;;  %v7127_v61 = vpop.f32.mrb[5].mxu1 }
 0x7d2   :  { %8757 = vtanh.f32 %v961_v60  ;;  %v6504_v9 = vmul.f32 -1.442695, %v961_v60 }
 0x7d3   :  { %v882_v3 = vpop.f32.mrb[4].mxu0 }
 0x7d4   :  { %v886_v4 = vadd.f32 %v882_v3, %v359_v62  ;;  %v7116_v5 = vpop.f32.mrb[5].mxu0 }
 0x7d6   :  { %8759 = vtanh.f32 %v886_v4  ;;  %v6503_v11 = vmul.f32 -1.442695, %v886_v4 }
 0x7d7   :  { %8761 = vpow2.f32 %v6504_v9 }
 0x7d8   :  { %8763 = vpow2.f32 %v6503_v11 }
 0x7dc   :  { %v8758_v7 = vpop.eup %8757 }
 0x7dd   :  { %989 = vrot.lane.b32.xlu0 %v8758_v7, %s9425_s29 }
 0x7e0   :  { %v8760_v8 = vpop.eup %8759 }
 0x7e1   :  { %978 = vrot.lane.b32.xlu1 %v8760_v8, %s9425_s29  ;;  %v8762_v12 = vpop.eup %8761 }
 0x7e2   :  { %v971_v13 = vadd.f32 1.0, %v8762_v12  ;;  %v8764_v16 = vpop.eup %8763 }
 0x7e3   :  { %v965_v21 = vadd.f32 1.0, %v8764_v16 }
 0x7e4   :  { %8765 = vrcp.f32 %v971_v13 }
 0x7e5   :  { %8767 = vrcp.f32 %v965_v21 }
 0x7ee   :  { %v8766_v23 = vpop.eup %8765 }
 0x7ef   :  { %v8768_v27 = vpop.eup %8767  ;;  %v987_v30 = vmul.f32 %v8766_v23, %v9937_v39 }
 0x7f0   :  { %v976_v33 = vmul.f32 %v8768_v27, %v9941_v42 }
 0x84f   :  { %v990_v25 = vpop.permute.xlu0 %989 }
 0x850   :  { %v992_v26 = vmul.f32 %v8766_v23, %v990_v25 }
 0x852   :  { %994 = vrot.lane.b32.xlu0 %v992_v26, %s9425_s29 }
 0x853   :  { %v979_v28 = vpop.permute.xlu1 %978 }
 0x854   :  { %v981_v29 = vmul.f32 %v8768_v27, %v979_v28 }
 0x856   :  { %983 = vrot.lane.b32.xlu1 %v981_v29, %s9425_s29 }
 0x8c4   :  { %v995_v31 = vpop.permute.xlu0 %994 }
 0x8c5   :  { %v9987_v32 = vadd.f32 %v995_v31, %v987_v30 }
 0x8c7   :  { %8769 = vtanh.f32 %v9987_v32 }
 0x8c8   :  { %v984_v34 = vpop.permute.xlu1 %983 }
 0x8c9   :  { %v9991_v35 = vadd.f32 %v984_v34, %v976_v33 }
 0x8cb   :  { %8771 = vtanh.f32 %v9991_v35 }
 0x8d1   :  { %v8770_v36 = vpop.eup %8769 }
 0x8d2   :  { %1006 = vrot.lane.b32.xlu0 %v8770_v36, %s9425_s29 }
 0x8d5   :  { %v8772_v37 = vpop.eup %8771 }
 0x8d6   :  { %1000 = vrot.lane.b32.xlu1 %v8772_v37, %s9425_s29 }
 0x944   :  { %v1007_v38 = vpop.permute.xlu0 %1006 }
 0x945   :  { %v9996_v39 = vmul.f32 %v8766_v23, %v1007_v38 }
 0x947   :  { %1093 = vrot.lane.b32.xlu0 %v9996_v39, %s9426_s16 }
 0x948   :  { %v1001_v40 = vpop.permute.xlu1 %1000 }
 0x949   :  { %v1003_v42 = vmul.f32 %v8768_v27, %v1001_v40 }
 0x94b   :  { %1011 = vrot.lane.b32.xlu1 %v1003_v42, %s9426_s16  ;;  %318 = vperm.xlu0 %8423, %v291_v41  }
 0x94f   :  { %313 = vperm.xlu1 %8424, %v290_v43  }
 0x9b9   :  { %v1094_v44 = vpop.permute.xlu0 %1093 }
 0x9ba   :  { %7148 = vmatmul.mubr.msk.f32.vlgmr.msra.gmra.mrb[6].mxu1 %vm403_vm1, %v1094_v44 }
 0x9bb   :  { %7933 = vmatpush3.bf16.msra.mxu1 %v9832_v10  ;;  %7169 = vmatprep.mubr.msk.f32.mxu1 %vm9422_vm0, %v9423_v1 }
 0x9bc   :  { %7934 = vmatprep.subr.bf16.mxu1 %v9421_v0 }
 0x9bd   :  { %v1012_v45 = vpop.permute.xlu1 %1011 }
 0x9be   :  { %1014 = vst.msk [vmem:[#allocation2 + $0x10] sm:$0xff] %vm403_vm1, %v1012_v45  ;;  %7137 = vmatmul.mubr.msk.f32.vlgmr.msra.gmra.mrb[6].mxu0 %vm403_vm1, %v1012_v45 }
 0x9bf   :  { %7927 = vmatpush3.bf16.msra.mxu0 %v9830_v6  ;;  %7936 = vmatpush3.bf16.msra.mxu1 %v9842_v15 }
 0x9c0   :  { %7928 = vmatprep.subr.bf16.mxu0 %v9421_v0  ;;  %7158 = vmatprep.mubr.msk.f32.mxu0 %vm9422_vm0, %v9423_v1 }
 0x9c1   :  { %7943 = vmatprep.subr.bf16.mxu1 %v9421_v0 }
 0x9c3   :  { %7930 = vmatpush3.bf16.msra.mxu0 %v9838_v14 }
 0x9c4   :  { %7937 = vmatprep.subr.bf16.mxu0 %v9421_v0 }
 0x9ca   :  { %v10022_v47 = vpop.permute.xlu0 %318 }
 0x9cb   :  { %v376_v48 = vmul.f32 %v9868_v18, %v10022_v47  ;;  %v346_v42 = vmul.f32 %v9870_v19, %v10022_v47 }
 0x9cd   :  { %v391_v51 = vadd.f32 %v9876_v22, %v376_v48 }
 0x9ce   :  { %v10026_v49 = vpop.permute.xlu1 %313 }
 0x9cf   :  { %v345_v50 = vmul.f32 %v9870_v19, %v10026_v49  ;;  %v375_v41 = vmul.f32 %v9868_v18, %v10026_v49 }
 0x9d1   :  { %v360_v58 = vadd.f32 %v9880_v24, %v345_v50  ;;  %v390_v43 = vadd.f32 %v9876_v22, %v375_v41  ;;  %v361_v50 = vadd.f32 %v9880_v24, %v346_v42 }
 0xa8d   :  { %v1163_v52 = vpop.f32.mrb[6].mxu1 }
 0xa8e   :  { %v1167_v54 = vadd.f32 %v1163_v52, %v391_v51  ;;  %v7149_v57 = vpop.f32.mrb[7].mxu1 }
 0xa90   :  { %8773 = vtanh.f32 %v1167_v54  ;;  %v6508_v4 = vmul.f32 -1.442695, %v1167_v54 }
 0xa91   :  { %v1088_v59 = vpop.f32.mrb[6].mxu0 }
 0xa92   :  { %v1092_v60 = vadd.f32 %v1088_v59, %v360_v58  ;;  %v7138_v61 = vpop.f32.mrb[7].mxu0 }
 0xa94   :  { %8775 = vtanh.f32 %v1092_v60  ;;  %v6507_v5 = vmul.f32 -1.442695, %v1092_v60 }
 0xa95   :  { %8777 = vpow2.f32 %v6508_v4 }
 0xa96   :  { %8779 = vpow2.f32 %v6507_v5 }
 0xa9a   :  { %v8774_v62 = vpop.eup %8773 }
 0xa9b   :  { %1195 = vrot.lane.b32.xlu0 %v8774_v62, %s9425_s29 }
 0xa9e   :  { %v8776_v3 = vpop.eup %8775 }
 0xa9f   :  { %1184 = vrot.lane.b32.xlu1 %v8776_v3, %s9425_s29  ;;  %v8778_v7 = vpop.eup %8777 }
 0xaa0   :  { %v1177_v8 = vadd.f32 1.0, %v8778_v7  ;;  %v8780_v9 = vpop.eup %8779 }
 0xaa1   :  { %v1171_v11 = vadd.f32 1.0, %v8780_v9 }
 0xaa2   :  { %8781 = vrcp.f32 %v1177_v8 }
 0xaa3   :  { %8783 = vrcp.f32 %v1171_v11 }
 0xaac   :  { %v8782_v12 = vpop.eup %8781 }
 0xaad   :  { %v8784_v21 = vpop.eup %8783  ;;  %v1193_v26 = vmul.f32 %v8782_v12, %v9987_v32 }
 0xaae   :  { %v1182_v29 = vmul.f32 %v8784_v21, %v9991_v35 }
 0xb0d   :  { %v1196_v13 = vpop.permute.xlu0 %1195 }
 0xb0e   :  { %v1198_v16 = vmul.f32 %v8782_v12, %v1196_v13 }
 0xb10   :  { %1200 = vrot.lane.b32.xlu0 %v1198_v16, %s9425_s29 }
 0xb11   :  { %v1185_v23 = vpop.permute.xlu1 %1184 }
 0xb12   :  { %v1187_v25 = vmul.f32 %v8784_v21, %v1185_v23 }
 0xb14   :  { %1189 = vrot.lane.b32.xlu1 %v1187_v25, %s9425_s29 }
 0xb82   :  { %v1201_v27 = vpop.permute.xlu0 %1200 }
 0xb83   :  { %v10037_v28 = vadd.f32 %v1201_v27, %v1193_v26 }
 0xb85   :  { %8785 = vtanh.f32 %v10037_v28 }
 0xb86   :  { %v1190_v30 = vpop.permute.xlu1 %1189 }
 0xb87   :  { %v10041_v31 = vadd.f32 %v1190_v30, %v1182_v29 }
 0xb89   :  { %8787 = vtanh.f32 %v10041_v31 }
 0xb8f   :  { %v8786_v33 = vpop.eup %8785 }
 0xb90   :  { %1212 = vrot.lane.b32.xlu0 %v8786_v33, %s9425_s29 }
 0xb93   :  { %v8788_v34 = vpop.eup %8787 }
 0xb94   :  { %1206 = vrot.lane.b32.xlu1 %v8788_v34, %s9425_s29  ;;  %v374_v34 = vmul.f32 %v9868_v18, %v9976_v55 }
 0xc02   :  { %v1213_v36 = vpop.permute.xlu0 %1212 }
 0xc03   :  { %v10046_v32 = vmul.f32 %v8782_v12, %v1213_v36  ;;  %v347_v36 = vmul.f32 %v9870_v19, %v9972_v53 }
 0xc05   :  { %1299 = vrot.lane.b32.xlu0 %v10046_v32, %s9426_s16  ;;  %v362_v41 = vadd.f32 %v9880_v24, %v347_v36 }
 0xc06   :  { %v1207_v37 = vpop.permute.xlu1 %1206 }
 0xc07   :  { %v1209_v38 = vmul.f32 %v8784_v21, %v1207_v37  ;;  %v389_v37 = vadd.f32 %v9876_v22, %v374_v34 }
 0xc09   :  { %1217 = vrot.lane.b32.xlu1 %v1209_v38, %s9426_s16 }
 0xc77   :  { %v1300_v35 = vpop.permute.xlu0 %1299 }
 0xc78   :  { %7170 = vmatmul.mubr.msk.f32.vlgmr.msra.gmra.mrb[8].mxu1 %vm403_vm1, %v1300_v35 }
 0xc79   :  { %7945 = vmatpush3.bf16.msra.mxu1 %v9832_v10  ;;  %7191 = vmatprep.mubr.msk.f32.mxu1 %vm9422_vm0, %v9423_v1 }
 0xc7a   :  { %7946 = vmatprep.subr.bf16.mxu1 %v9421_v0 }
 0xc7b   :  { %v1218_v40 = vpop.permute.xlu1 %1217 }
 0xc7c   :  { %1220 = vst.msk [vmem:[#allocation2 + $0x18] sm:$0xff] %vm403_vm1, %v1218_v40  ;;  %7159 = vmatmul.mubr.msk.f32.vlgmr.msra.gmra.mrb[8].mxu0 %vm403_vm1, %v1218_v40 }
 0xc7d   :  { %7939 = vmatpush3.bf16.msra.mxu0 %v9830_v6  ;;  %7948 = vmatpush3.bf16.msra.mxu1 %v9842_v15 }
 0xc7e   :  { %7940 = vmatprep.subr.bf16.mxu0 %v9421_v0  ;;  %7180 = vmatprep.mubr.msk.f32.mxu0 %vm9422_vm0, %v9423_v1 }
 0xc7f   :  { %7955 = vmatprep.subr.bf16.mxu1 %v9421_v0 }
 0xc81   :  { %7942 = vmatpush3.bf16.msra.mxu0 %v9838_v14 }
 0xc82   :  { %7949 = vmatprep.subr.bf16.mxu0 %v9421_v0 }
 0xd4b   :  { %v1369_v44 = vpop.f32.mrb[8].mxu1 }
 0xd4c   :  { %v1373_v45 = vadd.f32 %v1369_v44, %v390_v43  ;;  %v7171_v48 = vpop.f32.mrb[9].mxu1 }
 0xd4e   :  { %8789 = vtanh.f32 %v1373_v45  ;;  %v6512_v49 = vmul.f32 -1.442695, %v1373_v45 }
 0xd4f   :  { %v1294_v51 = vpop.f32.mrb[8].mxu0 }
 0xd50   :  { %v1298_v52 = vadd.f32 %v1294_v51, %v361_v50  ;;  %v7160_v54 = vpop.f32.mrb[9].mxu0 }
 0xd52   :  { %8791 = vtanh.f32 %v1298_v52  ;;  %v6511_v47 = vmul.f32 -1.442695, %v1298_v52 }
 0xd53   :  { %8793 = vpow2.f32 %v6512_v49 }
 0xd54   :  { %8795 = vpow2.f32 %v6511_v47 }
 0xd58   :  { %v8790_v57 = vpop.eup %8789 }
 0xd59   :  { %1401 = vrot.lane.b32.xlu0 %v8790_v57, %s9425_s29 }
 0xd5c   :  { %v8792_v58 = vpop.eup %8791 }
 0xd5d   :  { %1390 = vrot.lane.b32.xlu1 %v8792_v58, %s9425_s29  ;;  %v8794_v59 = vpop.eup %8793 }
 0xd5e   :  { %v1383_v60 = vadd.f32 1.0, %v8794_v59  ;;  %v8796_v61 = vpop.eup %8795 }
 0xd5f   :  { %v1377_v62 = vadd.f32 1.0, %v8796_v61 }
 0xd60   :  { %8797 = vrcp.f32 %v1383_v60 }
 0xd61   :  { %8799 = vrcp.f32 %v1377_v62 }
 0xd6a   :  { %v8798_v3 = vpop.eup %8797 }
 0xd6b   :  { %v8800_v7 = vpop.eup %8799  ;;  %v1399_v11 = vmul.f32 %v8798_v3, %v10037_v28 }
 0xd6c   :  { %v1388_v16 = vmul.f32 %v8800_v7, %v10041_v31 }
 0xdcb   :  { %v1402_v4 = vpop.permute.xlu0 %1401 }
 0xdcc   :  { %v1404_v5 = vmul.f32 %v8798_v3, %v1402_v4 }
 0xdce   :  { %1406 = vrot.lane.b32.xlu0 %v1404_v5, %s9425_s29 }
 0xdcf   :  { %v1391_v8 = vpop.permute.xlu1 %1390 }
 0xdd0   :  { %v1393_v9 = vmul.f32 %v8800_v7, %v1391_v8 }
 0xdd2   :  { %1395 = vrot.lane.b32.xlu1 %v1393_v9, %s9425_s29 }
 0xe40   :  { %v1407_v12 = vpop.permute.xlu0 %1406 }
 0xe41   :  { %v10077_v13 = vadd.f32 %v1407_v12, %v1399_v11 }
 0xe43   :  { %8801 = vtanh.f32 %v10077_v13 }
 0xe44   :  { %v1396_v21 = vpop.permute.xlu1 %1395 }
 0xe45   :  { %v10081_v23 = vadd.f32 %v1396_v21, %v1388_v16 }
 0xe47   :  { %8803 = vtanh.f32 %v10081_v23 }
 0xe4d   :  { %v8802_v25 = vpop.eup %8801 }
 0xe4e   :  { %1418 = vrot.lane.b32.xlu0 %v8802_v25, %s9425_s29  ;;  %v348_v25 = vmul.f32 %v9870_v19, %v9922_v63 }
 0xe51   :  { %v8804_v26 = vpop.eup %8803 }
 0xe52   :  { %1412 = vrot.lane.b32.xlu1 %v8804_v26, %s9425_s29 }
 0xec0   :  { %v1419_v27 = vpop.permute.xlu0 %1418 }
 0xec1   :  { %v10086_v28 = vmul.f32 %v8798_v3, %v1419_v27 }
 0xec3   :  { %1505 = vrot.lane.b32.xlu0 %v10086_v28, %s9426_s16 }
 0xec4   :  { %v1413_v29 = vpop.permute.xlu1 %1412 }
 0xec5   :  { %v1415_v30 = vmul.f32 %v8800_v7, %v1413_v29 }
 0xec7   :  { %1423 = vrot.lane.b32.xlu1 %v1415_v30, %s9426_s16 }
 0xf35   :  { %v1506_v31 = vpop.permute.xlu0 %1505 }
 0xf36   :  { %7192 = vmatmul.mubr.msk.f32.vlgmr.msra.gmra.mrb[10].mxu1 %vm403_vm1, %v1506_v31 }
 0xf37   :  { %7957 = vmatpush3.bf16.msra.mxu1 %v9832_v10  ;;  %7213 = vmatprep.mubr.msk.f32.mxu1 %vm9422_vm0, %v9423_v1 }
 0xf38   :  { %7958 = vmatprep.subr.bf16.mxu1 %v9421_v0 }
 0xf39   :  { %v10096_v33 = vpop.permute.xlu1 %1423 }
 0xf3a   :  { %7181 = vmatmul.mubr.msk.f32.vlgmr.msra.gmra.mrb[10].mxu0 %vm403_vm1, %v10096_v33 }
 0xf3b   :  { %7951 = vmatpush3.bf16.msra.mxu0 %v9830_v6  ;;  %7960 = vmatpush3.bf16.msra.mxu1 %v9842_v15 }
 0xf3c   :  { %7952 = vmatprep.subr.bf16.mxu0 %v9421_v0  ;;  %7202 = vmatprep.mubr.msk.f32.mxu0 %vm9422_vm0, %v9423_v1 }
 0xf3d   :  { %7967 = vmatprep.subr.bf16.mxu1 %v9421_v0 }
 0xf3f   :  { %7954 = vmatpush3.bf16.msra.mxu0 %v9838_v14 }
 0xf40   :  { %7961 = vmatprep.subr.bf16.mxu0 %v9421_v0 }
0x1009   :  { %v1575_v38 = vpop.f32.mrb[10].mxu1 }
0x100a   :  { %v1579_v35 = vadd.f32 %v1575_v38, %v389_v37  ;;  %v7193_v40 = vpop.f32.mrb[11].mxu1 }
0x100c   :  { %8805 = vtanh.f32 %v1579_v35  ;;  %v6516_v55 = vmul.f32 -1.442695, %v1579_v35 }
0x100d   :  { %v1500_v42 = vpop.f32.mrb[10].mxu0 }
0x100e   :  { %v1504_v43 = vadd.f32 %v1500_v42, %v362_v41  ;;  %v7182_v44 = vpop.f32.mrb[11].mxu0 }
0x1010   :  { %8807 = vtanh.f32 %v1504_v43  ;;  %v6515_v53 = vmul.f32 -1.442695, %v1504_v43 }
0x1011   :  { %8809 = vpow2.f32 %v6516_v55 }
0x1012   :  { %8811 = vpow2.f32 %v6515_v53 }
0x1016   :  { %v8806_v45 = vpop.eup %8805 }
0x1017   :  { %1607 = vrot.lane.b32.xlu0 %v8806_v45, %s9425_s29 }
0x101a   :  { %v8808_v48 = vpop.eup %8807 }
0x101b   :  { %1596 = vrot.lane.b32.xlu1 %v8808_v48, %s9425_s29  ;;  %v8810_v50 = vpop.eup %8809 }
0x101c   :  { %v1589_v51 = vadd.f32 1.0, %v8810_v50  ;;  %v8812_v52 = vpop.eup %8811 }
0x101d   :  { %v1583_v54 = vadd.f32 1.0, %v8812_v52 }
0x101e   :  { %8813 = vrcp.f32 %v1589_v51 }
0x101f   :  { %8815 = vrcp.f32 %v1583_v54 }
0x1028   :  { %v8814_v57 = vpop.eup %8813 }
0x1029   :  { %v8816_v47 = vpop.eup %8815  ;;  %v1605_v61 = vmul.f32 %v8814_v57, %v10077_v13 }
0x102a   :  { %v1594_v4 = vmul.f32 %v8816_v47, %v10081_v23 }
0x1089   :  { %v1608_v58 = vpop.permute.xlu0 %1607 }
0x108a   :  { %v1610_v49 = vmul.f32 %v8814_v57, %v1608_v58 }
0x108c   :  { %1612 = vrot.lane.b32.xlu0 %v1610_v49, %s9425_s29 }
0x108d   :  { %v1597_v59 = vpop.permute.xlu1 %1596 }
0x108e   :  { %v1599_v60 = vmul.f32 %v8816_v47, %v1597_v59 }
0x1090   :  { %1601 = vrot.lane.b32.xlu1 %v1599_v60, %s9425_s29 }
0x10fe   :  { %v1613_v62 = vpop.permute.xlu0 %1612 }
0x10ff   :  { %v1615_v3 = vadd.f32 %v1613_v62, %v1605_v61 }
0x1101   :  { %8817 = vtanh.f32 %v1615_v3 }
0x1102   :  { %v1602_v5 = vpop.permute.xlu1 %1601 }
0x1103   :  { %v1604_v7 = vadd.f32 %v1602_v5, %v1594_v4  ;;  %v349_v4 = vmul.f32 %v9870_v19, %v9866_v17 }
0x1105   :  { %8819 = vtanh.f32 %v1604_v7 }
0x110b   :  { %v8818_v8 = vpop.eup %8817 }
0x110c   :  { %1624 = vrot.lane.b32.xlu0 %v8818_v8, %s9425_s29 }
0x110f   :  { %v8820_v9 = vpop.eup %8819 }
0x1110   :  { %1618 = vrot.lane.b32.xlu1 %v8820_v9, %s9425_s29 }
0x117e   :  { %v1625_v11 = vpop.permute.xlu0 %1624 }
0x117f   :  { %v10122_v12 = vmul.f32 %v8814_v57, %v1625_v11  ;;  %v364_v11 = vadd.f32 %v9880_v24, %v349_v4 }
0x1181   :  { %1711 = vrot.lane.b32.xlu0 %v10122_v12, %s9426_s16 }
0x1182   :  { %v1619_v13 = vpop.permute.xlu1 %1618 }
0x1183   :  { %v1621_v16 = vmul.f32 %v8816_v47, %v1619_v13 }
0x1185   :  { %1629 = vrot.lane.b32.xlu1 %v1621_v16, %s9426_s16 }
0x11f3   :  { %v1712_v21 = vpop.permute.xlu0 %1711 }
0x11f4   :  { %7214 = vmatmul.mubr.msk.f32.vlgmr.msra.gmra.mrb[12].mxu1 %vm403_vm1, %v1712_v21 }
0x11f5   :  { %7969 = vmatpush3.bf16.msra.mxu1 %v9832_v10  ;;  %7235 = vmatprep.mubr.msk.f32.mxu1 %vm9422_vm0, %v9423_v1  ;;  %v373_v10 = vmul.f32 %v9868_v18, %v9924_v2 }
0x11f6   :  { %7970 = vmatprep.subr.bf16.mxu1 %v9421_v0 }
0x11f7   :  { %v10132_v23 = vpop.permute.xlu1 %1629  ;;  %v388_v26 = vadd.f32 %v9876_v22, %v373_v10 }
0x11f8   :  { %7203 = vmatmul.mubr.msk.f32.vlgmr.msra.gmra.mrb[12].mxu0 %vm403_vm1, %v10132_v23 }
0x11f9   :  { %7963 = vmatpush3.bf16.msra.mxu0 %v9830_v6  ;;  %7972 = vmatpush3.bf16.msra.mxu1 %v9842_v15  ;;  %v363_v15 = vadd.f32 %v9880_v24, %v348_v25 }
0x11fa   :  { %7964 = vmatprep.subr.bf16.mxu0 %v9421_v0  ;;  %7224 = vmatprep.mubr.msk.f32.mxu0 %vm9422_vm0, %v9423_v1 }
0x11fd   :  { %7966 = vmatpush3.bf16.msra.mxu0 %v9838_v14 }
0x12c7   :  { %v1781_v27 = vpop.f32.mrb[12].mxu1 }
0x12c8   :  { %v1785_v29 = vadd.f32 %v1781_v27, %v388_v26  ;;  %v7215_v6 = vpop.f32.mrb[13].mxu1 }
0x12ca   :  { %8821 = vtanh.f32 %v1785_v29  ;;  %v6520_v2 = vmul.f32 -1.442695, %v1785_v29 }
0x12cb   :  { %v1706_v30 = vpop.f32.mrb[12].mxu0 }
0x12cc   :  { %v1710_v31 = vadd.f32 %v1706_v30, %v363_v15  ;;  %v7204_v34 = vpop.f32.mrb[13].mxu0 }
0x12ce   :  { %8823 = vtanh.f32 %v1710_v31  ;;  %v6519_v63 = vmul.f32 -1.442695, %v1710_v31 }
0x12cf   :  { %8825 = vpow2.f32 %v6520_v2 }
0x12d0   :  { %8827 = vpow2.f32 %v6519_v63 }
0x12d4   :  { %v8822_v36 = vpop.eup %8821 }
0x12d5   :  { %1813 = vrot.lane.b32.xlu0 %v8822_v36, %s9425_s29 }
0x12d8   :  { %v8824_v14 = vpop.eup %8823 }
0x12d9   :  { %1802 = vrot.lane.b32.xlu1 %v8824_v14, %s9425_s29  ;;  %v8826_v37 = vpop.eup %8825 }
0x12da   :  { %v1795_v38 = vadd.f32 1.0, %v8826_v37  ;;  %v8828_v35 = vpop.eup %8827 }
0x12db   :  { %v1789_v40 = vadd.f32 1.0, %v8828_v35  ;;  %v2058_v35 = vld [vmem:[#allocation14] sm:$0xff] }
0x12dc   :  { %8829 = vrcp.f32 %v1795_v38 }
0x12dd   :  { %8831 = vrcp.f32 %v1789_v40  ;;  %v2059_v40 = vld [vmem:[#allocation14 + $0x8] sm:$0xff] }
0x12e6   :  { %v8830_v41 = vpop.eup %8829 }
0x12e7   :  { %v8832_v44 = vpop.eup %8831  ;;  %v1811_v55 = vmul.f32 %v8830_v41, %v1615_v3  ;;  %v372_v3 = vmul.f32 %v9868_v18, %v9872_v20 }
0x12e8   :  { %v1800_v51 = vmul.f32 %v8832_v44, %v1604_v7 }
0x12e9   :  { %v387_v5 = vadd.f32 %v9876_v22, %v372_v3  ;;  %v2210_v3 = vld [vmem:[#allocation15 + $0x38] sm:$0xff] }
0x1347   :  { %v1814_v42 = vpop.permute.xlu0 %1813 }
0x1348   :  { %v1816_v43 = vmul.f32 %v8830_v41, %v1814_v42  ;;  %v7973_v42 = vpack.c.bf16 %v2059_v40, %v2058_v35 }
0x134a   :  { %1818 = vrot.lane.b32.xlu0 %v1816_v43, %s9425_s29  ;;  %v2204_v43 = vld [vmem:[#allocation15 + $0x8] sm:$0xff]  ;;  %7974 = vmatprep.subr.bf16.mxu0 %v7973_v42 }
0x134b   :  { %v1803_v45 = vpop.permute.xlu1 %1802 }
0x134c   :  { %v1805_v48 = vmul.f32 %v8832_v44, %v1803_v45  ;;  %v2061_v45 = vld [vmem:[#allocation14 + $0x18] sm:$0xff] }
0x134e   :  { %1807 = vrot.lane.b32.xlu1 %v1805_v48, %s9425_s29 }
0x13bc   :  { %v1819_v53 = vpop.permute.xlu0 %1818 }
0x13bd   :  { %v1821_v50 = vadd.f32 %v1819_v53, %v1811_v55  ;;  %v2205_v53 = vld [vmem:[#allocation15 + $0x10] sm:$0xff] }
0x13bf   :  { %8833 = vtanh.f32 %v1821_v50 }
0x13c0   :  { %v1808_v52 = vpop.permute.xlu1 %1807 }
0x13c1   :  { %v1810_v54 = vadd.f32 %v1808_v52, %v1800_v51  ;;  %v2062_v52 = vld [vmem:[#allocation14 + $0x20] sm:$0xff] }
0x13c3   :  { %8835 = vtanh.f32 %v1810_v54 }
0x13c9   :  { %v8834_v57 = vpop.eup %8833 }
0x13ca   :  { %1830 = vrot.lane.b32.xlu0 %v8834_v57, %s9425_s29  ;;  %v2207_v57 = vld [vmem:[#allocation15 + $0x20] sm:$0xff] }
0x13cd   :  { %v8836_v58 = vpop.eup %8835 }
0x13ce   :  { %1824 = vrot.lane.b32.xlu1 %v8836_v58, %s9425_s29 }
0x143c   :  { %v1831_v49 = vpop.permute.xlu0 %1830 }
0x143d   :  { %v1833_v47 = vmul.f32 %v8830_v41, %v1831_v49  ;;  %v2203_v41 = vld [vmem:[#allocation15] sm:$0xff]  ;;  %v2208_v49 = vld [vmem:[#allocation15 + $0x28] sm:$0xff] }
0x143e   :  { %v7989_v48 = vpack.c.bf16 %v2204_v43, %v2203_v41 }
0x143f   :  { %1917 = vrot.lane.b32.xlu0 %v1833_v47, %s9426_s16 }
0x1440   :  { %v1825_v59 = vpop.permute.xlu1 %1824  ;;  %7990 = vmatprep.subr.bf16.mxu1 %v7989_v48 }
0x1441   :  { %v1827_v60 = vmul.f32 %v8832_v44, %v1825_v59  ;;  %v2060_v44 = vld [vmem:[#allocation14 + $0x10] sm:$0xff]  ;;  %v2065_v59 = vld [vmem:[#allocation14 + $0x38] sm:$0xff] }
0x1442   :  { %v7977_v55 = vpack.c.bf16 %v2061_v45, %v2060_v44 }
0x1443   :  { %1835 = vrot.lane.b32.xlu1 %v1827_v60, %s9426_s16  ;;  %v2209_v60 = vld [vmem:[#allocation15 + $0x30] sm:$0xff] }
0x14b1   :  { %v1918_v61 = vpop.permute.xlu0 %1917 }
0x14b2   :  { %7236 = vmatmul.mubr.msk.f32.vlgmr.msra.gmra.mrb[14].mxu1 %vm403_vm1, %v1918_v61 }
0x14b3   :  { %7992 = vmatpush3.bf16.msra.mxu1 %v7989_v48 }
0x14b5   :  { %v10157_v62 = vpop.permute.xlu1 %1835 }
0x14b6   :  { %7225 = vmatmul.mubr.msk.f32.vlgmr.msra.gmra.mrb[14].mxu0 %vm403_vm1, %v10157_v62 }
0x14b7   :  { %7976 = vmatpush3.bf16.msra.mxu0 %v7973_v42 }
0x14b8   :  { %7978 = vmatprep.subr.bf16.mxu0 %v7977_v55 }
0x14bb   :  { %7980 = vmatpush3.bf16.msra.mxu0 %v7977_v55 }
0x1585   :  { %v1987_v7 = vpop.f32.mrb[14].mxu1 }
0x1586   :  { %v1991_v8 = vadd.f32 %v1987_v7, %v387_v5  ;;  %v7237_v9 = vpop.f32.mrb[15].mxu1 }
0x1588   :  { %8837 = vtanh.f32 %v1991_v8  ;;  %v6524_v18 = vmul.f32 -1.442695, %v1991_v8 }
0x1589   :  { %v1912_v13 = vpop.f32.mrb[14].mxu0 }
0x158a   :  { %v1916_v16 = vadd.f32 %v1912_v13, %v364_v11  ;;  %v7226_v21 = vpop.f32.mrb[15].mxu0  ;;  %v2327_v13 = vld [vmem:[#allocation21] sm:$0xff] }
0x158b   :  { %v2328_v21 = vld [vmem:[#allocation21 + $0x8] sm:$0xff] }
0x158c   :  { %8839 = vtanh.f32 %v1916_v16  ;;  %v6523_v17 = vmul.f32 -1.442695, %v1916_v16 }
0x158d   :  { %8841 = vpow2.f32 %v6524_v18  ;;  %v2329_v18 = vld [vmem:[#allocation21 + $0x10] sm:$0xff] }
0x158e   :  { %8843 = vpow2.f32 %v6523_v17 }
0x1592   :  { %v8838_v10 = vpop.eup %8837 }
0x1593   :  { %2019 = vrot.lane.b32.xlu0 %v8838_v10, %s9425_s29  ;;  %v2324_v10 = vld [vmem:[#allocation20 + $0x8] sm:$0xff] }
0x1596   :  { %v8840_v25 = vpop.eup %8839 }
0x1597   :  { %2008 = vrot.lane.b32.xlu1 %v8840_v25, %s9425_s29  ;;  %v8842_v19 = vpop.eup %8841  ;;  %v10208_v25 = vpack.c.bf16 %v2328_v21, %v2327_v13 }
0x1598   :  { %v2001_v20 = vadd.f32 1.0, %v8842_v19  ;;  %v8844_v22 = vpop.eup %8843 }
0x1599   :  { %v1995_v26 = vadd.f32 1.0, %v8844_v22  ;;  %v2325_v22 = vld [vmem:[#allocation20 + $0x10] sm:$0xff] }
0x159a   :  { %8845 = vrcp.f32 %v2001_v20 }
0x159b   :  { %8847 = vrcp.f32 %v1995_v26  ;;  %v2326_v26 = vld [vmem:[#allocation20 + $0x18] sm:$0xff] }
0x15a4   :  { %v10169_v24 = vpop.eup %8845 }
0x15a5   :  { %v10173_v6 = vpop.eup %8847  ;;  %v2017_v31 = vmul.f32 %v10169_v24, %v1821_v50  ;;  %v2206_v50 = vld [vmem:[#allocation15 + $0x18] sm:$0xff] }
0x15a6   :  { %v2006_v14 = vmul.f32 %v10173_v6, %v1810_v54  ;;  %v7993_v51 = vpack.c.bf16 %v2206_v50, %v2205_v53  ;;  %v2063_v54 = vld [vmem:[#allocation14 + $0x28] sm:$0xff] }
0x15a7   :  { %v7981_v58 = vpack.c.bf16 %v2063_v54, %v2062_v52 }
0x15a8   :  { %7994 = vmatprep.subr.bf16.mxu1 %v7993_v51 }
0x15a9   :  { %7996 = vmatpush3.bf16.msra.mxu1 %v7993_v51  ;;  %7982 = vmatprep.subr.bf16.mxu0 %v7981_v58 }
0x15aa   :  { %7984 = vmatpush3.bf16.msra.mxu0 %v7981_v58 }
0x1605   :  { %v2020_v27 = vpop.permute.xlu0 %2019 }
0x1606   :  { %v2022_v29 = vmul.f32 %v10169_v24, %v2020_v27 }
0x1608   :  { %2024 = vrot.lane.b32.xlu0 %v2022_v29, %s9425_s29  ;;  %v10223_v29 = vpack.c.bf16 %v2326_v26, %v2325_v22 }
0x1609   :  { %v2009_v15 = vpop.permute.xlu1 %2008 }
0x160a   :  { %v2011_v30 = vmul.f32 %v10173_v6, %v2009_v15 }
0x160c   :  { %2013 = vrot.lane.b32.xlu1 %v2011_v30, %s9425_s29 }
0x167a   :  { %v2025_v34 = vpop.permute.xlu0 %2024 }
0x167b   :  { %v2027_v36 = vadd.f32 %v2025_v34, %v2017_v31 }
0x167d   :  { %8849 = vtanh.f32 %v2027_v36 }
0x167e   :  { %v2014_v2 = vpop.permute.xlu1 %2013 }
0x167f   :  { %v2016_v63 = vadd.f32 %v2014_v2, %v2006_v14  ;;  %v6525_v14 = vld [vmem:[#allocation17] ss:$0 sm:$0xff]  ;;  %v6534_v2 = vld [vmem:[#allocation18] ss:$0 sm:$0xff] }
0x1681   :  { %8851 = vtanh.f32 %v2016_v63 }
0x1687   :  { %v8850_v37 = vpop.eup %8849 }
0x1688   :  { %2036 = vrot.lane.b32.xlu0 %v8850_v37, %s9425_s29 }
0x168b   :  { %v8852_v38 = vpop.eup %8851 }
0x168c   :  { %2030 = vrot.lane.b32.xlu1 %v8852_v38, %s9425_s29 }
0x1690   :  { %1840 = vrot.lane.b32.xlu1 %v1833_v47, %s9427_s6  ;;  %v7997_v47 = vpack.c.bf16 %v2208_v49, %v2207_v57 }
0x1692   :  { %7998 = vmatprep.subr.bf16.mxu1 %v7997_v47 }
0x1693   :  { %8000 = vmatpush3.bf16.msra.mxu1 %v7997_v47 }
0x1694   :  { %1428 = vrot.lane.b32.xlu1 %v10086_v28, %s9427_s6  ;;  %v2064_v28 = vld [vmem:[#allocation14 + $0x30] sm:$0xff] }
0x1695   :  { %v7985_v61 = vpack.c.bf16 %v2065_v59, %v2064_v28 }
0x1697   :  { %7986 = vmatprep.subr.bf16.mxu0 %v7985_v61 }
0x1698   :  { %1016 = vrot.lane.b32.xlu1 %v9996_v39, %s9427_s6  ;;  %v8001_v39 = vpack.c.bf16 %v2210_v3, %v2209_v60  ;;  %7988 = vmatpush3.bf16.msra.mxu0 %v7985_v61 }
0x1699   :  { %8005 = vmatprep.subr.bf16.mxu0 %v9421_v0 }
0x169a   :  { %8002 = vmatprep.subr.bf16.mxu1 %v8001_v39 }
0x169b   :  { %8004 = vmatpush3.bf16.msra.mxu1 %v8001_v39 }
0x169c   :  { %603 = vrot.lane.b32.xlu1 %v9896_v56, %s9427_s6  ;;  %8011 = vmatprep.subr.bf16.mxu1 %v9421_v0 }
0x16fa   :  { %v2037_v56 = vpop.permute.xlu0 %2036 }
0x16fb   :  { %v2039_v4 = vmul.f32 %v10169_v24, %v2037_v56 }
0x16fd   :  { %2046 = vrot.lane.b32.xlu0 %v2039_v4, %s9427_s6 }
0x16fe   :  { %v2031_v5 = vpop.permute.xlu1 %2030 }
0x16ff   :  { %v2033_v11 = vmul.f32 %v10173_v6, %v2031_v5 }
0x1701   :  { %1634 = vrot.lane.b32.xlu0 %v10122_v12, %s9427_s6 }
0x1702   :  { %v1841_v7 = vpop.permute.xlu1 %1840 }
0x1703   :  { %1843 = vst.msk [vmem:[#allocation2 + $0x8] sm:$0xff] %vm606_vm2, %v1841_v7 }
0x1705   :  { %1222 = vrot.lane.b32.xlu0 %v10046_v32, %s9427_s6 }
0x1706   :  { %v1429_v8 = vpop.permute.xlu1 %1428 }
0x1707   :  { %1431 = vst.msk [vmem:[#allocation2 + $0x18] sm:$0xff] %vm606_vm2, %v1429_v8 }
0x1709   :  { %810 = vrot.lane.b32.xlu0 %v9946_v46, %s9427_s6  ;;  %v2323_v46 = vld [vmem:[#allocation20] sm:$0xff] }
0x170a   :  { %v1017_v9 = vpop.permute.xlu1 %1016  ;;  %v10210_v17 = vpack.c.bf16 %v2324_v10, %v2323_v46  ;;  %v2051_v24 = vld [vmem:[#allocation2 + $0x8] sm:$0xff] }
0x170b   :  { %1019 = vst.msk [vmem:[#allocation2 + $0x28] sm:$0xff] %vm606_vm2, %v1017_v9 }
0x170c   :  { %1632 = vst.msk [vmem:[#allocation2 + $0x28] sm:$0xff] %vm403_vm1, %v10132_v23  ;;  %v2330_v23 = vld [vmem:[#allocation21 + $0x18] sm:$0xff] }
0x170d   :  { %2041 = vrot.lane.b32.xlu0 %v2033_v11, %s9426_s16  ;;  %v10220_v27 = vpack.c.bf16 %v2330_v23, %v2329_v18 }
0x170e   :  { %v604_v12 = vpop.permute.xlu1 %603 }
0x170f   :  { %607 = vst.msk [vmem:[#allocation2 + $0x38] sm:$0xff] %vm606_vm2, %v604_v12 }
0x176f   :  { %v2047_v32 = vpop.permute.xlu0 %2046 }
0x1770   :  { %2049 = vst.msk [vmem:[#allocation2] sm:$0xff] %vm606_vm2, %v2047_v32 }
0x1773   :  { %v1635_v16 = vpop.permute.xlu0 %1634 }
0x1774   :  { %1637 = vst.msk [vmem:[#allocation2 + $0x10] sm:$0xff] %vm606_vm2, %v1635_v16 }
0x1777   :  { %v1223_v19 = vpop.permute.xlu0 %1222  ;;  %v2050_v20 = vld [vmem:[#allocation2] sm:$0xff] }
0x1778   :  { %1225 = vst.msk [vmem:[#allocation2 + $0x20] sm:$0xff] %vm606_vm2, %v1223_v19  ;;  %7254 = vmatprep.mubr.msk.f32.mxu0 %vm2073_vm3, %v2050_v20  ;;  %7282 = vmatprep.mubr.msk.f32.mxu1 %vm2073_vm3, %v2050_v20 }
0x1779   :  { %1426 = vst.msk [vmem:[#allocation2 + $0x20] sm:$0xff] %vm403_vm1, %v10096_v33  ;;  %7255 = vmatmul.mubr.msk.f32.vlgmr.msra.gmra.mrb[16].mxu0 %vm2073_vm3, %v2051_v24  ;;  %7283 = vmatmul.mubr.msk.f32.vlgmr.msra.gmra.mrb[16].mxu1 %vm2073_vm3, %v2051_v24  ;;  %v2053_v33 = vld [vmem:[#allocation2 + $0x18] sm:$0xff] }
0x177a   :  { %8013 = vmatpush3.bf16.msra.mxu1 %v10208_v25  ;;  %8007 = vmatpush3.bf16.msra.mxu0 %v10210_v17 }
0x177b   :  { %v811_v6 = vpop.permute.xlu0 %810  ;;  %v2052_v15 = vld [vmem:[#allocation2 + $0x10] sm:$0xff]  ;;  %8014 = vmatprep.subr.bf16.mxu1 %v9421_v0  ;;  %8008 = vmatprep.subr.bf16.mxu0 %v9421_v0 }
0x177c   :  { %813 = vst.msk [vmem:[#allocation2 + $0x30] sm:$0xff] %vm606_vm2, %v811_v6  ;;  %7257 = vmatprep.mubr.msk.f32.mxu0 %vm2073_vm3, %v2052_v15  ;;  %7285 = vmatprep.mubr.msk.f32.mxu1 %vm2073_vm3, %v2052_v15 }
0x177d   :  { %1838 = vst.msk [vmem:[#allocation2 + $0x30] sm:$0xff] %vm403_vm1, %v10157_v62  ;;  %7258 = vmatmul.mubr.msk.f32.gmra.mrb[18].mxu0 %vm2073_vm3, %v2053_v33  ;;  %7286 = vmatmul.mubr.msk.f32.gmra.mrb[18].mxu1 %vm2073_vm3, %v2053_v33  ;;  %v2055_v62 = vld [vmem:[#allocation2 + $0x28] sm:$0xff] }
0x177e   :  { %8016 = vmatpush3.bf16.msra.mxu1 %v10220_v27  ;;  %8010 = vmatpush3.bf16.msra.mxu0 %v10223_v29 }
0x177f   :  { %v2042_v30 = vpop.permute.xlu0 %2041  ;;  %8017 = vmatprep.subr.bf16.mxu0 %v9421_v0  ;;  %8023 = vmatprep.subr.bf16.mxu1 %v9421_v0 }
0x1780   :  { %2044 = vst.msk [vmem:[#allocation2 + $0x38] sm:$0xff] %vm403_vm1, %v2042_v30  ;;  %v2054_v31 = vld [vmem:[#allocation2 + $0x20] sm:$0xff] }
0x1781   :  { %7260 = vmatprep.mubr.msk.f32.mxu0 %vm2073_vm3, %v2054_v31  ;;  %7288 = vmatprep.mubr.msk.f32.mxu1 %vm2073_vm3, %v2054_v31 }
0x1782   :  { %7261 = vmatmul.mubr.msk.f32.gmra.mrb[20].mxu0 %vm2073_vm3, %v2055_v62  ;;  %7289 = vmatmul.mubr.msk.f32.gmra.mrb[20].mxu1 %vm2073_vm3, %v2055_v62 }
0x1784   :  { %v2056_v34 = vld [vmem:[#allocation2 + $0x30] sm:$0xff] }
0x1785   :  { %7263 = vmatprep.mubr.msk.f32.mxu0 %vm2073_vm3, %v2056_v34  ;;  %7291 = vmatprep.mubr.msk.f32.mxu1 %vm2073_vm3, %v2056_v34 }
0x1787   :  { %v2057_v36 = vld [vmem:[#allocation2 + $0x38] sm:$0xff] }
0x1788   :  { %7264 = vmatmul.mubr.msk.f32.gmra.mrb[22].mxu0 %vm2073_vm3, %v2057_v36  ;;  %7292 = vmatmul.mubr.msk.f32.gmra.mrb[22].mxu1 %vm2073_vm3, %v2057_v36 }
0x1789   :  { %7302 = vmatprep.mubr.msk.f32.mxu0 %vm9422_vm0, %v9423_v1  ;;  %7313 = vmatprep.mubr.msk.f32.mxu1 %vm9422_vm0, %v9423_v1 }
0x178c   :  { %7303 = vmatmul.mubr.f32.vlgmr.msra.gmra.mrb[24].mxu0 %v9423_v1  ;;  %7314 = vmatmul.mubr.f32.vlgmr.msra.gmra.mrb[24].mxu1 %v9423_v1 }
0x178d   :  { %8019 = vmatpush3.bf16.msra.mxu0 %v10210_v17  ;;  %8025 = vmatpush3.bf16.msra.mxu1 %v10208_v25 }
0x178e   :  { %8020 = vmatprep.subr.bf16.mxu0 %v9421_v0  ;;  %8026 = vmatprep.subr.bf16.mxu1 %v9421_v0 }
0x178f   :  { %7335 = vmatprep.mubr.msk.f32.mxu1 %vm9422_vm0, %v9423_v1  ;;  %7324 = vmatprep.mubr.msk.f32.mxu0 %vm9422_vm0, %v9423_v1 }
0x1791   :  { %8022 = vmatpush3.bf16.msra.mxu0 %v10223_v29  ;;  %8028 = vmatpush3.bf16.msra.mxu1 %v10220_v27 }
0x1792   :  { %8029 = vmatprep.subr.bf16.mxu0 %v9421_v0  ;;  %8035 = vmatprep.subr.bf16.mxu1 %v9421_v0 }
0x184c   :  { %v7256_v63 = vpop.f32.mrb[16].mxu0  ;;  %v7284_v37 = vpop.f32.mrb[16].mxu1 }
0x184d   :  { %v10265_v38 = vadd.f32 %v7256_v63, %v6525_v14  ;;  %v10267_v35 = vadd.f32 %v7284_v37, %v6534_v2  ;;  %v2164_v40 = vpop.f32.mrb[17].mxu0  ;;  %v2284_v41 = vpop.f32.mrb[17].mxu1 }
0x184e   :  { %v10269_v42 = vadd.f32 %v6534_v2, %v2284_v41  ;;  %v2165_v7 = vadd.f32 %v6525_v14, %v2164_v40 }
0x1850   :  { %v7259_v43 = vpop.f32.mrb[18].mxu0  ;;  %v7287_v44 = vpop.f32.mrb[18].mxu1 }
0x1851   :  { %v10271_v45 = vadd.f32 %v7259_v43, %v6525_v14  ;;  %v10273_v48 = vadd.f32 %v7287_v44, %v6534_v2  ;;  %v2174_v55 = vpop.f32.mrb[19].mxu0  ;;  %v2294_v53 = vpop.f32.mrb[19].mxu1 }
0x1852   :  { %v10275_v50 = vadd.f32 %v6525_v14, %v2174_v55  ;;  %v10277_v51 = vadd.f32 %v6534_v2, %v2294_v53 }
0x1855   :  { %v7262_v52 = vpop.f32.mrb[20].mxu0  ;;  %v7290_v54 = vpop.f32.mrb[20].mxu1 }
0x1856   :  { %v10279_v57 = vadd.f32 %v7262_v52, %v6525_v14  ;;  %v10281_v58 = vadd.f32 %v7290_v54, %v6534_v2  ;;  %v2184_v49 = vpop.f32.mrb[21].mxu0  ;;  %v2304_v47 = vpop.f32.mrb[21].mxu1 }
0x1857   :  { %v10283_v28 = vadd.f32 %v6525_v14, %v2184_v49  ;;  %v10285_v59 = vadd.f32 %v6534_v2, %v2304_v47 }
0x185b   :  { %v7265_v60 = vpop.f32.mrb[22].mxu0  ;;  %v7293_v61 = vpop.f32.mrb[22].mxu1 }
0x185c   :  { %v10287_v3 = vadd.f32 %v7265_v60, %v6525_v14  ;;  %v2194_v39 = vpop.f32.mrb[23].mxu0  ;;  %v2314_v56 = vpop.f32.mrb[23].mxu1  ;;  %v2320_v8 = vadd.f32 %v7293_v61, %v6534_v2 }
0x185d   :  { %v10289_v4 = vadd.f32 %v6525_v14, %v2194_v39  ;;  %v10291_v5 = vadd.f32 %v6534_v2, %v2314_v56 }
0x185f   :  { %v2397_v9 = vpop.f32.mrb[24].mxu0  ;;  %v2468_v11 = vpop.f32.mrb[24].mxu1 }
0x1860   :  { %v2401_v12 = vadd.f32 %v2397_v9, %v2165_v7  ;;  %v2472_v32 = vadd.f32 %v2468_v11, %v2320_v8  ;;  %v7315_v13 = vpop.f32.mrb[25].mxu1  ;;  %v7304_v16 = vpop.f32.mrb[25].mxu0 }
0x1862   :  { %8853 = vtanh.f32 %v2401_v12  ;;  %v6543_v10 = vmul.f32 -1.442695, %v2401_v12  ;;  %v6544_v18 = vmul.f32 -1.442695, %v2472_v32 }
0x1863   :  { %8855 = vtanh.f32 %v2472_v32 }
0x1864   :  { %8857 = vpow2.f32 %v6543_v10 }
0x1865   :  { %8859 = vpow2.f32 %v6544_v18 }
0x186c   :  { %v8854_v21 = vpop.eup %8853 }
0x186d   :  { %v8856_v46 = vpop.eup %8855  ;;  %2489 = vrot.lane.b32.xlu0 %v8854_v21, %s9425_s29 }
0x186e   :  { %2500 = vrot.lane.b32.xlu1 %v8856_v46, %s9425_s29  ;;  %v8858_v23 = vpop.eup %8857 }
0x186f   :  { %v8860_v19 = vpop.eup %8859  ;;  %v2476_v20 = vadd.f32 1.0, %v8858_v23 }
0x1870   :  { %v2482_v22 = vadd.f32 1.0, %v8860_v19 }
0x1871   :  { %8861 = vrcp.f32 %v2476_v20 }
0x1872   :  { %8863 = vrcp.f32 %v2482_v22 }
0x187b   :  { %v8862_v26 = vpop.eup %8861 }
0x187c   :  { %v8864_v6 = vpop.eup %8863  ;;  %v2487_v31 = vmul.f32 0.0, %v8862_v26 }
0x187d   :  { %v2498_v62 = vmul.f32 0.0, %v8864_v6 }
0x18df   :  { %v2490_v24 = vpop.permute.xlu0 %2489 }
0x18e0   :  { %v2501_v15 = vpop.permute.xlu1 %2500  ;;  %v2492_v33 = vmul.f32 %v8862_v26, %v2490_v24 }
0x18e1   :  { %v2503_v30 = vmul.f32 %v8864_v6, %v2501_v15 }
0x18e2   :  { %2494 = vrot.lane.b32.xlu0 %v2492_v33, %s9425_s29 }
0x18e3   :  { %2505 = vrot.lane.b32.xlu1 %v2503_v30, %s9425_s29 }
0x1954   :  { %v2495_v34 = vpop.permute.xlu0 %2494 }
0x1955   :  { %v2506_v36 = vpop.permute.xlu1 %2505  ;;  %v2497_v14 = vadd.f32 %v2495_v34, %v2487_v31 }
0x1956   :  { %v2508_v2 = vadd.f32 %v2506_v36, %v2498_v62 }
0x1957   :  { %8865 = vtanh.f32 %v2497_v14 }
0x1958   :  { %8867 = vtanh.f32 %v2508_v2 }
0x1961   :  { %v8866_v63 = vpop.eup %8865 }
0x1962   :  { %v8868_v37 = vpop.eup %8867  ;;  %2511 = vrot.lane.b32.xlu0 %v8866_v63, %s9425_s29 }
0x1963   :  { %2517 = vrot.lane.b32.xlu1 %v8868_v37, %s9425_s29 }
0x19d4   :  { %v2512_v40 = vpop.permute.xlu0 %2511 }
0x19d5   :  { %v2518_v41 = vpop.permute.xlu1 %2517  ;;  %v2514_v43 = vmul.f32 %v8862_v26, %v2512_v40 }
0x19d6   :  { %v10299_v44 = vmul.f32 %v8864_v6, %v2518_v41 }
0x19d7   :  { %2522 = vrot.lane.b32.xlu0 %v2514_v43, %s9426_s16 }
0x19d8   :  { %2604 = vrot.lane.b32.xlu1 %v10299_v44, %s9426_s16 }
0x1a49   :  { %v2523_v55 = vpop.permute.xlu0 %2522 }
0x1a4a   :  { %v2605_v53 = vpop.permute.xlu1 %2604  ;;  %2525 = vst.msk [vmem:[#allocation3] sm:$0xff] %vm403_vm1, %v2523_v55  ;;  %7325 = vmatmul.mubr.msk.f32.vlgmr.msra.gmra.mrb[26].mxu0 %vm403_vm1, %v2523_v55 }
0x1a4b   :  { %7336 = vmatmul.mubr.msk.f32.vlgmr.msra.gmra.mrb[26].mxu1 %vm403_vm1, %v2605_v53  ;;  %8031 = vmatpush3.bf16.msra.mxu0 %v10210_v17 }
0x1a4c   :  { %8037 = vmatpush3.bf16.msra.mxu1 %v10208_v25  ;;  %8032 = vmatprep.subr.bf16.mxu0 %v9421_v0 }
0x1a4d   :  { %8038 = vmatprep.subr.bf16.mxu1 %v9421_v0  ;;  %7357 = vmatprep.mubr.msk.f32.mxu1 %vm9422_vm0, %v9423_v1 }
0x1a4e   :  { %7346 = vmatprep.mubr.msk.f32.mxu0 %vm9422_vm0, %v9423_v1 }
0x1a4f   :  { %8034 = vmatpush3.bf16.msra.mxu0 %v10223_v29 }
0x1a50   :  { %8040 = vmatpush3.bf16.msra.mxu1 %v10220_v27  ;;  %8041 = vmatprep.subr.bf16.mxu0 %v9421_v0 }
0x1a51   :  { %8047 = vmatprep.subr.bf16.mxu1 %v9421_v0 }
0x1b1d   :  { %v2599_v52 = vpop.f32.mrb[26].mxu0 }
0x1b1e   :  { %v2603_v54 = vadd.f32 %v2599_v52, %v10265_v38  ;;  %v2674_v49 = vpop.f32.mrb[26].mxu1  ;;  %v7326_v47 = vpop.f32.mrb[27].mxu0 }
0x1b1f   :  { %v2678_v60 = vadd.f32 %v2674_v49, %v10291_v5  ;;  %v7337_v61 = vpop.f32.mrb[27].mxu1 }
0x1b20   :  { %8869 = vtanh.f32 %v2603_v54  ;;  %v6547_v7 = vmul.f32 -1.442695, %v2603_v54 }
0x1b21   :  { %8871 = vtanh.f32 %v2678_v60  ;;  %v6548_v8 = vmul.f32 -1.442695, %v2678_v60 }
0x1b22   :  { %8873 = vpow2.f32 %v6547_v7 }
0x1b23   :  { %8875 = vpow2.f32 %v6548_v8 }
0x1b2a   :  { %v8870_v39 = vpop.eup %8869 }
0x1b2b   :  { %v8872_v56 = vpop.eup %8871  ;;  %2695 = vrot.lane.b32.xlu0 %v8870_v39, %s9425_s29 }
0x1b2c   :  { %2706 = vrot.lane.b32.xlu1 %v8872_v56, %s9425_s29  ;;  %v8874_v9 = vpop.eup %8873 }
0x1b2d   :  { %v8876_v11 = vpop.eup %8875  ;;  %v2682_v38 = vadd.f32 1.0, %v8874_v9 }
0x1b2e   :  { %v2688_v12 = vadd.f32 1.0, %v8876_v11 }
0x1b2f   :  { %8877 = vrcp.f32 %v2682_v38 }
0x1b30   :  { %8879 = vrcp.f32 %v2688_v12 }
0x1b39   :  { %v8878_v5 = vpop.eup %8877 }
0x1b3a   :  { %v8880_v13 = vpop.eup %8879  ;;  %v2693_v10 = vmul.f32 %v8878_v5, %v2497_v14 }
0x1b3b   :  { %v2704_v18 = vmul.f32 %v8880_v13, %v2508_v2 }
0x1b9d   :  { %v2696_v32 = vpop.permute.xlu0 %2695 }
0x1b9e   :  { %v2707_v16 = vpop.permute.xlu1 %2706  ;;  %v2698_v21 = vmul.f32 %v8878_v5, %v2696_v32 }
0x1b9f   :  { %v2709_v46 = vmul.f32 %v8880_v13, %v2707_v16 }
0x1ba0   :  { %2700 = vrot.lane.b32.xlu0 %v2698_v21, %s9425_s29 }
0x1ba1   :  { %2711 = vrot.lane.b32.xlu1 %v2709_v46, %s9425_s29 }
0x1c12   :  { %v2701_v23 = vpop.permute.xlu0 %2700 }
0x1c13   :  { %v2712_v19 = vpop.permute.xlu1 %2711  ;;  %v2703_v20 = vadd.f32 %v2701_v23, %v2693_v10 }
0x1c14   :  { %v2714_v22 = vadd.f32 %v2712_v19, %v2704_v18 }
0x1c15   :  { %8881 = vtanh.f32 %v2703_v20 }
0x1c16   :  { %8883 = vtanh.f32 %v2714_v22 }
0x1c1f   :  { %v8882_v26 = vpop.eup %8881 }
0x1c20   :  { %v8884_v24 = vpop.eup %8883  ;;  %2717 = vrot.lane.b32.xlu0 %v8882_v26, %s9425_s29 }
0x1c21   :  { %2723 = vrot.lane.b32.xlu1 %v8884_v24, %s9425_s29 }
0x1c92   :  { %v2718_v6 = vpop.permute.xlu0 %2717 }
0x1c93   :  { %v2724_v15 = vpop.permute.xlu1 %2723  ;;  %v2720_v33 = vmul.f32 %v8878_v5, %v2718_v6 }
0x1c94   :  { %v10327_v30 = vmul.f32 %v8880_v13, %v2724_v15 }
0x1c95   :  { %2728 = vrot.lane.b32.xlu0 %v2720_v33, %s9426_s16 }
0x1c96   :  { %2810 = vrot.lane.b32.xlu1 %v10327_v30, %s9426_s16 }
0x1d07   :  { %v2729_v31 = vpop.permute.xlu0 %2728 }
0x1d08   :  { %v2811_v62 = vpop.permute.xlu1 %2810  ;;  %2731 = vst.msk [vmem:[#allocation3 + $0x8] sm:$0xff] %vm403_vm1, %v2729_v31  ;;  %7347 = vmatmul.mubr.msk.f32.vlgmr.msra.gmra.mrb[28].mxu0 %vm403_vm1, %v2729_v31 }
0x1d09   :  { %7358 = vmatmul.mubr.msk.f32.vlgmr.msra.gmra.mrb[28].mxu1 %vm403_vm1, %v2811_v62  ;;  %8043 = vmatpush3.bf16.msra.mxu0 %v10210_v17 }
0x1d0a   :  { %8049 = vmatpush3.bf16.msra.mxu1 %v10208_v25  ;;  %8044 = vmatprep.subr.bf16.mxu0 %v9421_v0 }
0x1d0b   :  { %8050 = vmatprep.subr.bf16.mxu1 %v9421_v0  ;;  %7379 = vmatprep.mubr.msk.f32.mxu1 %vm9422_vm0, %v9423_v1 }
0x1d0c   :  { %7368 = vmatprep.mubr.msk.f32.mxu0 %vm9422_vm0, %v9423_v1 }
0x1d0d   :  { %8046 = vmatpush3.bf16.msra.mxu0 %v10223_v29 }
0x1d0e   :  { %8052 = vmatpush3.bf16.msra.mxu1 %v10220_v27  ;;  %8053 = vmatprep.subr.bf16.mxu0 %v9421_v0 }
0x1d0f   :  { %8059 = vmatprep.subr.bf16.mxu1 %v9421_v0 }
0x1ddb   :  { %v2805_v34 = vpop.f32.mrb[28].mxu0 }
0x1ddc   :  { %v2809_v36 = vadd.f32 %v2805_v34, %v10275_v50  ;;  %v2880_v14 = vpop.f32.mrb[28].mxu1  ;;  %v7348_v2 = vpop.f32.mrb[29].mxu0 }
0x1ddd   :  { %v2884_v63 = vadd.f32 %v2880_v14, %v10281_v58  ;;  %v7359_v37 = vpop.f32.mrb[29].mxu1 }
0x1dde   :  { %8885 = vtanh.f32 %v2809_v36  ;;  %v6551_v43 = vmul.f32 -1.442695, %v2809_v36 }
0x1ddf   :  { %8887 = vtanh.f32 %v2884_v63  ;;  %v6552_v55 = vmul.f32 -1.442695, %v2884_v63 }
0x1de0   :  { %8889 = vpow2.f32 %v6551_v43 }
0x1de1   :  { %8891 = vpow2.f32 %v6552_v55 }
0x1de8   :  { %v8886_v40 = vpop.eup %8885 }
0x1de9   :  { %v8888_v41 = vpop.eup %8887  ;;  %2901 = vrot.lane.b32.xlu0 %v8886_v40, %s9425_s29 }
0x1dea   :  { %2912 = vrot.lane.b32.xlu1 %v8888_v41, %s9425_s29  ;;  %v8890_v53 = vpop.eup %8889 }
0x1deb   :  { %v8892_v52 = vpop.eup %8891  ;;  %v2888_v50 = vadd.f32 1.0, %v8890_v53 }
0x1dec   :  { %v2894_v54 = vadd.f32 1.0, %v8892_v52 }
0x1ded   :  { %8893 = vrcp.f32 %v2888_v50 }
0x1dee   :  { %8895 = vrcp.f32 %v2894_v54 }
0x1df7   :  { %v8894_v58 = vpop.eup %8893 }
0x1df8   :  { %v8896_v47 = vpop.eup %8895  ;;  %v2899_v56 = vmul.f32 %v8894_v58, %v2703_v20 }
0x1df9   :  { %v2910_v7 = vmul.f32 %v8896_v47, %v2714_v22 }
0x1e5b   :  { %v2902_v49 = vpop.permute.xlu0 %2901 }
0x1e5c   :  { %v2913_v60 = vpop.permute.xlu1 %2912  ;;  %v2904_v61 = vmul.f32 %v8894_v58, %v2902_v49 }
0x1e5d   :  { %v2915_v39 = vmul.f32 %v8896_v47, %v2913_v60 }
0x1e5e   :  { %2906 = vrot.lane.b32.xlu0 %v2904_v61, %s9425_s29 }
0x1e5f   :  { %2917 = vrot.lane.b32.xlu1 %v2915_v39, %s9425_s29 }
0x1ed0   :  { %v2907_v8 = vpop.permute.xlu0 %2906 }
0x1ed1   :  { %v2918_v9 = vpop.permute.xlu1 %2917  ;;  %v2909_v11 = vadd.f32 %v2907_v8, %v2899_v56 }
0x1ed2   :  { %v2920_v38 = vadd.f32 %v2918_v9, %v2910_v7 }
0x1ed3   :  { %8897 = vtanh.f32 %v2909_v11 }
0x1ed4   :  { %8899 = vtanh.f32 %v2920_v38 }
0x1edd   :  { %v8898_v12 = vpop.eup %8897 }
0x1ede   :  { %v8900_v5 = vpop.eup %8899  ;;  %2923 = vrot.lane.b32.xlu0 %v8898_v12, %s9425_s29 }
0x1edf   :  { %2929 = vrot.lane.b32.xlu1 %v8900_v5, %s9425_s29 }
0x1f50   :  { %v2924_v32 = vpop.permute.xlu0 %2923 }
0x1f51   :  { %v2930_v13 = vpop.permute.xlu1 %2929  ;;  %v2926_v16 = vmul.f32 %v8894_v58, %v2924_v32 }
0x1f52   :  { %v10355_v21 = vmul.f32 %v8896_v47, %v2930_v13 }
0x1f53   :  { %2934 = vrot.lane.b32.xlu0 %v2926_v16, %s9426_s16 }
0x1f54   :  { %3016 = vrot.lane.b32.xlu1 %v10355_v21, %s9426_s16 }
0x1fc5   :  { %v2935_v46 = vpop.permute.xlu0 %2934 }
0x1fc6   :  { %v3017_v10 = vpop.permute.xlu1 %3016  ;;  %2937 = vst.msk [vmem:[#allocation3 + $0x10] sm:$0xff] %vm403_vm1, %v2935_v46  ;;  %7369 = vmatmul.mubr.msk.f32.vlgmr.msra.gmra.mrb[30].mxu0 %vm403_vm1, %v2935_v46 }
0x1fc7   :  { %7380 = vmatmul.mubr.msk.f32.vlgmr.msra.gmra.mrb[30].mxu1 %vm403_vm1, %v3017_v10  ;;  %8055 = vmatpush3.bf16.msra.mxu0 %v10210_v17 }
0x1fc8   :  { %8061 = vmatpush3.bf16.msra.mxu1 %v10208_v25  ;;  %8056 = vmatprep.subr.bf16.mxu0 %v9421_v0 }
0x1fc9   :  { %8062 = vmatprep.subr.bf16.mxu1 %v9421_v0  ;;  %7401 = vmatprep.mubr.msk.f32.mxu1 %vm9422_vm0, %v9423_v1 }
0x1fca   :  { %7390 = vmatprep.mubr.msk.f32.mxu0 %vm9422_vm0, %v9423_v1 }
0x1fcb   :  { %8058 = vmatpush3.bf16.msra.mxu0 %v10223_v29 }
0x1fcc   :  { %8064 = vmatpush3.bf16.msra.mxu1 %v10220_v27  ;;  %8065 = vmatprep.subr.bf16.mxu0 %v9421_v0 }
0x1fcd   :  { %8071 = vmatprep.subr.bf16.mxu1 %v9421_v0 }
0x2099   :  { %v3011_v18 = vpop.f32.mrb[30].mxu0 }
0x209a   :  { %v3015_v23 = vadd.f32 %v3011_v18, %v10271_v45  ;;  %v3086_v19 = vpop.f32.mrb[30].mxu1  ;;  %v7370_v20 = vpop.f32.mrb[31].mxu0 }
0x209b   :  { %v3090_v22 = vadd.f32 %v3086_v19, %v10285_v59  ;;  %v7381_v26 = vpop.f32.mrb[31].mxu1 }
0x209c   :  { %8901 = vtanh.f32 %v3015_v23  ;;  %v6555_v15 = vmul.f32 -1.442695, %v3015_v23 }
0x209d   :  { %8903 = vtanh.f32 %v3090_v22  ;;  %v6556_v33 = vmul.f32 -1.442695, %v3090_v22 }
0x209e   :  { %8905 = vpow2.f32 %v6555_v15 }
0x209f   :  { %8907 = vpow2.f32 %v6556_v33 }
0x20a6   :  { %v8902_v24 = vpop.eup %8901 }
0x20a7   :  { %v8904_v6 = vpop.eup %8903  ;;  %3107 = vrot.lane.b32.xlu0 %v8902_v24, %s9425_s29 }
0x20a8   :  { %3118 = vrot.lane.b32.xlu1 %v8904_v6, %s9425_s29  ;;  %v8906_v31 = vpop.eup %8905 }
0x20a9   :  { %v8908_v62 = vpop.eup %8907  ;;  %v3094_v45 = vadd.f32 1.0, %v8906_v31 }
0x20aa   :  { %v3100_v34 = vadd.f32 1.0, %v8908_v62 }
0x20ab   :  { %8909 = vrcp.f32 %v3094_v45 }
0x20ac   :  { %8911 = vrcp.f32 %v3100_v34 }
0x20b5   :  { %v8910_v59 = vpop.eup %8909 }
0x20b6   :  { %v8912_v14 = vpop.eup %8911  ;;  %v3105_v40 = vmul.f32 %v8910_v59, %v2909_v11 }
0x20b7   :  { %v3116_v41 = vmul.f32 %v8912_v14, %v2920_v38 }
0x2119   :  { %v3108_v36 = vpop.permute.xlu0 %3107 }
0x211a   :  { %v3119_v2 = vpop.permute.xlu1 %3118  ;;  %v3110_v63 = vmul.f32 %v8910_v59, %v3108_v36 }
0x211b   :  { %v3121_v37 = vmul.f32 %v8912_v14, %v3119_v2 }
0x211c   :  { %3112 = vrot.lane.b32.xlu0 %v3110_v63, %s9425_s29 }
0x211d   :  { %3123 = vrot.lane.b32.xlu1 %v3121_v37, %s9425_s29 }
0x218e   :  { %v3113_v43 = vpop.permute.xlu0 %3112 }
0x218f   :  { %v3124_v55 = vpop.permute.xlu1 %3123  ;;  %v3115_v53 = vadd.f32 %v3113_v43, %v3105_v40 }
0x2190   :  { %v3126_v52 = vadd.f32 %v3124_v55, %v3116_v41 }
0x2191   :  { %8913 = vtanh.f32 %v3115_v53 }
0x2192   :  { %8915 = vtanh.f32 %v3126_v52 }
0x219b   :  { %v8914_v50 = vpop.eup %8913 }
0x219c   :  { %v8916_v54 = vpop.eup %8915  ;;  %3129 = vrot.lane.b32.xlu0 %v8914_v50, %s9425_s29 }
0x219d   :  { %3135 = vrot.lane.b32.xlu1 %v8916_v54, %s9425_s29 }
0x220e   :  { %v3130_v58 = vpop.permute.xlu0 %3129 }
0x220f   :  { %v3136_v49 = vpop.permute.xlu1 %3135  ;;  %v3132_v47 = vmul.f32 %v8910_v59, %v3130_v58 }
0x2210   :  { %v10383_v60 = vmul.f32 %v8912_v14, %v3136_v49 }
0x2211   :  { %3140 = vrot.lane.b32.xlu0 %v3132_v47, %s9426_s16 }
0x2212   :  { %3222 = vrot.lane.b32.xlu1 %v10383_v60, %s9426_s16 }
0x2283   :  { %v3141_v61 = vpop.permute.xlu0 %3140 }
0x2284   :  { %v3223_v39 = vpop.permute.xlu1 %3222  ;;  %3143 = vst.msk [vmem:[#allocation3 + $0x18] sm:$0xff] %vm403_vm1, %v3141_v61  ;;  %7391 = vmatmul.mubr.msk.f32.vlgmr.msra.gmra.mrb[32].mxu0 %vm403_vm1, %v3141_v61 }
0x2285   :  { %7402 = vmatmul.mubr.msk.f32.vlgmr.msra.gmra.mrb[32].mxu1 %vm403_vm1, %v3223_v39  ;;  %8067 = vmatpush3.bf16.msra.mxu0 %v10210_v17 }
0x2286   :  { %8073 = vmatpush3.bf16.msra.mxu1 %v10208_v25  ;;  %8068 = vmatprep.subr.bf16.mxu0 %v9421_v0 }
0x2287   :  { %8074 = vmatprep.subr.bf16.mxu1 %v9421_v0  ;;  %7423 = vmatprep.mubr.msk.f32.mxu1 %vm9422_vm0, %v9423_v1 }
0x2288   :  { %7412 = vmatprep.mubr.msk.f32.mxu0 %vm9422_vm0, %v9423_v1 }
0x2289   :  { %8070 = vmatpush3.bf16.msra.mxu0 %v10223_v29 }
0x228a   :  { %8076 = vmatpush3.bf16.msra.mxu1 %v10220_v27  ;;  %8077 = vmatprep.subr.bf16.mxu0 %v9421_v0 }
0x228b   :  { %8083 = vmatprep.subr.bf16.mxu1 %v9421_v0 }
0x2357   :  { %v3217_v56 = vpop.f32.mrb[32].mxu0 }
0x2358   :  { %v3221_v7 = vadd.f32 %v3217_v56, %v10283_v28  ;;  %v3292_v8 = vpop.f32.mrb[32].mxu1  ;;  %v7392_v9 = vpop.f32.mrb[33].mxu0 }
0x2359   :  { %v3296_v11 = vadd.f32 %v3292_v8, %v10273_v48  ;;  %v7403_v38 = vpop.f32.mrb[33].mxu1 }
0x235a   :  { %8917 = vtanh.f32 %v3221_v7  ;;  %v6559_v32 = vmul.f32 -1.442695, %v3221_v7 }
0x235b   :  { %8919 = vtanh.f32 %v3296_v11  ;;  %v6560_v13 = vmul.f32 -1.442695, %v3296_v11 }
0x235c   :  { %8921 = vpow2.f32 %v6559_v32 }
0x235d   :  { %8923 = vpow2.f32 %v6560_v13 }
0x2364   :  { %v8918_v12 = vpop.eup %8917 }
0x2365   :  { %v8920_v5 = vpop.eup %8919  ;;  %3313 = vrot.lane.b32.xlu0 %v8918_v12, %s9425_s29 }
0x2366   :  { %3324 = vrot.lane.b32.xlu1 %v8920_v5, %s9425_s29  ;;  %v8922_v16 = vpop.eup %8921 }
0x2367   :  { %v8924_v46 = vpop.eup %8923  ;;  %v3300_v28 = vadd.f32 1.0, %v8922_v16 }
0x2368   :  { %v3306_v10 = vadd.f32 1.0, %v8924_v46 }
0x2369   :  { %8925 = vrcp.f32 %v3300_v28 }
0x236a   :  { %8927 = vrcp.f32 %v3306_v10 }
0x2373   :  { %v8926_v48 = vpop.eup %8925 }
0x2374   :  { %v8928_v23 = vpop.eup %8927  ;;  %v3311_v26 = vmul.f32 %v8926_v48, %v3115_v53 }
0x2375   :  { %v3322_v24 = vmul.f32 %v8928_v23, %v3126_v52 }
0x23d7   :  { %v3314_v18 = vpop.permute.xlu0 %3313 }
0x23d8   :  { %v3325_v19 = vpop.permute.xlu1 %3324  ;;  %v3316_v20 = vmul.f32 %v8926_v48, %v3314_v18 }
0x23d9   :  { %v3327_v22 = vmul.f32 %v8928_v23, %v3325_v19 }
0x23da   :  { %3318 = vrot.lane.b32.xlu0 %v3316_v20, %s9425_s29 }
0x23db   :  { %3329 = vrot.lane.b32.xlu1 %v3327_v22, %s9425_s29 }
0x244c   :  { %v3319_v6 = vpop.permute.xlu0 %3318 }
0x244d   :  { %v3330_v15 = vpop.permute.xlu1 %3329  ;;  %v3321_v33 = vadd.f32 %v3319_v6, %v3311_v26 }
0x244e   :  { %v3332_v31 = vadd.f32 %v3330_v15, %v3322_v24 }
0x244f   :  { %8929 = vtanh.f32 %v3321_v33 }
0x2450   :  { %8931 = vtanh.f32 %v3332_v31 }
0x2459   :  { %v8930_v62 = vpop.eup %8929 }
0x245a   :  { %v8932_v45 = vpop.eup %8931  ;;  %3335 = vrot.lane.b32.xlu0 %v8930_v62, %s9425_s29 }
0x245b   :  { %3341 = vrot.lane.b32.xlu1 %v8932_v45, %s9425_s29 }
0x24cc   :  { %v3336_v34 = vpop.permute.xlu0 %3335 }
0x24cd   :  { %v3342_v59 = vpop.permute.xlu1 %3341  ;;  %v3338_v36 = vmul.f32 %v8926_v48, %v3336_v34 }
0x24ce   :  { %v10411_v14 = vmul.f32 %v8928_v23, %v3342_v59 }
0x24cf   :  { %3346 = vrot.lane.b32.xlu0 %v3338_v36, %s9426_s16 }
0x24d0   :  { %3428 = vrot.lane.b32.xlu1 %v10411_v14, %s9426_s16 }
0x2541   :  { %v10416_v2 = vpop.permute.xlu0 %3346 }
0x2542   :  { %v3429_v63 = vpop.permute.xlu1 %3428  ;;  %7413 = vmatmul.mubr.msk.f32.vlgmr.msra.gmra.mrb[34].mxu0 %vm403_vm1, %v10416_v2 }
0x2543   :  { %7424 = vmatmul.mubr.msk.f32.vlgmr.msra.gmra.mrb[34].mxu1 %vm403_vm1, %v3429_v63  ;;  %8079 = vmatpush3.bf16.msra.mxu0 %v10210_v17 }
0x2544   :  { %8085 = vmatpush3.bf16.msra.mxu1 %v10208_v25  ;;  %8080 = vmatprep.subr.bf16.mxu0 %v9421_v0 }
0x2545   :  { %8086 = vmatprep.subr.bf16.mxu1 %v9421_v0  ;;  %7445 = vmatprep.mubr.msk.f32.mxu1 %vm9422_vm0, %v9423_v1 }
0x2546   :  { %7434 = vmatprep.mubr.msk.f32.mxu0 %vm9422_vm0, %v9423_v1 }
0x2547   :  { %8082 = vmatpush3.bf16.msra.mxu0 %v10223_v29 }
0x2548   :  { %8088 = vmatpush3.bf16.msra.mxu1 %v10220_v27  ;;  %8089 = vmatprep.subr.bf16.mxu0 %v9421_v0 }
0x2549   :  { %8095 = vmatprep.subr.bf16.mxu1 %v9421_v0 }
0x2615   :  { %v3423_v37 = vpop.f32.mrb[34].mxu0 }
0x2616   :  { %v3427_v40 = vadd.f32 %v3423_v37, %v10279_v57  ;;  %v3498_v41 = vpop.f32.mrb[34].mxu1  ;;  %v7414_v43 = vpop.f32.mrb[35].mxu0 }
0x2617   :  { %v3502_v55 = vadd.f32 %v3498_v41, %v10277_v51  ;;  %v7425_v53 = vpop.f32.mrb[35].mxu1 }
0x2618   :  { %8933 = vtanh.f32 %v3427_v40  ;;  %v6563_v54 = vmul.f32 -1.442695, %v3427_v40 }
0x2619   :  { %8935 = vtanh.f32 %v3502_v55  ;;  %v6564_v58 = vmul.f32 -1.442695, %v3502_v55 }
0x261a   :  { %8937 = vpow2.f32 %v6563_v54 }
0x261b   :  { %8939 = vpow2.f32 %v6564_v58 }
0x2622   :  { %v8934_v52 = vpop.eup %8933 }
0x2623   :  { %v8936_v50 = vpop.eup %8935  ;;  %3519 = vrot.lane.b32.xlu0 %v8934_v52, %s9425_s29 }
0x2624   :  { %3530 = vrot.lane.b32.xlu1 %v8936_v50, %s9425_s29  ;;  %v8938_v49 = vpop.eup %8937 }
0x2625   :  { %v8940_v47 = vpop.eup %8939  ;;  %v3506_v57 = vadd.f32 1.0, %v8938_v49 }
0x2626   :  { %v3512_v61 = vadd.f32 1.0, %v8940_v47 }
0x2627   :  { %8941 = vrcp.f32 %v3506_v57 }
0x2628   :  { %8943 = vrcp.f32 %v3512_v61 }
0x2631   :  { %v8942_v51 = vpop.eup %8941 }
0x2632   :  { %v8944_v56 = vpop.eup %8943  ;;  %v3517_v11 = vmul.f32 %v8942_v51, %v3321_v33 }
0x2633   :  { %v3528_v38 = vmul.f32 %v8944_v56, %v3332_v31 }
0x2695   :  { %v3520_v39 = vpop.permute.xlu0 %3519 }
0x2696   :  { %v3531_v7 = vpop.permute.xlu1 %3530  ;;  %v3522_v8 = vmul.f32 %v8942_v51, %v3520_v39 }
0x2697   :  { %v3533_v9 = vmul.f32 %v8944_v56, %v3531_v7 }
0x2698   :  { %3524 = vrot.lane.b32.xlu0 %v3522_v8, %s9425_s29 }
0x2699   :  { %3535 = vrot.lane.b32.xlu1 %v3533_v9, %s9425_s29 }
0x270a   :  { %v3525_v12 = vpop.permute.xlu0 %3524 }
0x270b   :  { %v3536_v5 = vpop.permute.xlu1 %3535  ;;  %v3527_v32 = vadd.f32 %v3525_v12, %v3517_v11 }
0x270c   :  { %v3538_v13 = vadd.f32 %v3536_v5, %v3528_v38 }
0x270d   :  { %8945 = vtanh.f32 %v3527_v32 }
0x270e   :  { %8947 = vtanh.f32 %v3538_v13 }
0x2717   :  { %v8946_v16 = vpop.eup %8945 }
0x2718   :  { %v8948_v46 = vpop.eup %8947  ;;  %3541 = vrot.lane.b32.xlu0 %v8946_v16, %s9425_s29 }
0x2719   :  { %3547 = vrot.lane.b32.xlu1 %v8948_v46, %s9425_s29 }
0x278a   :  { %v3542_v28 = vpop.permute.xlu0 %3541 }
0x278b   :  { %v3548_v10 = vpop.permute.xlu1 %3547  ;;  %v3544_v48 = vmul.f32 %v8942_v51, %v3542_v28 }
0x278c   :  { %v10441_v18 = vmul.f32 %v8944_v56, %v3548_v10 }
0x278d   :  { %3552 = vrot.lane.b32.xlu0 %v3544_v48, %s9426_s16 }
0x278e   :  { %3634 = vrot.lane.b32.xlu1 %v10441_v18, %s9426_s16 }
0x27ff   :  { %v10446_v23 = vpop.permute.xlu0 %3552 }
0x2800   :  { %v3635_v19 = vpop.permute.xlu1 %3634  ;;  %7435 = vmatmul.mubr.msk.f32.vlgmr.msra.gmra.mrb[36].mxu0 %vm403_vm1, %v10446_v23 }
0x2801   :  { %7446 = vmatmul.mubr.msk.f32.vlgmr.msra.gmra.mrb[36].mxu1 %vm403_vm1, %v3635_v19  ;;  %8091 = vmatpush3.bf16.msra.mxu0 %v10210_v17 }
0x2802   :  { %8097 = vmatpush3.bf16.msra.mxu1 %v10208_v25  ;;  %8092 = vmatprep.subr.bf16.mxu0 %v9421_v0 }
0x2803   :  { %8098 = vmatprep.subr.bf16.mxu1 %v9421_v0  ;;  %7467 = vmatprep.mubr.msk.f32.mxu1 %vm9422_vm0, %v9423_v1 }
0x2804   :  { %7456 = vmatprep.mubr.msk.f32.mxu0 %vm9422_vm0, %v9423_v1 }
0x2805   :  { %8094 = vmatpush3.bf16.msra.mxu0 %v10223_v29 }
0x2806   :  { %8100 = vmatpush3.bf16.msra.mxu1 %v10220_v27  ;;  %8101 = vmatprep.subr.bf16.mxu0 %v9421_v0 }
0x28d3   :  { %v3629_v20 = vpop.f32.mrb[36].mxu0 }
0x28d4   :  { %v3633_v17 = vadd.f32 %v3629_v20, %v10289_v4  ;;  %v3704_v25 = vpop.f32.mrb[36].mxu1  ;;  %v7436_v22 = vpop.f32.mrb[37].mxu0 }
0x28d5   :  { %v3708_v26 = vadd.f32 %v3704_v25, %v10267_v35  ;;  %v7447_v24 = vpop.f32.mrb[37].mxu1 }
0x28d6   :  { %8949 = vtanh.f32 %v3633_v17  ;;  %v6567_v29 = vmul.f32 -1.442695, %v3633_v17 }
0x28d7   :  { %8951 = vtanh.f32 %v3708_v26  ;;  %v6568_v27 = vmul.f32 -1.442695, %v3708_v26 }
0x28d8   :  { %8953 = vpow2.f32 %v6567_v29 }
0x28d9   :  { %8955 = vpow2.f32 %v6568_v27 }
0x28e0   :  { %v8950_v6 = vpop.eup %8949 }
0x28e1   :  { %v8952_v15 = vpop.eup %8951  ;;  %3725 = vrot.lane.b32.xlu0 %v8950_v6, %s9425_s29 }
0x28e2   :  { %3736 = vrot.lane.b32.xlu1 %v8952_v15, %s9425_s29  ;;  %v8954_v33 = vpop.eup %8953 }
0x28e3   :  { %v8956_v31 = vpop.eup %8955  ;;  %v3712_v4 = vadd.f32 1.0, %v8954_v33 }
0x28e4   :  { %v3718_v62 = vadd.f32 1.0, %v8956_v31 }
0x28e5   :  { %8957 = vrcp.f32 %v3712_v4 }
0x28e6   :  { %8959 = vrcp.f32 %v3718_v62 }
0x28ef   :  { %v8958_v35 = vpop.eup %8957 }
0x28f0   :  { %v8960_v34 = vpop.eup %8959  ;;  %v3723_v37 = vmul.f32 %v8958_v35, %v3527_v32 }
0x28f1   :  { %v3734_v40 = vmul.f32 %v8960_v34, %v3538_v13 }
0x2953   :  { %v3726_v45 = vpop.permute.xlu0 %3725 }
0x2954   :  { %v3737_v59 = vpop.permute.xlu1 %3736  ;;  %v3728_v36 = vmul.f32 %v8958_v35, %v3726_v45 }
0x2955   :  { %v3739_v63 = vmul.f32 %v8960_v34, %v3737_v59 }
0x2956   :  { %3730 = vrot.lane.b32.xlu0 %v3728_v36, %s9425_s29 }
0x2957   :  { %3741 = vrot.lane.b32.xlu1 %v3739_v63, %s9425_s29 }
0x29c8   :  { %v3731_v41 = vpop.permute.xlu0 %3730 }
0x29c9   :  { %v3742_v43 = vpop.permute.xlu1 %3741  ;;  %v3733_v55 = vadd.f32 %v3731_v41, %v3723_v37 }
0x29ca   :  { %v3744_v53 = vadd.f32 %v3742_v43, %v3734_v40 }
0x29cb   :  { %8961 = vtanh.f32 %v3733_v55 }
0x29cc   :  { %8963 = vtanh.f32 %v3744_v53 }
0x29d5   :  { %v8962_v52 = vpop.eup %8961 }
0x29d6   :  { %v8964_v50 = vpop.eup %8963  ;;  %3747 = vrot.lane.b32.xlu0 %v8962_v52, %s9425_s29 }
0x29d7   :  { %3753 = vrot.lane.b32.xlu1 %v8964_v50, %s9425_s29 }
0x2a48   :  { %v3748_v54 = vpop.permute.xlu0 %3747 }
0x2a49   :  { %v3754_v58 = vpop.permute.xlu1 %3753  ;;  %v3750_v49 = vmul.f32 %v8958_v35, %v3748_v54 }
0x2a4a   :  { %v3756_v47 = vmul.f32 %v8960_v34, %v3754_v58 }
0x2a4b   :  { %3758 = vrot.lane.b32.xlu0 %v3750_v49, %s9426_s16 }
0x2a4c   :  { %3840 = vrot.lane.b32.xlu1 %v3756_v47, %s9426_s16 }
0x2abd   :  { %v10472_v57 = vpop.permute.xlu0 %3758 }
0x2abe   :  { %v3841_v61 = vpop.permute.xlu1 %3840  ;;  %7457 = vmatmul.mubr.msk.f32.vlgmr.msra.gmra.mrb[38].mxu0 %vm403_vm1, %v10472_v57 }
0x2abf   :  { %7468 = vmatmul.mubr.msk.f32.vlgmr.msra.gmra.mrb[38].mxu1 %vm403_vm1, %v3841_v61  ;;  %7486 = vmatprep.mubr.msk.f32.mxu0 %vm9422_vm0, %v9423_v1 }
0x2b91   :  { %v3835_v51 = vpop.f32.mrb[38].mxu0 }
0x2b92   :  { %v3839_v39 = vadd.f32 %v3835_v51, %v10287_v3  ;;  %v3910_v56 = vpop.f32.mrb[38].mxu1  ;;  %v7458_v7 = vpop.f32.mrb[39].mxu0 }
0x2b93   :  { %v3914_v8 = vadd.f32 %v3910_v56, %v10269_v42  ;;  %v7469_v9 = vpop.f32.mrb[39].mxu1 }
0x2b94   :  { %8965 = vtanh.f32 %v3839_v39  ;;  %v6571_v12 = vmul.f32 -1.442695, %v3839_v39 }
0x2b95   :  { %8967 = vtanh.f32 %v3914_v8  ;;  %v6572_v5 = vmul.f32 -1.442695, %v3914_v8 }
0x2b96   :  { %8969 = vpow2.f32 %v6571_v12 }
0x2b97   :  { %8971 = vpow2.f32 %v6572_v5 }
0x2b9e   :  { %v8966_v11 = vpop.eup %8965 }
0x2b9f   :  { %v8968_v38 = vpop.eup %8967  ;;  %3931 = vrot.lane.b32.xlu0 %v8966_v11, %s9425_s29 }
0x2ba0   :  { %3942 = vrot.lane.b32.xlu1 %v8968_v38, %s9425_s29  ;;  %v8970_v32 = vpop.eup %8969 }
0x2ba1   :  { %v8972_v13 = vpop.eup %8971  ;;  %v3918_v3 = vadd.f32 1.0, %v8970_v32 }
0x2ba2   :  { %v3924_v16 = vadd.f32 1.0, %v8972_v13 }
0x2ba3   :  { %8973 = vrcp.f32 %v3918_v3 }
0x2ba4   :  { %8975 = vrcp.f32 %v3924_v16 }
0x2bad   :  { %v8974_v42 = vpop.eup %8973 }
0x2bae   :  { %v8976_v28 = vpop.eup %8975  ;;  %v3929_v20 = vmul.f32 %v8974_v42, %v3733_v55 }
0x2baf   :  { %v3940_v17 = vmul.f32 %v8976_v28, %v3744_v53 }
0x2c11   :  { %v3932_v46 = vpop.permute.xlu0 %3931 }
0x2c12   :  { %v3943_v10 = vpop.permute.xlu1 %3942  ;;  %v3934_v48 = vmul.f32 %v8974_v42, %v3932_v46 }
0x2c13   :  { %v3945_v19 = vmul.f32 %v8976_v28, %v3943_v10 }
0x2c14   :  { %3936 = vrot.lane.b32.xlu0 %v3934_v48, %s9425_s29 }
0x2c15   :  { %3947 = vrot.lane.b32.xlu1 %v3945_v19, %s9425_s29 }
0x2c86   :  { %v3937_v25 = vpop.permute.xlu0 %3936 }
0x2c87   :  { %v3948_v22 = vpop.permute.xlu1 %3947  ;;  %v3939_v26 = vadd.f32 %v3937_v25, %v3929_v20 }
0x2c88   :  { %v3950_v24 = vadd.f32 %v3948_v22, %v3940_v17 }
0x2c89   :  { %8977 = vtanh.f32 %v3939_v26 }
0x2c8a   :  { %8979 = vtanh.f32 %v3950_v24 }
0x2c93   :  { %v8978_v6 = vpop.eup %8977 }
0x2c94   :  { %v8980_v15 = vpop.eup %8979  ;;  %3953 = vrot.lane.b32.xlu0 %v8978_v6, %s9425_s29 }
0x2c95   :  { %3959 = vrot.lane.b32.xlu1 %v8980_v15, %s9425_s29 }
0x2c98   :  { %3763 = vrot.lane.b32.xlu0 %v3756_v47, %s9427_s6 }
0x2c9c   :  { %3351 = vrot.lane.b32.xlu0 %v10411_v14, %s9427_s6 }
0x2ca0   :  { %2939 = vrot.lane.b32.xlu0 %v10355_v21, %s9427_s6 }
0x2ca4   :  { %2527 = vrot.lane.b32.xlu0 %v10299_v44, %s9427_s6 }
0x2d06   :  { %v3954_v29 = vpop.permute.xlu0 %3953 }
0x2d07   :  { %v3960_v27 = vpop.permute.xlu1 %3959  ;;  %v3956_v14 = vmul.f32 %v8974_v42, %v3954_v29 }
0x2d08   :  { %v3962_v33 = vmul.f32 %v8976_v28, %v3960_v27 }
0x2d0a   :  { %3969 = vrot.lane.b32.xlu1 %v3962_v33, %s9427_s6  ;;  %v3764_v31 = vpop.permute.xlu0 %3763 }
0x2d0b   :  { %3766 = vst.msk [vmem:[#allocation3 + $0x8] sm:$0xff] %vm606_vm2, %v3764_v31 }
0x2d0e   :  { %3557 = vrot.lane.b32.xlu1 %v10441_v18, %s9427_s6  ;;  %v3352_v4 = vpop.permute.xlu0 %3351 }
0x2d0f   :  { %3354 = vst.msk [vmem:[#allocation3 + $0x18] sm:$0xff] %vm606_vm2, %v3352_v4 }
0x2d12   :  { %3145 = vrot.lane.b32.xlu1 %v10383_v60, %s9427_s6  ;;  %v2940_v21 = vpop.permute.xlu0 %2939  ;;  %v3974_v18 = vld [vmem:[#allocation3 + $0x8] sm:$0xff] }
0x2d13   :  { %2942 = vst.msk [vmem:[#allocation3 + $0x28] sm:$0xff] %vm606_vm2, %v2940_v21  ;;  %v3984_v62 = vsel %vm2073_vm3, %v3974_v18, 0.0 }
0x2d14   :  { %3555 = vst.msk [vmem:[#allocation3 + $0x28] sm:$0xff] %vm403_vm1, %v10446_v23 }
0x2d16   :  { %2733 = vrot.lane.b32.xlu1 %v10327_v30, %s9427_s6  ;;  %v2528_v44 = vpop.permute.xlu0 %2527  ;;  %v3976_v63 = vld [vmem:[#allocation3 + $0x18] sm:$0xff] }
0x2d17   :  { %2530 = vst.msk [vmem:[#allocation3 + $0x38] sm:$0xff] %vm606_vm2, %v2528_v44  ;;  %v3990_v40 = vsel %vm2073_vm3, %v3976_v63, 0.0 }
0x2d1a   :  { %3964 = vrot.lane.b32.xlu1 %v3956_v14, %s9426_s16  ;;  %v4204_v14 = vld [vmem:[#allocation26] sm:$0xff] }
0x2d1b   :  { %v3978_v43 = vld [vmem:[#allocation3 + $0x28] sm:$0xff] }
0x2d1c   :  { %v3996_v55 = vsel %vm2073_vm3, %v3978_v43, 0.0 }
0x2d3e   :  { %3985 = vadd.xlane.f32.xlu1 %v3984_v62 }
0x2d7c   :  { %v3970_v60 = vpop.permute.xlu1 %3969 }
0x2d7d   :  { %3972 = vst.msk [vmem:[#allocation3] sm:$0xff] %vm606_vm2, %v3970_v60  ;;  %v4206_v60 = vld [vmem:[#allocation26 + $0x10] sm:$0xff] }
0x2d80   :  { %v3558_v35 = vpop.permute.xlu1 %3557 }
0x2d81   :  { %3560 = vst.msk [vmem:[#allocation3 + $0x10] sm:$0xff] %vm606_vm2, %v3558_v35  ;;  %v4207_v35 = vld [vmem:[#allocation26 + $0x18] sm:$0xff] }
0x2d84   :  { %v3146_v23 = vpop.permute.xlu1 %3145  ;;  %v3973_v45 = vld [vmem:[#allocation3] sm:$0xff] }
0x2d85   :  { %3148 = vst.msk [vmem:[#allocation3 + $0x20] sm:$0xff] %vm606_vm2, %v3146_v23  ;;  %v3981_v30 = vsel %vm2073_vm3, %v3973_v45, 0.0  ;;  %v8117_v23 = vpack.c.bf16 %v4207_v35, %v4206_v60 }
0x2d86   :  { %3349 = vst.msk [vmem:[#allocation3 + $0x20] sm:$0xff] %vm403_vm1, %v10416_v2  ;;  %3982 = vadd.xlane.f32.xlu0 %v3981_v30  ;;  %v4209_v30 = vld [vmem:[#allocation26 + $0x28] sm:$0xff] }
0x2d88   :  { %v2734_v34 = vpop.permute.xlu1 %2733  ;;  %v3975_v59 = vld [vmem:[#allocation3 + $0x10] sm:$0xff] }
0x2d89   :  { %2736 = vst.msk [vmem:[#allocation3 + $0x30] sm:$0xff] %vm606_vm2, %v2734_v34  ;;  %v3987_v36 = vsel %vm2073_vm3, %v3975_v59, 0.0 }
0x2d8a   :  { %3761 = vst.msk [vmem:[#allocation3 + $0x30] sm:$0xff] %vm403_vm1, %v10472_v57  ;;  %3988 = vadd.xlane.f32.xlu0 %v3987_v36  ;;  %v4211_v36 = vld [vmem:[#allocation26 + $0x38] sm:$0xff] }
0x2d8c   :  { %v3965_v37 = vpop.permute.xlu1 %3964 }
0x2d8d   :  { %3967 = vst.msk [vmem:[#allocation3 + $0x38] sm:$0xff] %vm403_vm1, %v3965_v37  ;;  %v3977_v41 = vld [vmem:[#allocation3 + $0x20] sm:$0xff]  ;;  %v4116_v37 = vld [vmem:[#allocation23] sm:$0xff] }
0x2d8e   :  { %3991 = vadd.xlane.f32.xlu0 %v3990_v40  ;;  %v3993_v2 = vsel %vm2073_vm3, %v3977_v41, 0.0  ;;  %v4117_v40 = vld [vmem:[#allocation23 + $0x8] sm:$0xff] }
0x2d8f   :  { %3994 = vadd.xlane.f32.xlu1 %v3993_v2  ;;  %v4118_v2 = vld [vmem:[#allocation23 + $0x10] sm:$0xff] }
0x2d91   :  { %v3979_v53 = vld [vmem:[#allocation3 + $0x30] sm:$0xff] }
0x2d92   :  { %3997 = vadd.xlane.f32.xlu0 %v3996_v55  ;;  %v3999_v52 = vsel %vm2073_vm3, %v3979_v53, 0.0 }
0x2d93   :  { %4000 = vadd.xlane.f32.xlu1 %v3999_v52  ;;  %v4121_v52 = vld [vmem:[#allocation23 + $0x28] sm:$0xff] }
0x2d94   :  { %v3980_v50 = vld [vmem:[#allocation3 + $0x38] sm:$0xff] }
0x2d95   :  { %v4002_v54 = vsel %vm2073_vm3, %v3980_v50, 0.0 }
0x2d96   :  { %4003 = vadd.xlane.f32.xlu0 %v4002_v54  ;;  %v4122_v54 = vld [vmem:[#allocation23 + $0x30] sm:$0xff] }
0x2dcb   :  { %v3986_v58 = vpop.xlane.xlu1 %3985 }
0x2dcc   :  { %v4007_v49 = vmul.f32 0.015625, %v3986_v58  ;;  %v4123_v58 = vld [vmem:[#allocation23 + $0x38] sm:$0xff] }
0x2dce   :  { %v10525_v47 = vsub.f32 %v3974_v18, %v4007_v49  ;;  %v4205_v18 = vld [vmem:[#allocation26 + $0x8] sm:$0xff]  ;;  %v8111_v49 = vpack.c.bf16 %v4123_v58, %v4122_v54 }
0x2dcf   :  { %v8113_v62 = vpack.c.bf16 %v4205_v18, %v4204_v14 }
0x2dd0   :  { %v4023_v57 = vmul.f32 %v10525_v47, %v10525_v47 }
0x2dd1   :  { %8114 = vmatprep.subr.bf16.mxu1 %v8113_v62 }
0x2dd2   :  { %v4033_v61 = vsel %vm2073_vm3, %v4023_v57, 0.0  ;;  %8116 = vmatpush3.bf16.msra.mxu1 %v8113_v62 }
0x2dd3   :  { %4034 = vadd.xlane.f32.xlu0 %v4033_v61  ;;  %8118 = vmatprep.subr.bf16.mxu1 %v8117_v23 }
0x2dd6   :  { %8120 = vmatpush3.bf16.msra.mxu1 %v8117_v23 }
0x2e13   :  { %v3983_v51 = vpop.xlane.xlu0 %3982 }
0x2e14   :  { %v4006_v39 = vmul.f32 0.015625, %v3983_v51 }
0x2e16   :  { %v10530_v56 = vsub.f32 %v3973_v45, %v4006_v39  ;;  %v4208_v45 = vld [vmem:[#allocation26 + $0x20] sm:$0xff] }
0x2e17   :  { %v3989_v7 = vpop.xlane.xlu0 %3988  ;;  %v8121_v34 = vpack.c.bf16 %v4209_v30, %v4208_v45 }
0x2e18   :  { %v4008_v8 = vmul.f32 0.015625, %v3989_v7  ;;  %v4022_v9 = vmul.f32 %v10530_v56, %v10530_v56 }
0x2e19   :  { %8122 = vmatprep.subr.bf16.mxu1 %v8121_v34 }
0x2e1a   :  { %v10534_v11 = vsub.f32 %v3975_v59, %v4008_v8  ;;  %v4030_v38 = vsel %vm2073_vm3, %v4022_v9, 0.0  ;;  %8124 = vmatpush3.bf16.msra.mxu1 %v8121_v34  ;;  %v4210_v59 = vld [vmem:[#allocation26 + $0x30] sm:$0xff] }
0x2e1b   :  { %v3992_v12 = vpop.xlane.xlu0 %3991  ;;  %4031 = vadd.xlane.f32.xlu1 %v4030_v38 }
0x2e1c   :  { %v4009_v5 = vmul.f32 0.015625, %v3992_v12  ;;  %v3995_v32 = vpop.xlane.xlu1 %3994  ;;  %v4024_v13 = vmul.f32 %v10534_v11, %v10534_v11 }
0x2e1d   :  { %v4010_v3 = vmul.f32 0.015625, %v3995_v32 }
0x2e1e   :  { %v10539_v16 = vsub.f32 %v3976_v63, %v4009_v5  ;;  %v4036_v42 = vsel %vm2073_vm3, %v4024_v13, 0.0  ;;  %v8125_v63 = vpack.c.bf16 %v4211_v36, %v4210_v59 }
0x2e1f   :  { %v10542_v46 = vsub.f32 %v3977_v41, %v4010_v3  ;;  %v3998_v28 = vpop.xlane.xlu0 %3997  ;;  %4037 = vadd.xlane.f32.xlu1 %v4036_v42  ;;  %v8102_v41 = vpack.c.bf16 %v4117_v40, %v4116_v37 }
0x2e20   :  { %v4011_v10 = vmul.f32 0.015625, %v3998_v28  ;;  %v4001_v48 = vpop.xlane.xlu1 %4000  ;;  %v4025_v19 = vmul.f32 %v10539_v16, %v10539_v16  ;;  %8126 = vmatprep.subr.bf16.mxu1 %v8125_v63 }
0x2e21   :  { %v4012_v20 = vmul.f32 0.015625, %v4001_v48  ;;  %v4026_v17 = vmul.f32 %v10542_v46, %v10542_v46  ;;  %8128 = vmatpush3.bf16.msra.mxu1 %v8125_v63  ;;  %8103 = vmatpush3.bf16.msra.mxu0 %v8102_v41 }
0x2e22   :  { %v10548_v25 = vsub.f32 %v3978_v43, %v4011_v10  ;;  %v4039_v22 = vsel %vm2073_vm3, %v4025_v19, 0.0  ;;  %8145 = vmatprep.subr.bf16.mxu1 %v9421_v0  ;;  %8104 = vmatprep.subr.bf16.mxu0 %v9421_v0  ;;  %v4119_v43 = vld [vmem:[#allocation23 + $0x18] sm:$0xff] }
0x2e23   :  { %v10551_v26 = vsub.f32 %v3979_v53, %v4012_v20  ;;  %4040 = vadd.xlane.f32.xlu0 %v4039_v22  ;;  %v4004_v24 = vpop.xlane.xlu0 %4003  ;;  %v4042_v6 = vsel %vm2073_vm3, %v4026_v17, 0.0  ;;  %v8105_v55 = vpack.c.bf16 %v4119_v43, %v4118_v2  ;;  %v4120_v53 = vld [vmem:[#allocation23 + $0x20] sm:$0xff] }
0x2e24   :  { %v4013_v15 = vmul.f32 0.015625, %v4004_v24  ;;  %4043 = vadd.xlane.f32.xlu1 %v4042_v6  ;;  %v4027_v29 = vmul.f32 %v10548_v25, %v10548_v25  ;;  %v6573_v24 = vld [vmem:[%s11265_s13] ss:$0 sm:$0xff]  ;;  %s9428_s13 = smov 120  }
0x2e25   :  { %v4028_v27 = vmul.f32 %v10551_v26, %v10551_v26  ;;  %8106 = vmatpush3.bf16.msra.mxu0 %v8105_v55 }
0x2e26   :  { %v10558_v33 = vsub.f32 %v3980_v50, %v4013_v15  ;;  %v4045_v31 = vsel %vm2073_vm3, %v4027_v29, 0.0  ;;  %8107 = vmatprep.subr.bf16.mxu0 %v9421_v0  ;;  %v8108_v50 = vpack.c.bf16 %v4121_v52, %v4120_v53 }
0x2e27   :  { %4046 = vadd.xlane.f32.xlu0 %v4045_v31  ;;  %v4048_v4 = vsel %vm2073_vm3, %v4028_v27, 0.0 }
0x2e28   :  { %4049 = vadd.xlane.f32.xlu1 %v4048_v4  ;;  %v4029_v21 = vmul.f32 %v10558_v33, %v10558_v33 }
0x2e29   :  { %8109 = vmatpush3.bf16.msra.mxu0 %v8108_v50 }
0x2e2a   :  { %v4051_v44 = vsel %vm2073_vm3, %v4029_v21, 0.0  ;;  %8110 = vmatprep.subr.bf16.mxu0 %v9421_v0 }
0x2e2b   :  { %4052 = vadd.xlane.f32.xlu0 %v4051_v44  ;;  %v6574_v44 = vld [vmem:[%s11266_s14] ss:$0 sm:$0xff]  ;;  %s9429_s14 = smov 112  }
0x2e2d   :  { %8112 = vmatpush3.bf16.msra.mxu0 %v8111_v49 }
0x2e2e   :  { %8129 = vmatprep.subr.bf16.mxu0 %v9421_v0 }
0x2e60   :  { %v4035_v57 = vpop.xlane.xlu0 %4034 }
0x2e61   :  { %v4055_v61 = vmul.f32 0.015625, %v4035_v57 }
0x2e63   :  { %v4063_v51 = vadd.f32 1e-05, %v4055_v61 }
0x2e65   :  { %8981 = vrsqrt.f32 %v4063_v51 }
0x2e6f   :  { %v8982_v3 = vpop.eup %8981 }
0x2e70   :  { %v4079_v19 = vmul.f32 %v8982_v3, %v10525_v47 }
0x2e72   :  { %v4094_v21 = vmul.f32 %v6573_v24, %v4079_v19 }
0x2e74   :  { %v4109_v35 = vadd.f32 %v6574_v44, %v4094_v21 }
0x2ea8   :  { %v4032_v39 = vpop.xlane.xlu1 %4031 }
0x2ea9   :  { %v4054_v7 = vmul.f32 0.015625, %v4032_v39 }
0x2eab   :  { %v4062_v8 = vadd.f32 1e-05, %v4054_v7 }
0x2eac   :  { %v4038_v9 = vpop.xlane.xlu1 %4037 }
0x2ead   :  { %8983 = vrsqrt.f32 %v4062_v8  ;;  %v4056_v38 = vmul.f32 0.015625, %v4038_v9 }
0x2eaf   :  { %v4064_v12 = vadd.f32 1e-05, %v4056_v38 }
0x2eb0   :  { %v4041_v5 = vpop.xlane.xlu0 %4040 }
0x2eb1   :  { %8985 = vrsqrt.f32 %v4064_v12  ;;  %v4057_v32 = vmul.f32 0.015625, %v4041_v5  ;;  %v4044_v13 = vpop.xlane.xlu1 %4043 }
0x2eb2   :  { %v4058_v42 = vmul.f32 0.015625, %v4044_v13 }
0x2eb3   :  { %v4065_v28 = vadd.f32 1e-05, %v4057_v32 }
0x2eb4   :  { %v4066_v10 = vadd.f32 1e-05, %v4058_v42  ;;  %v4047_v48 = vpop.xlane.xlu0 %4046 }
0x2eb5   :  { %8987 = vrsqrt.f32 %v4065_v28  ;;  %v4059_v20 = vmul.f32 0.015625, %v4047_v48  ;;  %v4050_v17 = vpop.xlane.xlu1 %4049  ;;  %v6575_v28 = vld [vmem:[#allocation24] ss:$0 sm:$0xff] }
0x2eb6   :  { %8989 = vrsqrt.f32 %v4066_v10  ;;  %v4060_v22 = vmul.f32 0.015625, %v4050_v17 }
0x2eb7   :  { %v8984_v6 = vpop.eup %8983  ;;  %v4067_v15 = vadd.f32 1e-05, %v4059_v20 }
0x2eb8   :  { %v4068_v29 = vadd.f32 1e-05, %v4060_v22  ;;  %v4053_v27 = vpop.xlane.xlu0 %4052  ;;  %v4078_v31 = vmul.f32 %v8984_v6, %v10530_v56 }
0x2eb9   :  { %8991 = vrsqrt.f32 %v4067_v15  ;;  %v4061_v4 = vmul.f32 0.015625, %v4053_v27 }
0x2eba   :  { %8993 = vrsqrt.f32 %v4068_v29  ;;  %v4093_v47 = vmul.f32 %v6573_v24, %v4078_v31 }
0x2ebb   :  { %v8986_v14 = vpop.eup %8985  ;;  %v4069_v18 = vadd.f32 1e-05, %v4061_v4 }
0x2ebc   :  { %v4108_v62 = vadd.f32 %v6574_v44, %v4093_v47  ;;  %v4080_v60 = vmul.f32 %v8986_v14, %v10534_v11 }
0x2ebd   :  { %8995 = vrsqrt.f32 %v4069_v18 }
0x2ebe   :  { %7505 = vmatprep.mubr.msk.f32.mxu1 %vm2073_vm3, %v4108_v62  ;;  %v4095_v23 = vmul.f32 %v6573_v24, %v4080_v60 }
0x2ebf   :  { %v8988_v56 = vpop.eup %8987  ;;  %7506 = vmatmul.mubr.msk.f32.vlgmr.msra.gmra.mrb[40].mxu1 %vm2073_vm3, %v4109_v35 }
0x2ec0   :  { %v8990_v45 = vpop.eup %8989  ;;  %v4110_v30 = vadd.f32 %v6574_v44, %v4095_v23  ;;  %v4081_v34 = vmul.f32 %v8988_v56, %v10539_v16 }
0x2ec1   :  { %v4082_v59 = vmul.f32 %v8990_v45, %v10542_v46 }
0x2ec2   :  { %7508 = vmatprep.mubr.msk.f32.mxu1 %vm2073_vm3, %v4110_v30  ;;  %v4096_v36 = vmul.f32 %v6573_v24, %v4081_v34 }
0x2ec3   :  { %v8992_v63 = vpop.eup %8991  ;;  %v4097_v37 = vmul.f32 %v6573_v24, %v4082_v59 }
0x2ec4   :  { %v8994_v11 = vpop.eup %8993  ;;  %v4111_v40 = vadd.f32 %v6574_v44, %v4096_v36  ;;  %v4083_v41 = vmul.f32 %v8992_v63, %v10548_v25 }
0x2ec5   :  { %v4112_v2 = vadd.f32 %v6574_v44, %v4097_v37  ;;  %v4084_v43 = vmul.f32 %v8994_v11, %v10551_v26  ;;  %v6577_v26 = vld [vmem:[#allocation27] ss:$0 sm:$0xff] }
0x2ec6   :  { %7509 = vmatmul.mubr.msk.f32.gmra.mrb[42].mxu1 %vm2073_vm3, %v4111_v40  ;;  %v4098_v55 = vmul.f32 %v6573_v24, %v4083_v41 }
0x2ec7   :  { %v8996_v53 = vpop.eup %8995  ;;  %7511 = vmatprep.mubr.msk.f32.mxu1 %vm2073_vm3, %v4112_v2  ;;  %v4099_v16 = vmul.f32 %v6573_v24, %v4084_v43 }
0x2ec8   :  { %v4085_v46 = vmul.f32 %v8996_v53, %v10558_v33  ;;  %v4113_v52 = vadd.f32 %v6574_v44, %v4098_v55 }
0x2ec9   :  { %v4114_v50 = vadd.f32 %v6574_v44, %v4099_v16 }
0x2eca   :  { %7512 = vmatmul.mubr.msk.f32.gmra.mrb[44].mxu1 %vm2073_vm3, %v4113_v52  ;;  %v4100_v54 = vmul.f32 %v6573_v24, %v4085_v46 }
0x2ecb   :  { %7514 = vmatprep.mubr.msk.f32.mxu1 %vm2073_vm3, %v4114_v50 }
0x2ecc   :  { %v10591_v25 = vadd.f32 %v6574_v44, %v4100_v54 }
0x2ece   :  { %7487 = vmatmul.mubr.msk.f32.vlgmr.msra.gmra.mrb[40].mxu0 %vm2073_vm3, %v10591_v25  ;;  %7515 = vmatmul.mubr.msk.f32.gmra.mrb[46].mxu1 %vm2073_vm3, %v10591_v25 }
0x2ecf   :  { %7533 = vmatprep.mubr.msk.f32.mxu0 %vm9422_vm0, %v9423_v1  ;;  %7552 = vmatprep.mubr.msk.f32.mxu1 %vm9422_vm0, %v9423_v1 }
0x2f92   :  { %v7507_v33 = vpop.f32.mrb[40].mxu1 }
0x2f93   :  { %v4312_v58 = vadd.f32 %v7507_v33, %v6577_v26  ;;  %v4306_v49 = vpop.f32.mrb[41].mxu1 }
0x2f94   :  { %v4307_v57 = vadd.f32 %v6577_v26, %v4306_v49 }
0x2f96   :  { %v10607_v51 = vpack.i.bf16 %v4312_v58, %v4307_v57  ;;  %v8130_v39 = vpack.c.bf16 %v4312_v58, %v4307_v57 }
0x2f98   :  { %8426 = vrot.lane.b32.xlu1 %v10607_v51, %s9428_s13  ;;  %8132 = vmatpush3.bf16.xpose.msk.msra.mxu0 %vm10603_vm5, %v8130_v39 }
0x2f99   :  { %v7510_v7 = vpop.f32.mrb[42].mxu1  ;;  %8133 = vmatprep.subr.bf16.mxu0 %v9421_v0 }
0x2f9a   :  { %v4322_v8 = vadd.f32 %v7510_v7, %v6577_v26  ;;  %v4316_v9 = vpop.f32.mrb[43].mxu1 }
0x2f9b   :  { %v4317_v38 = vadd.f32 %v6577_v26, %v4316_v9 }
0x2f9d   :  { %v7513_v12 = vpop.f32.mrb[44].mxu1  ;;  %v10614_v5 = vpack.i.bf16 %v4322_v8, %v4317_v38  ;;  %v8134_v32 = vpack.c.bf16 %v4322_v8, %v4317_v38 }
0x2f9e   :  { %v4332_v13 = vadd.f32 %v7513_v12, %v6577_v26  ;;  %v4326_v3 = vpop.f32.mrb[45].mxu1 }
0x2f9f   :  { %v4327_v42 = vadd.f32 %v6577_v26, %v4326_v3  ;;  %8431 = vrot.lane.b32.xlu0 %v10614_v5, %s9428_s13 }
0x2fa0   :  { %8136 = vmatpush3.bf16.xpose.msk.msra.mxu0 %vm10603_vm5, %v8134_v32 }
0x2fa1   :  { %v4200_v10 = vpop.f32.mrb[40].mxu0  ;;  %v7516_v48 = vpop.f32.mrb[46].mxu1  ;;  %v8435_v19 = vpack.i.bf16 %v4332_v13, %v4327_v42  ;;  %8137 = vmatprep.subr.bf16.mxu0 %v9421_v0  ;;  %v8138_v20 = vpack.c.bf16 %v4332_v13, %v4327_v42 }
0x2fa2   :  { %v4342_v17 = vadd.f32 %v7516_v48, %v6577_v26  ;;  %v7488_v22 = vpop.f32.mrb[41].mxu0  ;;  %v4336_v24 = vpop.f32.mrb[47].mxu1  ;;  %v4201_v15 = vadd.f32 %v6575_v28, %v4200_v10 }
0x2fa3   :  { %v4337_v6 = vadd.f32 %v6577_v26, %v4336_v24  ;;  %8446 = vrot.lane.b32.xlu0 %v10607_v51, %s9429_s14  ;;  %8436 = vrot.lane.b32.xlu1 %v8435_v19, %s9428_s13 }
0x2fa5   :  { %v8440_v29 = vpack.i.bf16 %v4342_v17, %v4337_v6  ;;  %v8142_v27 = vpack.c.bf16 %v4342_v17, %v4337_v6 }
0x2fa7   :  { %4346 = vrot.lane.b32.xlu0 %v4201_v15, %s9428_s13  ;;  %8441 = vrot.lane.b32.xlu1 %v8440_v29, %s9428_s13  ;;  %s9438_s13 = smov 48  }
0x2fa8   :  { %8140 = vmatpush3.bf16.xpose.msk.msra.mxu0 %vm10603_vm5, %v8138_v20 }
0x2fa9   :  { %8141 = vmatprep.subr.bf16.mxu0 %v9421_v0 }
0x2fab   :  { %8461 = vrot.lane.b32.xlu0 %v10614_v5, %s9430_s9  ;;  %8451 = vrot.lane.b32.xlu1 %v10607_v51, %s9430_s9 }
0x2faf   :  { %8471 = vrot.lane.b32.xlu0 %v8435_v19, %s9430_s9  ;;  %8456 = vrot.lane.b32.xlu1 %v10614_v5, %s9429_s14 }
0x2fb0   :  { %8144 = vmatpush3.bf16.xpose.msk.msra.mxu0 %vm10603_vm5, %v8142_v27 }
0x2fb1   :  { %8161 = vmatprep.subr.bf16.mxu0 %v9421_v0 }
0x2fb3   :  { %8481 = vrot.lane.b32.xlu0 %v8440_v29, %s9430_s9  ;;  %8466 = vrot.lane.b32.xlu1 %v8435_v19, %s9429_s14 }
0x2fb7   :  { %8491 = vrot.lane.b32.xlu0 %v10607_v51, %s9431_s8  ;;  %8476 = vrot.lane.b32.xlu1 %v8440_v29, %s9429_s14 }
0x2fb8   :  { %7534 = vmatmul.mubr.msk.f32.vlgmr.msra.gmra.mrb[42].mxu0 %vm4498_vm4, %v4201_v15 }
0x2fb9   :  { %7571 = vmatprep.mubr.msk.f32.mxu0 %vm9422_vm0, %v9423_v1 }
0x2fbb   :  { %4350 = vrot.lane.b32.xlu0 %v4201_v15, %s9430_s9  ;;  %8486 = vrot.lane.b32.xlu1 %v10607_v51, %s9427_s6 }
0x2fbf   :  { %8501 = vrot.lane.b32.xlu0 %v10614_v5, %s9431_s8  ;;  %4348 = vrot.lane.b32.xlu1 %v4201_v15, %s9429_s14 }
0x2fc3   :  { %8511 = vrot.lane.b32.xlu0 %v8435_v19, %s9431_s8  ;;  %8496 = vrot.lane.b32.xlu1 %v10614_v5, %s9427_s6 }
0x2fc7   :  { %8521 = vrot.lane.b32.xlu0 %v8440_v29, %s9431_s8  ;;  %8506 = vrot.lane.b32.xlu1 %v8435_v19, %s9427_s6 }
0x2fcb   :  { %8531 = vrot.lane.b32.xlu0 %v10607_v51, %s9432_s2  ;;  %8516 = vrot.lane.b32.xlu1 %v8440_v29, %s9427_s6 }
0x2fcf   :  { %4354 = vrot.lane.b32.xlu0 %v4201_v15, %s9431_s8  ;;  %8526 = vrot.lane.b32.xlu1 %v10607_v51, %s9433_s3 }
0x2fd3   :  { %8541 = vrot.lane.b32.xlu0 %v10614_v5, %s9432_s2  ;;  %4352 = vrot.lane.b32.xlu1 %v4201_v15, %s9427_s6 }
0x2fd7   :  { %8551 = vrot.lane.b32.xlu0 %v8435_v19, %s9432_s2  ;;  %8536 = vrot.lane.b32.xlu1 %v10614_v5, %s9433_s3 }
0x2fdb   :  { %8561 = vrot.lane.b32.xlu0 %v8440_v29, %s9432_s2  ;;  %8546 = vrot.lane.b32.xlu1 %v8435_v19, %s9433_s3 }
0x2fdf   :  { %4358 = vrot.lane.b32.xlu0 %v4201_v15, %s9432_s2  ;;  %8556 = vrot.lane.b32.xlu1 %v8440_v29, %s9433_s3 }
0x2fe3   :  { %8566 = vrot.lane.b32.xlu0 %v10607_v51, %s9426_s16  ;;  %4356 = vrot.lane.b32.xlu1 %v4201_v15, %s9433_s3 }
0x2fe7   :  { %8576 = vrot.lane.b32.xlu0 %v8435_v19, %s9426_s16  ;;  %8571 = vrot.lane.b32.xlu1 %v10614_v5, %s9426_s16 }
0x2feb   :  { %8581 = vrot.lane.b32.xlu1 %v8440_v29, %s9426_s16 }
0x300a   :  { %v8427_v31 = vpop.permute.xlu1 %8426 }
0x300b   :  { %v8429_v4 = vunpack.i.h.bf16 %v8427_v31  ;;  %v8428_v21 = vunpack.i.l.bf16 %v8427_v31  ;;  %8586 = vrot.lane.b32.xlu1 %v8427_v31, %s9426_s16 }
0x300d   :  { %v8146_v47 = vpack.c.bf16 %v8429_v4, %v8428_v21 }
0x300f   :  { %8148 = vmatpush3.bf16.xpose.msk.msra.mxu1 %vm10603_vm5, %v8146_v47 }
0x3010   :  { %8149 = vmatprep.subr.bf16.mxu1 %v9421_v0 }
0x3011   :  { %v10660_v44 = vpop.permute.xlu0 %8431 }
0x3012   :  { %v8434_v14 = vunpack.i.h.bf16 %v10660_v44  ;;  %v8433_v18 = vunpack.i.l.bf16 %v10660_v44 }
0x3014   :  { %v8150_v62 = vpack.c.bf16 %v8434_v14, %v8433_v18 }
0x3015   :  { %v8447_v60 = vpop.permute.xlu0 %8446  ;;  %v10664_v35 = vpop.permute.xlu1 %8436 }
0x3016   :  { %v8449_v23 = vunpack.i.h.bf16 %v8447_v60  ;;  %v8448_v56 = vunpack.i.l.bf16 %v8447_v60  ;;  %v8439_v30 = vunpack.i.h.bf16 %v10664_v35  ;;  %v8438_v34 = vunpack.i.l.bf16 %v10664_v35  ;;  %8591 = vrot.lane.b32.xlu1 %v8447_v60, %s9426_s16 }
0x3017   :  { %8152 = vmatpush3.bf16.xpose.msk.msra.mxu1 %vm10603_vm5, %v8150_v62 }
0x3018   :  { %v8162_v45 = vpack.c.bf16 %v8449_v23, %v8448_v56  ;;  %8153 = vmatprep.subr.bf16.mxu1 %v9421_v0  ;;  %v8154_v63 = vpack.c.bf16 %v8439_v30, %v8438_v34 }
0x3019   :  { %v4347_v59 = vpop.permute.xlu0 %4346  ;;  %v10671_v36 = vpop.permute.xlu1 %8441 }
0x301a   :  { %8164 = vmatpush3.bf16.xpose.msk.msra.mxu0 %vm10603_vm5, %v8162_v45  ;;  %v8444_v2 = vunpack.i.h.bf16 %v10671_v36  ;;  %v8443_v43 = vunpack.i.l.bf16 %v10671_v36 }
0x301b   :  { %8165 = vmatprep.subr.bf16.mxu0 %v9421_v0 }
0x301c   :  { %v8158_v50 = vpack.c.bf16 %v8444_v2, %v8443_v43 }
0x301d   :  { %v10677_v37 = vpop.permute.xlu0 %8461  ;;  %v8452_v11 = vpop.permute.xlu1 %8451 }
0x301e   :  { %v8454_v40 = vunpack.i.h.bf16 %v8452_v11  ;;  %v8453_v41 = vunpack.i.l.bf16 %v8452_v11  ;;  %8596 = vrot.lane.b32.xlu0 %v8452_v11, %s9426_s16  ;;  %v8464_v28 = vunpack.i.h.bf16 %v10677_v37  ;;  %v8463_v10 = vunpack.i.l.bf16 %v10677_v37 }
0x301f   :  { %8156 = vmatpush3.bf16.xpose.msk.msra.mxu1 %vm10603_vm5, %v8154_v63 }
0x3020   :  { %8157 = vmatprep.subr.bf16.mxu1 %v9421_v0  ;;  %v8178_v38 = vpack.c.bf16 %v8454_v40, %v8453_v41  ;;  %v8182_v17 = vpack.c.bf16 %v8464_v28, %v8463_v10 }
0x3021   :  { %v10684_v55 = vpop.permute.xlu0 %8471  ;;  %v10686_v53 = vpop.permute.xlu1 %8456 }
0x3022   :  { %v8459_v16 = vunpack.i.h.bf16 %v10686_v53  ;;  %v8458_v46 = vunpack.i.l.bf16 %v10686_v53  ;;  %v8474_v6 = vunpack.i.h.bf16 %v10684_v55  ;;  %v8473_v15 = vunpack.i.l.bf16 %v10684_v55 }
0x3024   :  { %v8166_v52 = vpack.c.bf16 %v8459_v16, %v8458_v46  ;;  %v8186_v4 = vpack.c.bf16 %v8474_v6, %v8473_v15 }
0x3025   :  { %v10691_v54 = vpop.permute.xlu0 %8481  ;;  %v10693_v26 = vpop.permute.xlu1 %8466 }
0x3026   :  { %8168 = vmatpush3.bf16.xpose.msk.msra.mxu0 %vm10603_vm5, %v8166_v52  ;;  %v8469_v33 = vunpack.i.h.bf16 %v10693_v26  ;;  %v8468_v58 = vunpack.i.l.bf16 %v10693_v26  ;;  %v8484_v23 = vunpack.i.h.bf16 %v10691_v54  ;;  %v8483_v56 = vunpack.i.l.bf16 %v10691_v54 }
0x3027   :  { %8160 = vmatpush3.bf16.xpose.msk.msra.mxu1 %vm10603_vm5, %v8158_v50  ;;  %8169 = vmatprep.subr.bf16.mxu0 %v9421_v0 }
0x3028   :  { %8177 = vmatprep.subr.bf16.mxu1 %v9421_v0  ;;  %v8170_v7 = vpack.c.bf16 %v8469_v33, %v8468_v58  ;;  %v8190_v11 = vpack.c.bf16 %v8484_v23, %v8483_v56 }
0x3029   :  { %v10703_v49 = vpop.permute.xlu0 %8491  ;;  %v10705_v57 = vpop.permute.xlu1 %8476 }
0x302a   :  { %v8494_v51 = vunpack.i.h.bf16 %v10703_v49  ;;  %v8493_v39 = vunpack.i.l.bf16 %v10703_v49  ;;  %8606 = vrot.lane.b32.xlu0 %v10703_v49, %s9426_s16  ;;  %v8479_v32 = vunpack.i.h.bf16 %v10705_v57  ;;  %v8478_v13 = vunpack.i.l.bf16 %v10705_v57 }
0x302c   :  { %v8174_v48 = vpack.c.bf16 %v8479_v32, %v8478_v13 }
0x302d   :  { %v10709_v8 = vpop.permute.xlu0 %4350  ;;  %v8487_v9 = vpop.permute.xlu1 %8486 }
0x302e   :  { %v8489_v12 = vunpack.i.h.bf16 %v8487_v9  ;;  %v8488_v5 = vunpack.i.l.bf16 %v8487_v9  ;;  %8172 = vmatpush3.bf16.xpose.msk.msra.mxu0 %vm10603_vm5, %v8170_v7  ;;  %7553 = vmatmul.mubr.msk.f32.vlgmr.msra.gmra.mrb[48].mxu1 %vm4498_vm4, %v4347_v59 }
0x302f   :  { %8173 = vmatprep.subr.bf16.mxu0 %v9421_v0  ;;  %8180 = vmatpush3.bf16.xpose.msk.msra.mxu1 %vm10603_vm5, %v8178_v38  ;;  %v8210_v38 = vpack.c.bf16 %v8494_v51, %v8493_v39 }
0x3030   :  { %7590 = vmatprep.mubr.msk.f32.mxu1 %vm9422_vm0, %v9423_v1  ;;  %8181 = vmatprep.subr.bf16.mxu1 %v9421_v0  ;;  %v8194_v29 = vpack.c.bf16 %v8489_v12, %v8488_v5 }
0x3031   :  { %v10723_v3 = vpop.permute.xlu0 %8501  ;;  %v4349_v42 = vpop.permute.xlu1 %4348  ;;  %8601 = vrot.lane.b32.xlu1 %v8487_v9, %s9426_s16 }
0x3032   :  { %v8504_v2 = vunpack.i.h.bf16 %v10723_v3  ;;  %v8503_v43 = vunpack.i.l.bf16 %v10723_v3 }
0x3035   :  { %v10729_v19 = vpop.permute.xlu0 %8511  ;;  %v10731_v20 = vpop.permute.xlu1 %8496 }
0x3036   :  { %8176 = vmatpush3.bf16.xpose.msk.msra.mxu0 %vm10603_vm5, %v8174_v48  ;;  %v8499_v14 = vunpack.i.h.bf16 %v10731_v20  ;;  %v8498_v18 = vunpack.i.l.bf16 %v10731_v20  ;;  %v8514_v28 = vunpack.i.h.bf16 %v10729_v19  ;;  %v8513_v10 = vunpack.i.l.bf16 %v10729_v19 }
0x3037   :  { %8193 = vmatprep.subr.bf16.mxu0 %v9421_v0  ;;  %8184 = vmatpush3.bf16.xpose.msk.msra.mxu1 %vm10603_vm5, %v8182_v17  ;;  %v8214_v48 = vpack.c.bf16 %v8504_v2, %v8503_v43 }
0x3038   :  { %8185 = vmatprep.subr.bf16.mxu1 %v9421_v0  ;;  %v8198_v34 = vpack.c.bf16 %v8499_v14, %v8498_v18  ;;  %v4480_v14 = vlaneseq }
0x3039   :  { %v10738_v22 = vpop.permute.xlu0 %8521  ;;  %v10740_v24 = vpop.permute.xlu1 %8506 }
0x303a   :  { %v8509_v16 = vunpack.i.h.bf16 %v10740_v24  ;;  %v8508_v46 = vunpack.i.l.bf16 %v10740_v24 }
0x303c   :  { %v8202_v9 = vpack.c.bf16 %v8509_v16, %v8508_v46 }
0x303d   :  { %v10745_v27 = vpop.permute.xlu0 %8531  ;;  %v10747_v31 = vpop.permute.xlu1 %8516  ;;  %7572 = vmatmul.mubr.msk.f32.vlgmr.msra.gmra.mrb[44].mxu0 %vm4498_vm4, %v4349_v42 }
0x303e   :  { %v8534_v21 = vunpack.i.h.bf16 %v10745_v27  ;;  %v8533_v47 = vunpack.i.l.bf16 %v10745_v27  ;;  %8196 = vmatpush3.bf16.xpose.msk.msra.mxu0 %vm10603_vm5, %v8194_v29  ;;  %7609 = vmatprep.mubr.msk.f32.mxu0 %vm9422_vm0, %v9423_v1  ;;  %v8518_v49 = vunpack.i.l.bf16 %v10747_v31 }
0x303f   :  { %8197 = vmatprep.subr.bf16.mxu0 %v9421_v0  ;;  %8188 = vmatpush3.bf16.xpose.msk.msra.mxu1 %vm10603_vm5, %v8186_v4 }
0x3040   :  { %8189 = vmatprep.subr.bf16.mxu1 %v9421_v0  ;;  %8616 = vrot.lane.b32.xlu0 %v10745_v27, %s9426_s16 }
0x3041   :  { %v10761_v62 = vpop.permute.xlu0 %4354  ;;  %v10763_v60 = vpop.permute.xlu1 %8526 }
0x3042   :  { %v8529_v45 = vunpack.i.h.bf16 %v10763_v60  ;;  %v8528_v30 = vunpack.i.l.bf16 %v10763_v60  ;;  %8611 = vrot.lane.b32.xlu1 %v10763_v60, %s9426_s16 }
0x3044   :  { %8621 = vrot.lane.b32.xlu0 %v10660_v44, %s9426_s16 }
0x3045   :  { %v10772_v59 = vpop.permute.xlu0 %8541  ;;  %v4353_v63 = vpop.permute.xlu1 %4352 }
0x3046   :  { %v8544_v40 = vunpack.i.h.bf16 %v10772_v59  ;;  %v8543_v41 = vunpack.i.l.bf16 %v10772_v59  ;;  %8200 = vmatpush3.bf16.xpose.msk.msra.mxu0 %vm10603_vm5, %v8198_v34  ;;  %8626 = vrot.lane.b32.xlu1 %v10686_v53, %s9426_s16  ;;  %v8519_v53 = vunpack.i.h.bf16 %v10747_v31  ;;  %v4483_v34 = vshrl.u32 %v4480_v14, 7 }
0x3047   :  { %8201 = vmatprep.subr.bf16.mxu0 %v9421_v0  ;;  %8192 = vmatpush3.bf16.xpose.msk.msra.mxu1 %vm10603_vm5, %v8190_v11 }
0x3048   :  { %8209 = vmatprep.subr.bf16.mxu1 %v9421_v0  ;;  %8631 = vrot.lane.b32.xlu0 %v10677_v37, %s9426_s16  ;;  %v8246_v15 = vpack.c.bf16 %v8544_v40, %v8543_v41 }
0x3049   :  { %v10789_v52 = vpop.permute.xlu0 %8551  ;;  %v10791_v50 = vpop.permute.xlu1 %8536 }
0x304a   :  { %v8554_v44 = vunpack.i.h.bf16 %v10789_v52  ;;  %v8553_v33 = vunpack.i.l.bf16 %v10789_v52  ;;  %v8539_v58 = vunpack.i.h.bf16 %v10791_v50  ;;  %v8538_v7 = vunpack.i.l.bf16 %v10791_v50  ;;  %8636 = vrot.lane.b32.xlu1 %v10731_v20, %s9426_s16 }
0x304b   :  { %v8218_v20 = vpack.c.bf16 %v8514_v28, %v8513_v10 }
0x304c   :  { %8641 = vrot.lane.b32.xlu0 %v10723_v3, %s9426_s16  ;;  %v8206_v3 = vpack.c.bf16 %v8519_v53, %v8518_v49 }
0x304d   :  { %v10806_v12 = vpop.permute.xlu0 %8561  ;;  %v10808_v5 = vpop.permute.xlu1 %8546 }
0x304e   :  { %v8564_v32 = vunpack.i.h.bf16 %v10806_v12  ;;  %v8563_v13 = vunpack.i.l.bf16 %v10806_v12  ;;  %v8549_v42 = vunpack.i.h.bf16 %v10808_v5  ;;  %v8548_v37 = vunpack.i.l.bf16 %v10808_v5  ;;  %8204 = vmatpush3.bf16.xpose.msk.msra.mxu0 %vm10603_vm5, %v8202_v9  ;;  %7591 = vmatmul.mubr.msk.f32.vlgmr.msra.gmra.mrb[50].mxu1 %vm4498_vm4, %v10709_v8 }
0x304f   :  { %8212 = vmatpush3.bf16.xpose.msk.msra.mxu1 %vm10603_vm5, %v8210_v38  ;;  %8205 = vmatprep.subr.bf16.mxu0 %v9421_v0 }
0x3050   :  { %8213 = vmatprep.subr.bf16.mxu1 %v9421_v0  ;;  %8651 = vrot.lane.b32.xlu0 %v10693_v26, %s9426_s16  ;;  %v8523_v26 = vunpack.i.l.bf16 %v10738_v22  ;;  %v8254_v2 = vpack.c.bf16 %v8564_v32, %v8563_v13 }
0x3051   :  { %v10826_v51 = vpop.permute.xlu1 %8556  ;;  %7628 = vmatprep.mubr.msk.f32.mxu1 %vm9422_vm0, %v9423_v1  ;;  %8646 = vrot.lane.b32.xlu1 %v10664_v35, %s9426_s16  ;;  %v8524_v35 = vunpack.i.h.bf16 %v10738_v22  ;;  %v4359_v17 = vpop.permute.xlu0 %4358 }
0x3052   :  { %v8559_v39 = vunpack.i.h.bf16 %v10826_v51  ;;  %v8558_v8 = vunpack.i.l.bf16 %v10826_v51 }
0x3054   :  { %8661 = vrot.lane.b32.xlu0 %v10740_v24, %s9426_s16  ;;  %v8238_v24 = vpack.c.bf16 %v8559_v39, %v8558_v8 }
0x3055   :  { %8656 = vrot.lane.b32.xlu1 %v10684_v55, %s9426_s16  ;;  %v8226_v55 = vpack.c.bf16 %v8529_v45, %v8528_v30  ;;  %v8567_v6 = vpop.permute.xlu0 %8566  ;;  %v10917_v45 = vand.u32 127, %v4480_v14 }
0x3056   :  { %8208 = vmatpush3.bf16.xpose.msk.msra.mxu0 %vm10603_vm5, %v8206_v3  ;;  %v8569_v29 = vunpack.i.h.bf16 %v8567_v6  ;;  %v8568_v27 = vunpack.i.l.bf16 %v8567_v6 }
0x3057   :  { %8225 = vmatprep.subr.bf16.mxu0 %v9421_v0  ;;  %8216 = vmatpush3.bf16.xpose.msk.msra.mxu1 %vm10603_vm5, %v8214_v48  ;;  %v4488_v41 = vand.u32 7, %v10917_v45  ;;  %vm6468_vm12 = vcmp.eq.s32.totalorder %v10917_v45, 0 }
0x3058   :  { %8217 = vmatprep.subr.bf16.mxu1 %v9421_v0  ;;  %8671 = vrot.lane.b32.xlu0 %v10671_v36, %s9426_s16  ;;  %v8230_v36 = vpack.c.bf16 %v8539_v58, %v8538_v7  ;;  %v8258_v4 = vpack.c.bf16 %v8569_v29, %v8568_v27 }
0x3059   :  { %8666 = vrot.lane.b32.xlu1 %v10729_v19, %s9426_s16  ;;  %v8242_v19 = vpack.c.bf16 %v8534_v21, %v8533_v47  ;;  %v8577_v18 = vpop.permute.xlu0 %8576  ;;  %vm4496_vm6 = vcmp.eq.s32.totalorder %v4488_v41, %v4483_v34 }
0x305a   :  { %v8579_v60 = vunpack.i.h.bf16 %v8577_v18  ;;  %v8578_v23 = vunpack.i.l.bf16 %v8577_v18 }
0x305c   :  { %8681 = vrot.lane.b32.xlu0 %v10691_v54, %s9426_s16  ;;  %v8222_v54 = vpack.c.bf16 %v8524_v35, %v8523_v26 }
0x305d   :  { %7610 = vmatmul.mubr.msk.f32.vlgmr.msra.gmra.mrb[46].mxu0 %vm4498_vm4, %v4353_v63  ;;  %8676 = vrot.lane.b32.xlu1 %v10705_v57, %s9426_s16  ;;  %v8234_v57 = vpack.c.bf16 %v8549_v42, %v8548_v37  ;;  %v8264_v63 = vpack.c.bf16 %v8579_v60, %v8578_v23 }
0x305e   :  { %8228 = vmatpush3.bf16.xpose.msk.msra.mxu0 %vm10603_vm5, %v8226_v55  ;;  %7647 = vmatprep.mubr.msk.f32.mxu0 %vm9422_vm0, %v9423_v1 }
0x305f   :  { %8229 = vmatprep.subr.bf16.mxu0 %v9421_v0  ;;  %8220 = vmatpush3.bf16.xpose.msk.msra.mxu1 %vm10603_vm5, %v8218_v20 }
0x3060   :  { %8221 = vmatprep.subr.bf16.mxu1 %v9421_v0  ;;  %8691 = vrot.lane.b32.xlu0 %v10738_v22, %s9426_s16  ;;  %v4357_v22 = vpop.permute.xlu1 %4356 }
0x3061   :  { %8686 = vrot.lane.b32.xlu1 %v10747_v31, %s9426_s16 }
0x3064   :  { %v8572_v31 = vpop.permute.xlu1 %8571 }
0x3065   :  { %v8574_v21 = vunpack.i.h.bf16 %v8572_v31  ;;  %v8573_v47 = vunpack.i.l.bf16 %v8572_v31 }
0x3066   :  { %8232 = vmatpush3.bf16.xpose.msk.msra.mxu0 %vm10603_vm5, %v8230_v36 }
0x3067   :  { %8233 = vmatprep.subr.bf16.mxu0 %v9421_v0  ;;  %8224 = vmatpush3.bf16.xpose.msk.msra.mxu1 %vm10603_vm5, %v8222_v54  ;;  %v8261_v56 = vpack.c.bf16 %v8574_v21, %v8573_v47 }
0x3068   :  { %8241 = vmatprep.subr.bf16.mxu1 %v9421_v0  ;;  %v8582_v30 = vpop.permute.xlu1 %8581 }
0x3069   :  { %v8584_v11 = vunpack.i.h.bf16 %v8582_v30  ;;  %v8583_v40 = vunpack.i.l.bf16 %v8582_v30 }
0x306b   :  { %v8267_v16 = vpack.c.bf16 %v8584_v11, %v8583_v40 }
0x306e   :  { %8236 = vmatpush3.bf16.xpose.msk.msra.mxu0 %vm10603_vm5, %v8234_v57  ;;  %7629 = vmatmul.mubr.msk.f32.vlgmr.msra.gmra.mrb[52].mxu1 %vm4498_vm4, %v10761_v62  ;;  %v8250_v62 = vpack.c.bf16 %v8554_v44, %v8553_v33  ;;  %v9434_v33 = vmov -1e+30  }
0x306f   :  { %8237 = vmatprep.subr.bf16.mxu0 %v9421_v0  ;;  %8244 = vmatpush3.bf16.xpose.msk.msra.mxu1 %vm10603_vm5, %v8242_v19  ;;  %v10930_v58 = vsel %vm4496_vm6, 0.0, %v9434_v33 }
0x3070   :  { %7666 = vmatprep.mubr.msk.f32.mxu1 %vm9422_vm0, %v9423_v1  ;;  %8245 = vmatprep.subr.bf16.mxu1 %v9421_v0 }
0x3076   :  { %8240 = vmatpush3.bf16.xpose.msk.msra.mxu0 %vm10603_vm5, %v8238_v24 }
0x3077   :  { %8257 = vmatprep.subr.bf16.mxu0 %v9421_v0  ;;  %8248 = vmatpush3.bf16.xpose.msk.msra.mxu1 %vm10603_vm5, %v8246_v15 }
0x3078   :  { %8249 = vmatprep.subr.bf16.mxu1 %v9421_v0 }
0x307d   :  { %7648 = vmatmul.mubr.msk.f32.vlgmr.msra.gmra.mrb[48].mxu0 %vm4498_vm4, %v4357_v22  ;;  %v8587_v43 = vpop.permute.xlu1 %8586 }
0x307e   :  { %8259 = vmatpush3.bf16.msra.mxu0 %v8258_v4  ;;  %7685 = vmatprep.mubr.msk.f32.mxu0 %vm9422_vm0, %v9423_v1  ;;  %v8589_v46 = vunpack.i.h.bf16 %v8587_v43  ;;  %v8588_v44 = vunpack.i.l.bf16 %v8587_v43 }
0x307f   :  { %8260 = vmatprep.subr.bf16.mxu0 %v9421_v0  ;;  %8252 = vmatpush3.bf16.xpose.msk.msra.mxu1 %vm10603_vm5, %v8250_v62 }
0x3080   :  { %8253 = vmatprep.subr.bf16.mxu1 %v9421_v0  ;;  %v8270_v32 = vpack.c.bf16 %v8589_v46, %v8588_v44 }
0x3082   :  { %8262 = vmatpush3.bf16.msra.mxu0 %v8261_v56 }
0x3083   :  { %8263 = vmatprep.subr.bf16.mxu0 %v9421_v0 }
0x3086   :  { %8265 = vmatpush3.bf16.msra.mxu0 %v8264_v63 }
0x3087   :  { %8266 = vmatprep.subr.bf16.mxu0 %v9421_v0  ;;  %8256 = vmatpush3.bf16.xpose.msk.msra.mxu1 %vm10603_vm5, %v8254_v2 }
0x3088   :  { %8269 = vmatprep.subr.bf16.mxu1 %v9421_v0  ;;  %v10943_v53 = vpop.permute.xlu1 %8591 }
0x308a   :  { %8268 = vmatpush3.bf16.msra.mxu0 %v8267_v16 }
0x308b   :  { %v4583_v7 = vpop.f32.mrb[42].mxu0  ;;  %8281 = vmatprep.subr.bf16.mxu0 %v9421_v0 }
0x308c   :  { %v5203_v9 = vmul.f32 0.35355338, %v4583_v7  ;;  %v7535_v38 = vpop.f32.mrb[43].mxu0 }
0x308e   :  { %v5211_v13 = vadd.f32 %v5203_v9, %v10930_v58  ;;  %7667 = vmatmul.mubr.msk.f32.vlgmr.msra.gmra.mrb[54].mxu1 %vm4498_vm4, %v4359_v17 }
0x308f   :  { %8271 = vmatpush3.bf16.msra.mxu1 %v8270_v32  ;;  %7704 = vmatprep.mubr.msk.f32.mxu1 %vm9422_vm0, %v9423_v1 }
0x3090   :  { %v5219_v61 = vsel %vm2073_vm3, %v5211_v13, -inf  ;;  %8272 = vmatprep.subr.bf16.mxu1 %v9421_v0  ;;  %v10939_v42 = vpop.permute.xlu0 %8596 }
0x3091   :  { %5220 = vmax.xlane.f32.xlu1 %v5219_v61 }
0x309c   :  { %v10941_v37 = vpop.permute.xlu0 %8606 }
0x30a3   :  { %v10947_v39 = vpop.permute.xlu1 %8601 }
0x30b2   :  { %v10945_v49 = vpop.permute.xlu0 %8616 }
0x30b4   :  { %v10949_v10 = vpop.permute.xlu1 %8611 }
0x30b6   :  { %v8622_v8 = vpop.permute.xlu0 %8621 }
0x30b7   :  { %v8624_v3 = vunpack.i.h.bf16 %v8622_v8  ;;  %v8623_v28 = vunpack.i.l.bf16 %v8622_v8 }
0x30b8   :  { %v10953_v26 = vpop.permute.xlu1 %8626 }
0x30b9   :  { %v8273_v48 = vpack.c.bf16 %v8624_v3, %v8623_v28 }
0x30ba   :  { %v10951_v35 = vpop.permute.xlu0 %8631 }
0x30bb   :  { %8274 = vmatpush3.bf16.msra.mxu1 %v8273_v48 }
0x30bc   :  { %8275 = vmatprep.subr.bf16.mxu1 %v9421_v0  ;;  %v10958_v20 = vpop.permute.xlu1 %8636 }
0x30be   :  { %v10956_v55 = vpop.permute.xlu0 %8641 }
0x30c2   :  { %v10960_v36 = vpop.permute.xlu0 %8651 }
0x30c3   :  { %v8647_v54 = vpop.permute.xlu1 %8646 }
0x30c4   :  { %v8649_v57 = vunpack.i.h.bf16 %v8647_v54  ;;  %v8648_v19 = vunpack.i.l.bf16 %v8647_v54 }
0x30c6   :  { %v8276_v17 = vpack.c.bf16 %v8649_v57, %v8648_v19  ;;  %v10962_v22 = vpop.permute.xlu0 %8661 }
0x30c7   :  { %v10968_v14 = vpop.permute.xlu1 %8656 }
0x30c8   :  { %8277 = vmatpush3.bf16.msra.mxu1 %v8276_v17 }
0x30c9   :  { %8278 = vmatprep.subr.bf16.mxu1 %v9421_v0 }
0x30ca   :  { %v8672_v24 = vpop.permute.xlu0 %8671 }
0x30cb   :  { %v8674_v6 = vunpack.i.h.bf16 %v8672_v24  ;;  %v8673_v15 = vunpack.i.l.bf16 %v8672_v24  ;;  %v10970_v62 = vpop.permute.xlu1 %8666 }
0x30cd   :  { %v8279_v29 = vpack.c.bf16 %v8674_v6, %v8673_v15 }
0x30cf   :  { %8280 = vmatpush3.bf16.msra.mxu1 %v8279_v29  ;;  %v10974_v34 = vpop.permute.xlu1 %8676 }
0x30d0   :  { %8293 = vmatprep.subr.bf16.mxu1 %v9421_v0 }
0x30d3   :  { %v10976_v63 = vpop.permute.xlu1 %8686 }
0x3101   :  { %v4671_v27 = vpop.f32.mrb[48].mxu1 }
0x3102   :  { %v5204_v31 = vmul.f32 0.35355338, %v4671_v27  ;;  %v7554_v4 = vpop.f32.mrb[49].mxu1 }
0x3104   :  { %v5212_v21 = vadd.f32 %v5204_v31, %v10930_v58 }
0x3106   :  { %v5222_v47 = vsel %vm2073_vm3, %v5212_v21, -inf }
0x3107   :  { %5223 = vmax.xlane.f32.xlu0 %v5222_v47  ;;  %v11002_v47 = vpop.permute.xlu0 %8681 }
0x3110   :  { %v4759_v18 = vpop.f32.mrb[44].mxu0 }
0x3111   :  { %v5205_v60 = vmul.f32 0.35355338, %v4759_v18  ;;  %v7573_v23 = vpop.f32.mrb[45].mxu0  ;;  %v11004_v18 = vpop.permute.xlu0 %8691 }
0x3113   :  { %v5213_v56 = vadd.f32 %v5205_v60, %v10930_v58 }
0x3115   :  { %v5225_v30 = vsel %vm2073_vm3, %v5213_v56, -inf }
0x3116   :  { %5226 = vmax.xlane.f32.xlu0 %v5225_v30 }
0x311e   :  { %v5221_v11 = vpop.xlane.xlu1 %5220 }
0x311f   :  { %v5243_v43 = vsub.f32 %v5211_v13, %v5221_v11 }
0x3121   :  { %v4847_v40 = vpop.f32.mrb[50].mxu1  ;;  %v5251_v44 = vmul.f32 1.442695, %v5243_v43 }
0x3122   :  { %v5206_v41 = vmul.f32 0.35355338, %v4847_v40  ;;  %v7592_v2 = vpop.f32.mrb[51].mxu1 }
0x3123   :  { %8997 = vpow2.f32 %v5251_v44 }
0x3124   :  { %v5214_v16 = vadd.f32 %v5206_v41, %v10930_v58 }
0x3126   :  { %v5228_v46 = vsel %vm2073_vm3, %v5214_v16, -inf }
0x3127   :  { %5229 = vmax.xlane.f32.xlu1 %v5228_v46 }
0x312d   :  { %v8998_v61 = vpop.eup %8997 }
0x312e   :  { %v5267_v13 = vsel %vm2073_vm3, %v8998_v61, 0.0 }
0x3130   :  { %v4935_v33 = vpop.f32.mrb[46].mxu0 }
0x3131   :  { %v5207_v7 = vmul.f32 0.35355338, %v4935_v33  ;;  %v7611_v9 = vpop.f32.mrb[47].mxu0 }
0x3132   :  { %v8594_v9 = vunpack.i.h.bf16 %v10943_v53 }
0x3133   :  { %v10981_v38 = vadd.f32 %v5207_v7, %v10930_v58 }
0x3135   :  { %v5231_v32 = vsel %vm2073_vm3, %v10981_v38, -inf }
0x3136   :  { %5232 = vmax.xlane.f32.xlu0 %v5231_v32  ;;  %v8593_v32 = vunpack.i.l.bf16 %v10943_v53 }
0x313a   :  { %5268 = vadd.xlane.f32.xlu0 %v5267_v13 }
0x3141   :  { %v5023_v8 = vpop.f32.mrb[52].mxu1 }
0x3142   :  { %v5208_v3 = vmul.f32 0.35355338, %v5023_v8  ;;  %v7630_v28 = vpop.f32.mrb[53].mxu1 }
0x3143   :  { %v8629_v28 = vunpack.i.h.bf16 %v10953_v26 }
0x3144   :  { %v5216_v48 = vadd.f32 %v5208_v3, %v10930_v58  ;;  %v8282_v3 = vpack.c.bf16 %v8594_v9, %v8593_v32 }
0x3146   :  { %v5234_v54 = vsel %vm2073_vm3, %v5216_v48, -inf }
0x3147   :  { %5235 = vmax.xlane.f32.xlu1 %v5234_v54  ;;  %v8628_v54 = vunpack.i.l.bf16 %v10953_v26 }
0x3149   :  { %v8285_v53 = vpack.c.bf16 %v8629_v28, %v8628_v54 }
0x3150   :  { %v5111_v57 = vpop.f32.mrb[48].mxu0 }
0x3151   :  { %v5209_v19 = vmul.f32 0.35355338, %v5111_v57  ;;  %v7649_v17 = vpop.f32.mrb[49].mxu0 }
0x3153   :  { %v10989_v24 = vadd.f32 %v5209_v19, %v10930_v58 }
0x3155   :  { %v5237_v6 = vsel %vm2073_vm3, %v10989_v24, -inf }
0x3156   :  { %5238 = vmax.xlane.f32.xlu0 %v5237_v6  ;;  %v8678_v6 = vunpack.i.l.bf16 %v10974_v34 }
0x3161   :  { %v5199_v15 = vpop.f32.mrb[54].mxu1 }
0x3162   :  { %v5210_v29 = vmul.f32 0.35355338, %v5199_v15  ;;  %v7668_v27 = vpop.f32.mrb[55].mxu1 }
0x3164   :  { %v10994_v31 = vadd.f32 %v5210_v29, %v10930_v58 }
0x3166   :  { %v5240_v4 = vsel %vm2073_vm3, %v10994_v31, -inf }
0x3167   :  { %5241 = vmax.xlane.f32.xlu1 %v5240_v4 }
0x316c   :  { %8701 = vrot.lane.b32.xlu0 %v10772_v59, %s9426_s16 }
0x3178   :  { %8696 = vrot.lane.b32.xlu1 %v10791_v50, %s9426_s16 }
0x3194   :  { %v5224_v60 = vpop.xlane.xlu0 %5223 }
0x3195   :  { %v5244_v23 = vsub.f32 %v5212_v21, %v5224_v60 }
0x3197   :  { %v5253_v30 = vmul.f32 1.442695, %v5244_v23 }
0x3199   :  { %8999 = vpow2.f32 %v5253_v30 }
0x31a3   :  { %v5227_v58 = vpop.xlane.xlu0 %5226  ;;  %v11006_v11 = vpop.eup %8999 }
0x31a4   :  { %v5245_v40 = vsub.f32 %v5213_v56, %v5227_v58  ;;  %v5270_v41 = vsel %vm2073_vm3, %v11006_v11, 0.0 }
0x31a5   :  { %5271 = vadd.xlane.f32.xlu1 %v5270_v41 }
0x31a6   :  { %v5255_v2 = vmul.f32 1.442695, %v5245_v40 }
0x31a8   :  { %9001 = vpow2.f32 %v5255_v2 }
0x31b2   :  { %v11010_v59 = vpop.eup %9001 }
0x31b3   :  { %v5273_v50 = vsel %vm2073_vm3, %v11010_v59, 0.0 }
0x31b4   :  { %5274 = vadd.xlane.f32.xlu1 %v5273_v50  ;;  %v5230_v43 = vpop.xlane.xlu1 %5229 }
0x31b5   :  { %v5246_v21 = vsub.f32 %v5214_v16, %v5230_v43 }
0x31b7   :  { %v5257_v46 = vmul.f32 1.442695, %v5246_v21  ;;  %v8598_v21 = vunpack.i.l.bf16 %v10939_v42 }
0x31b9   :  { %9003 = vpow2.f32 %v5257_v46 }
0x31c3   :  { %v5233_v44 = vpop.xlane.xlu0 %5232  ;;  %v11014_v33 = vpop.eup %9003 }
0x31c4   :  { %v5276_v56 = vsel %vm2073_vm3, %v11014_v33, 0.0  ;;  %v5247_v16 = vsub.f32 %v10981_v38, %v5233_v44  ;;  %v8654_v38 = vunpack.i.h.bf16 %v10960_v36 }
0x31c5   :  { %8706 = vrot.lane.b32.xlu1 %v10808_v5, %s9426_s16  ;;  %5277 = vadd.xlane.f32.xlu0 %v5276_v56  ;;  %v8634_v56 = vunpack.i.h.bf16 %v10951_v35 }
0x31c6   :  { %v5259_v19 = vmul.f32 1.442695, %v5247_v16  ;;  %v8604_v16 = vunpack.i.h.bf16 %v10947_v39 }
0x31c7   :  { %v5269_v7 = vpop.xlane.xlu0 %5268 }
0x31c8   :  { %9005 = vrcp.f32 %v5269_v7  ;;  %v8633_v7 = vunpack.i.l.bf16 %v10951_v35  ;;  %v8684_v35 = vunpack.i.h.bf16 %v11002_v47 }
0x31d2   :  { %v9006_v13 = vpop.eup %9005 }
0x31d3   :  { %v5292_v8 = vmul.f32 %v9006_v13, %v8998_v61  ;;  %v8653_v61 = vunpack.i.l.bf16 %v10960_v36  ;;  %v8683_v13 = vunpack.i.l.bf16 %v11002_v47  ;;  %v8664_v47 = vunpack.i.h.bf16 %v10962_v22 }
0x31d4   :  { %v5236_v5 = vpop.xlane.xlu1 %5235 }
0x31d5   :  { %v5248_v57 = vsub.f32 %v5216_v48, %v5236_v5  ;;  %7686 = vmatmul.mubr.msk.f32.vlgmr.msra.gmra.mrb[50].mxu0 %vm2073_vm3, %v5292_v8  ;;  %v8288_v26 = vpack.c.bf16 %v8654_v38, %v8653_v61  ;;  %v8679_v48 = vunpack.i.h.bf16 %v10974_v34  ;;  %v8603_v8 = vunpack.i.l.bf16 %v10947_v39 }
0x31d6   :  { %8283 = vmatpush3.bf16.msra.mxu0 %v8282_v3  ;;  %7723 = vmatprep.mubr.msk.f32.mxu0 %vm9422_vm0, %v9423_v1  ;;  %v8303_v28 = vpack.c.bf16 %v8684_v35, %v8683_v13  ;;  %v8639_v5 = vunpack.i.h.bf16 %v10958_v20  ;;  %v8688_v38 = vunpack.i.l.bf16 %v10976_v63 }
0x31d7   :  { %v5261_v17 = vmul.f32 1.442695, %v5248_v57  ;;  %8284 = vmatprep.subr.bf16.mxu0 %v9421_v0  ;;  %v8291_v15 = vpack.c.bf16 %v8679_v48, %v8678_v6  ;;  %v8638_v57 = vunpack.i.l.bf16 %v10958_v20  ;;  %v8608_v48 = vunpack.i.l.bf16 %v10941_v37 }
0x31d9   :  { %9007 = vpow2.f32 %v5261_v17  ;;  %v8309_v39 = vpack.c.bf16 %v8639_v5, %v8638_v57 }
0x31da   :  { %9009 = vpow2.f32 %v5259_v19  ;;  %8286 = vmatpush3.bf16.msra.mxu0 %v8285_v53  ;;  %v8689_v53 = vunpack.i.h.bf16 %v10976_v63  ;;  %v8669_v63 = vunpack.i.h.bf16 %v10970_v62 }
0x31db   :  { %8287 = vmatprep.subr.bf16.mxu0 %v9421_v0 }
0x31dc   :  { %v8315_v61 = vpack.c.bf16 %v8689_v53, %v8688_v38 }
0x31de   :  { %8289 = vmatpush3.bf16.msra.mxu0 %v8288_v26  ;;  %v8609_v26 = vunpack.i.h.bf16 %v10941_v37 }
0x31df   :  { %8290 = vmatprep.subr.bf16.mxu0 %v9421_v0 }
0x31e2   :  { %8292 = vmatpush3.bf16.msra.mxu0 %v8291_v15  ;;  %v8318_v15 = vpack.c.bf16 %v8609_v26, %v8608_v48 }
0x31e3   :  { %v5239_v29 = vpop.xlane.xlu0 %5238  ;;  %v11035_v27 = vpop.eup %9007  ;;  %8305 = vmatprep.subr.bf16.mxu0 %v9421_v0 }
0x31e4   :  { %v5249_v36 = vsub.f32 %v10989_v24, %v5239_v29  ;;  %v11039_v4 = vpop.eup %9009  ;;  %v5282_v60 = vsel %vm2073_vm3, %v11035_v27, 0.0  ;;  %v8644_v29 = vunpack.i.h.bf16 %v10956_v55 }
0x31e5   :  { %5283 = vadd.xlane.f32.xlu0 %v5282_v60  ;;  %v5279_v34 = vsel %vm2073_vm3, %v11039_v4, 0.0  ;;  %v8668_v60 = vunpack.i.l.bf16 %v10970_v62  ;;  %v8619_v62 = vunpack.i.h.bf16 %v10945_v49 }
0x31e6   :  { %v5263_v23 = vmul.f32 1.442695, %v5249_v36  ;;  %v8643_v36 = vunpack.i.l.bf16 %v10956_v55  ;;  %v8693_v55 = vunpack.i.l.bf16 %v11004_v18 }
0x31e7   :  { %v11082_v19 = vpop.permute.xlu0 %8701 }
0x31e8   :  { %9011 = vpow2.f32 %v5263_v23  ;;  %v8321_v37 = vpack.c.bf16 %v8644_v29, %v8643_v36  ;;  %v8694_v23 = vunpack.i.h.bf16 %v11004_v18  ;;  %v8613_v18 = vunpack.i.l.bf16 %v10949_v10  ;;  %v6123_v36 = vld [vmem:[%s11271_s19] sm:$0xff] }
0x31e9   :  { %5280 = vadd.xlane.f32.xlu1 %v5279_v34 }
0x31ea   :  { %v8327_v34 = vpack.c.bf16 %v8694_v23, %v8693_v55  ;;  %v6127_v55 = vld [vmem:[%s11271_s19 + $0x20] sm:$0xff] }
0x31f2   :  { %v11045_v30 = vpop.eup %9011 }
0x31f3   :  { %v5285_v58 = vsel %vm2073_vm3, %v11045_v30, 0.0 }
0x31f4   :  { %5286 = vadd.xlane.f32.xlu1 %v5285_v58  ;;  %v5242_v24 = vpop.xlane.xlu1 %5241 }
0x31f5   :  { %v5250_v40 = vsub.f32 %v10994_v31, %v5242_v24  ;;  %v8599_v31 = vunpack.i.h.bf16 %v10939_v42  ;;  %v8659_v42 = vunpack.i.h.bf16 %v10968_v14 }
0x31f7   :  { %v5265_v41 = vmul.f32 1.442695, %v5250_v40  ;;  %v8294_v44 = vpack.c.bf16 %v8599_v31, %v8598_v21 }
0x31f8   :  { %v11058_v43 = vpop.permute.xlu1 %8696 }
0x31f9   :  { %9013 = vpow2.f32 %v5265_v41  ;;  %v8618_v41 = vunpack.i.l.bf16 %v10945_v49 }
0x31fb   :  { %8711 = vrot.lane.b32.xlu0 %v10789_v52, %s9426_s16  ;;  %v8342_v21 = vpack.c.bf16 %v8619_v62, %v8618_v41 }
0x3203   :  { %v11054_v2 = vpop.eup %9013 }
0x3204   :  { %v5288_v50 = vsel %vm2073_vm3, %v11054_v2, 0.0 }
0x3205   :  { %8716 = vrot.lane.b32.xlu1 %v10826_v51, %s9426_s16 }
0x321a   :  { %5289 = vadd.xlane.f32.xlu0 %v5288_v50 }
0x3230   :  { %8721 = vrot.lane.b32.xlu0 %v10806_v12, %s9426_s16  ;;  %v8297_v12 = vpack.c.bf16 %v8634_v56, %v8633_v7  ;;  %s9435_s16 = smov 16  }
0x3232   :  { %v5272_v52 = vpop.xlane.xlu1 %5271 }
0x3233   :  { %9015 = vrcp.f32 %v5272_v52  ;;  %v8614_v52 = vunpack.i.h.bf16 %v10949_v10  ;;  %v8699_v10 = vunpack.i.h.bf16 %v11058_v43 }
0x323d   :  { %v9016_v51 = vpop.eup %9015 }
0x323e   :  { %v5294_v46 = vmul.f32 %v9016_v51, %v11006_v11  ;;  %v8658_v11 = vunpack.i.l.bf16 %v10968_v14  ;;  %v8306_v14 = vpack.c.bf16 %v8604_v16, %v8603_v8  ;;  %v8704_v51 = vunpack.i.h.bf16 %v11082_v19 }
0x3240   :  { %7705 = vmatmul.mubr.msk.f32.vlgmr.msra.gmra.mrb[56].mxu1 %vm2073_vm3, %v5294_v46  ;;  %v8300_v32 = vpack.c.bf16 %v8659_v42, %v8658_v11  ;;  %v8703_v46 = vunpack.i.l.bf16 %v11082_v19 }
0x3241   :  { %v5275_v9 = vpop.xlane.xlu1 %5274  ;;  %8295 = vmatpush3.bf16.msra.mxu1 %v8294_v44  ;;  %7742 = vmatprep.mubr.msk.f32.mxu1 %vm9422_vm0, %v9423_v1 }
0x3242   :  { %9017 = vrcp.f32 %v5275_v9  ;;  %8296 = vmatprep.subr.bf16.mxu1 %v9421_v0  ;;  %v8330_v9 = vpack.c.bf16 %v8614_v52, %v8613_v18  ;;  %v6212_v52 = vld [vmem:[%s11273_s21] sm:$0xff]  ;;  %v6213_v18 = vld [vmem:[%s11273_s21 + $0x8] sm:$0xff] }
0x3245   :  { %8298 = vmatpush3.bf16.msra.mxu1 %v8297_v12  ;;  %v8707_v58 = vpop.permute.xlu1 %8706  ;;  %v8345_v12 = vpack.c.bf16 %v8704_v51, %v8703_v46  ;;  %v6215_v51 = vld [vmem:[%s11273_s21 + $0x18] sm:$0xff] }
0x3246   :  { %8299 = vmatprep.subr.bf16.mxu1 %v9421_v0  ;;  %v8708_v35 = vunpack.i.l.bf16 %v8707_v58 }
0x3249   :  { %8301 = vmatpush3.bf16.msra.mxu1 %v8300_v32  ;;  %v8709_v32 = vunpack.i.h.bf16 %v8707_v58 }
0x324a   :  { %8302 = vmatprep.subr.bf16.mxu1 %v9421_v0 }
0x324b   :  { %v8336_v16 = vpack.c.bf16 %v8709_v32, %v8708_v35 }
0x324c   :  { %v9018_v3 = vpop.eup %9017 }
0x324d   :  { %v5296_v54 = vmul.f32 %v9018_v3, %v11010_v59  ;;  %8304 = vmatpush3.bf16.msra.mxu1 %v8303_v28  ;;  %v8663_v59 = vunpack.i.l.bf16 %v10962_v22 }
0x324e   :  { %8317 = vmatprep.subr.bf16.mxu1 %v9421_v0 }
0x324f   :  { %7724 = vmatmul.mubr.msk.f32.vlgmr.msra.gmra.mrb[52].mxu0 %vm2073_vm3, %v5296_v54  ;;  %v8312_v20 = vpack.c.bf16 %v8664_v47, %v8663_v59 }
0x3250   :  { %8307 = vmatpush3.bf16.msra.mxu0 %v8306_v14  ;;  %7761 = vmatprep.mubr.msk.f32.mxu0 %vm9422_vm0, %v9423_v1 }
0x3251   :  { %8308 = vmatprep.subr.bf16.mxu0 %v9421_v0 }
0x3252   :  { %v5278_v17 = vpop.xlane.xlu0 %5277 }
0x3253   :  { %9019 = vrcp.f32 %v5278_v17 }
0x3254   :  { %8310 = vmatpush3.bf16.msra.mxu0 %v8309_v39 }
0x3255   :  { %8311 = vmatprep.subr.bf16.mxu0 %v9421_v0 }
0x3258   :  { %8313 = vmatpush3.bf16.msra.mxu0 %v8312_v20 }
0x3259   :  { %8314 = vmatprep.subr.bf16.mxu0 %v9421_v0 }
0x325c   :  { %8316 = vmatpush3.bf16.msra.mxu0 %v8315_v61 }
0x325d   :  { %8329 = vmatprep.subr.bf16.mxu0 %v9421_v0  ;;  %v9020_v22 = vpop.eup %9019 }
0x325e   :  { %v5298_v6 = vmul.f32 %v9020_v22, %v11014_v33  ;;  %v8324_v33 = vpack.c.bf16 %v8669_v63, %v8668_v60  ;;  %v6125_v63 = vld [vmem:[%s11271_s19 + $0x10] sm:$0xff] }
0x3260   :  { %7743 = vmatmul.mubr.msk.f32.vlgmr.msra.gmra.mrb[58].mxu1 %vm2073_vm3, %v5298_v6 }
0x3261   :  { %8319 = vmatpush3.bf16.msra.mxu1 %v8318_v15  ;;  %7780 = vmatprep.mubr.msk.f32.mxu1 %vm9422_vm0, %v9423_v1 }
0x3262   :  { %8320 = vmatprep.subr.bf16.mxu1 %v9421_v0 }
0x3265   :  { %8322 = vmatpush3.bf16.msra.mxu1 %v8321_v37  ;;  %v6124_v37 = vld [vmem:[%s11271_s19 + $0x8] sm:$0xff] }
0x3266   :  { %8323 = vmatprep.subr.bf16.mxu1 %v9421_v0  ;;  %v8354_v60 = vpack.c.bf16 %v6124_v37, %v6123_v36 }
0x3269   :  { %8325 = vmatpush3.bf16.msra.mxu1 %v8324_v33  ;;  %v6126_v33 = vld [vmem:[%s11271_s19 + $0x18] sm:$0xff] }
0x326a   :  { %8326 = vmatprep.subr.bf16.mxu1 %v9421_v0  ;;  %v8357_v23 = vpack.c.bf16 %v6126_v33, %v6125_v63 }
0x326d   :  { %8328 = vmatpush3.bf16.msra.mxu1 %v8327_v34  ;;  %v6128_v34 = vld [vmem:[%s11271_s19 + $0x28] sm:$0xff] }
0x326e   :  { %8341 = vmatprep.subr.bf16.mxu1 %v9421_v0  ;;  %v8360_v58 = vpack.c.bf16 %v6128_v34, %v6127_v55 }
0x3272   :  { %v5284_v24 = vpop.xlane.xlu0 %5283 }
0x3273   :  { %9021 = vrcp.f32 %v5284_v24  ;;  %v6129_v24 = vld [vmem:[%s11271_s19 + $0x30] sm:$0xff] }
0x3276   :  { %v5281_v40 = vpop.xlane.xlu1 %5280  ;;  %v8712_v56 = vpop.permute.xlu0 %8711 }
0x3277   :  { %9023 = vrcp.f32 %v5281_v40  ;;  %v8714_v42 = vunpack.i.h.bf16 %v8712_v56  ;;  %v8713_v11 = vunpack.i.l.bf16 %v8712_v56  ;;  %v6130_v40 = vld [vmem:[%s11271_s19 + $0x38] sm:$0xff]  ;;  %v6217_v56 = vld [vmem:[%s11273_s21 + $0x28] sm:$0xff] }
0x3278   :  { %v8363_v62 = vpack.c.bf16 %v6130_v40, %v6129_v24 }
0x327d   :  { %v9022_v50 = vpop.eup %9021 }
0x327e   :  { %v5302_v31 = vmul.f32 %v9022_v50, %v11035_v27  ;;  %v8698_v27 = vunpack.i.l.bf16 %v11058_v43  ;;  %v8348_v43 = vpack.c.bf16 %v8714_v42, %v8713_v11 }
0x3280   :  { %7781 = vmatmul.mubr.msk.f32.vlgmr.msra.gmra.mrb[60].mxu1 %vm2073_vm3, %v5302_v31  ;;  %v6214_v31 = vld [vmem:[%s11273_s21 + $0x10] sm:$0xff] }
0x3281   :  { %v9024_v44 = vpop.eup %9023  ;;  %8343 = vmatpush3.bf16.msra.mxu1 %v8342_v21  ;;  %v5287_v49 = vpop.xlane.xlu1 %5286  ;;  %7818 = vmatprep.mubr.msk.f32.mxu1 %vm9422_vm0, %v9423_v1  ;;  %v8366_v21 = vpack.c.bf16 %v6213_v18, %v6212_v52  ;;  %v8369_v46 = vpack.c.bf16 %v6215_v51, %v6214_v31 }
0x3282   :  { %v5300_v7 = vmul.f32 %v9024_v44, %v11039_v4  ;;  %8344 = vmatprep.subr.bf16.mxu1 %v9421_v0  ;;  %9025 = vrcp.f32 %v5287_v49  ;;  %v8333_v4 = vpack.c.bf16 %v8699_v10, %v8698_v27  ;;  %v6216_v44 = vld [vmem:[%s11273_s21 + $0x20] sm:$0xff] }
0x3284   :  { %7762 = vmatmul.mubr.msk.f32.vlgmr.msra.gmra.mrb[54].mxu0 %vm2073_vm3, %v5300_v7  ;;  %v8372_v7 = vpack.c.bf16 %v6217_v56, %v6216_v44 }
0x3285   :  { %8331 = vmatpush3.bf16.msra.mxu0 %v8330_v9  ;;  %7799 = vmatprep.mubr.msk.f32.mxu0 %vm9422_vm0, %v9423_v1  ;;  %v8717_v13 = vpop.permute.xlu1 %8716 }
0x3286   :  { %8346 = vmatpush3.bf16.msra.mxu1 %v8345_v12  ;;  %8332 = vmatprep.subr.bf16.mxu0 %v9421_v0  ;;  %v8719_v8 = vunpack.i.h.bf16 %v8717_v13  ;;  %v8718_v3 = vunpack.i.l.bf16 %v8717_v13 }
0x3287   :  { %8347 = vmatprep.subr.bf16.mxu1 %v9421_v0 }
0x3288   :  { %v8339_v54 = vpack.c.bf16 %v8719_v8, %v8718_v3 }
0x3289   :  { %8334 = vmatpush3.bf16.msra.mxu0 %v8333_v4 }
0x328a   :  { %8349 = vmatpush3.bf16.msra.mxu1 %v8348_v43  ;;  %8335 = vmatprep.subr.bf16.mxu0 %v9421_v0 }
0x328b   :  { %8350 = vmatprep.subr.bf16.mxu1 %v9421_v0 }
0x328c   :  { %v9026_v28 = vpop.eup %9025 }
0x328d   :  { %8337 = vmatpush3.bf16.msra.mxu0 %v8336_v16  ;;  %v5304_v14 = vmul.f32 %v9026_v28, %v11045_v30 }
0x328e   :  { %8338 = vmatprep.subr.bf16.mxu0 %v9421_v0 }
0x3291   :  { %8340 = vmatpush3.bf16.msra.mxu0 %v8339_v54  ;;  %v6218_v54 = vld [vmem:[%s11273_s21 + $0x30] sm:$0xff] }
0x3292   :  { %8353 = vmatprep.subr.bf16.mxu0 %v9421_v0 }
0x3294   :  { %7800 = vmatmul.mubr.msk.f32.vlgmr.msra.gmra.mrb[56].mxu0 %vm2073_vm3, %v5304_v14  ;;  %v6219_v14 = vld [vmem:[%s11273_s21 + $0x38] sm:$0xff] }
0x3295   :  { %7837 = vmatprep.mubr.msk.f32.mxu0 %vm9422_vm0, %v9423_v1  ;;  %8355 = vmatpush3.bf16.msra.mxu0 %v8354_v60 }
0x3296   :  { %8356 = vmatprep.subr.bf16.mxu0 %v9421_v0 }
0x3299   :  { %8358 = vmatpush3.bf16.msra.mxu0 %v8357_v23 }
0x329a   :  { %8359 = vmatprep.subr.bf16.mxu0 %v9421_v0 }
0x329d   :  { %8361 = vmatpush3.bf16.msra.mxu0 %v8360_v58 }
0x329e   :  { %8362 = vmatprep.subr.bf16.mxu0 %v9421_v0 }
0x32a1   :  { %8364 = vmatpush3.bf16.msra.mxu0 %v8363_v62 }
0x32a2   :  { %8377 = vmatprep.subr.bf16.mxu0 %v9421_v0 }
0x32a7   :  { %v5290_v5 = vpop.xlane.xlu0 %5289 }
0x32a8   :  { %9027 = vrcp.f32 %v5290_v5  ;;  %v11139_v57 = vpop.f32.mrb[50].mxu0  ;;  %v8375_v5 = vpack.c.bf16 %v6219_v14, %v6218_v54 }
0x32a9   :  { %v7687_v19 = vpop.f32.mrb[51].mxu0 }
0x32aa   :  { %v6302_v19 = vld [vmem:[%s11275_s23 + $0x8] sm:$0xff] }
0x32ab   :  { %v8722_v39 = vpop.permute.xlu0 %8721 }
0x32ac   :  { %v8724_v47 = vunpack.i.h.bf16 %v8722_v39  ;;  %v8723_v59 = vunpack.i.l.bf16 %v8722_v39 }
0x32ae   :  { %v8351_v17 = vpack.c.bf16 %v8724_v47, %v8723_v59  ;;  %v6666_v47 = vld [vmem:[%s11272_s20] ss:$0 sm:$0xff] }
0x32b0   :  { %8352 = vmatpush3.bf16.msra.mxu1 %v8351_v17 }
0x32b1   :  { %8365 = vmatprep.subr.bf16.mxu1 %v9421_v0 }
0x32b2   :  { %v9028_v30 = vpop.eup %9027 }
0x32b3   :  { %v5306_v20 = vmul.f32 %v9028_v30, %v11054_v2 }
0x32b5   :  { %7819 = vmatmul.mubr.msk.f32.vlgmr.msra.gmra.mrb[62].mxu1 %vm2073_vm3, %v5306_v20 }
0x32b6   :  { %7856 = vmatprep.mubr.msk.f32.mxu1 %vm9422_vm0, %v9423_v1  ;;  %8367 = vmatpush3.bf16.msra.mxu1 %v8366_v21 }
0x32b7   :  { %8368 = vmatprep.subr.bf16.mxu1 %v9421_v0 }
0x32ba   :  { %8370 = vmatpush3.bf16.msra.mxu1 %v8369_v46 }
0x32bb   :  { %8371 = vmatprep.subr.bf16.mxu1 %v9421_v0 }
0x32be   :  { %8373 = vmatpush3.bf16.msra.mxu1 %v8372_v7 }
0x32bf   :  { %8374 = vmatprep.subr.bf16.mxu1 %v9421_v0 }
0x32c2   :  { %8376 = vmatpush3.bf16.msra.mxu1 %v8375_v5 }
0x32c3   :  { %8383 = vmatprep.subr.bf16.mxu1 %v9421_v0 }
0x3313   :  { %v5497_v53 = vpop.f32.mrb[56].mxu1 }
0x3314   :  { %6084 = vrot.lane.b32.xlu1 %v5497_v53, %s9408_s4  ;;  %v7706_v38 = vpop.f32.mrb[57].mxu1  ;;  %v6303_v53 = vld [vmem:[%s11275_s23 + $0x10] sm:$0xff] }
0x3322   :  { %v5594_v61 = vpop.f32.mrb[52].mxu0 }
0x3323   :  { %6088 = vrot.lane.b32.xlu0 %v5594_v61, %s9435_s16  ;;  %v7725_v26 = vpop.f32.mrb[53].mxu0  ;;  %v6668_v61 = vld [vmem:[%s11274_s22] ss:$0 sm:$0xff]  ;;  %s11321_s16 = sld [smem:[#allocation50_spill]] }
0x3333   :  { %v5691_v48 = vpop.f32.mrb[58].mxu1 }
0x3334   :  { %6092 = vrot.lane.b32.xlu1 %v5691_v48, %s9436_s15  ;;  %v7744_v22 = vpop.f32.mrb[59].mxu1 }
0x3353   :  { %v5885_v6 = vpop.f32.mrb[60].mxu1 }
0x3354   :  { %6100 = vrot.lane.b32.xlu1 %v5885_v6, %s9437_s1  ;;  %v7782_v2 = vpop.f32.mrb[61].mxu1  ;;  %v6387_v6 = vld [vmem:[%s11277_s25 + $0x8] sm:$0xff]  ;;  %s11322_s1 = sld [smem:[#allocation51_spill]] }
0x3357   :  { %v5788_v15 = vpop.f32.mrb[54].mxu0 }
0x3358   :  { %6096 = vrot.lane.b32.xlu0 %v5788_v15, %s9425_s29  ;;  %v7763_v29 = vpop.f32.mrb[55].mxu0  ;;  %v6670_v15 = vld [vmem:[%s11321_s16] ss:$0 sm:$0xff] }
0x335a   :  { %v6672_v60 = vld [vmem:[%s11322_s1] ss:$0 sm:$0xff] }
0x3367   :  { %v5982_v41 = vpop.f32.mrb[56].mxu0 }
0x3368   :  { %6104 = vrot.lane.b32.xlu0 %v5982_v41, %s9438_s13  ;;  %v7801_v50 = vpop.f32.mrb[57].mxu0 }
0x3386   :  { %v6085_v10 = vpop.permute.xlu1 %6084 }
0x3387   :  { %v6111_v42 = vsel %vm4498_vm4, %v11139_v57, %v6085_v10  ;;  %v6301_v57 = vld [vmem:[%s11275_s23] sm:$0xff] }
0x3388   :  { %v6079_v49 = vpop.f32.mrb[62].mxu1  ;;  %v8378_v39 = vpack.c.bf16 %v6302_v19, %v6301_v57 }
0x3389   :  { %6108 = vrot.lane.b32.xlu1 %v6079_v49, %s9439_s28  ;;  %v7820_v9 = vpop.f32.mrb[63].mxu1 }
0x3395   :  { %v6089_v27 = vpop.permute.xlu0 %6088 }
0x3396   :  { %v6113_v4 = vsel %vm6112_vm7, %v6111_v42, %v6089_v27 }
0x33a6   :  { %v6093_v12 = vpop.permute.xlu1 %6092 }
0x33a7   :  { %v6115_v32 = vsel %vm6114_vm8, %v6113_v4, %v6093_v12 }
0x33c6   :  { %v6101_v35 = vpop.permute.xlu1 %6100 }
0x33ca   :  { %v6097_v11 = vpop.permute.xlu0 %6096 }
0x33cb   :  { %v6116_v43 = vsel %vm403_vm1, %v6115_v32, %v6097_v11 }
0x33cc   :  { %v6118_v16 = vsel %vm6117_vm9, %v6116_v43, %v6101_v35 }
0x33da   :  { %v6105_v13 = vpop.permute.xlu0 %6104 }
0x33db   :  { %v6120_v8 = vsel %vm6119_vm10, %v6118_v16, %v6105_v13 }
0x33fb   :  { %v6109_v3 = vpop.permute.xlu1 %6108 }
0x33fc   :  { %v6122_v28 = vsel %vm6121_vm11, %v6120_v8, %v6109_v3 }
0x33fd   :  { %7838 = vmatmul.mubr.msk.f32.vlgmr.msra.gmra.mrb[58].mxu0 %vm2073_vm3, %v6122_v28 }
0x33fe   :  { %7867 = vmatprep.mubr.msk.f32.mxu0 %vm9422_vm0, %v9423_v1  ;;  %8379 = vmatpush3.bf16.msra.mxu0 %v8378_v39 }
0x33ff   :  { %8380 = vmatprep.subr.bf16.mxu0 %v9421_v0  ;;  %v6304_v0 = vld [vmem:[%s11275_s23 + $0x18] sm:$0xff] }
0x3400   :  { %v8381_v38 = vpack.c.bf16 %v6304_v0, %v6303_v53 }
0x3402   :  { %8382 = vmatpush3.bf16.msra.mxu0 %v8381_v38 }
0x34d0   :  { %v6207_v59 = vpop.f32.mrb[58].mxu0 }
0x34d1   :  { %v6208_v17 = vadd.f32 %v6666_v47, %v6207_v59  ;;  %v7839_v30 = vpop.f32.mrb[59].mxu0 }
0x34d3   :  { %v6211_v20 = vadd.f32 %v6208_v17, %v10591_v25 }
0x34d5   :  { %7857 = vmatmul.mubr.msk.f32.vlgmr.msra.gmra.mrb[64].mxu1 %vm2073_vm3, %v6211_v20 }
0x34d6   :  { %7874 = vmatprep.mubr.msk.f32.mxu1 %vm9422_vm0, %v9423_v1  ;;  %v6386_v1 = vld [vmem:[%s11277_s25] sm:$0xff] }
0x34d7   :  { %v8384_v2 = vpack.c.bf16 %v6387_v6, %v6386_v1 }
0x34d9   :  { %8385 = vmatpush3.bf16.msra.mxu1 %v8384_v2 }
0x35a8   :  { %v6296_v25 = vpop.f32.mrb[64].mxu1 }
0x35a9   :  { %v6297_v26 = vadd.f32 %v6668_v61, %v6296_v25  ;;  %v7858_v48 = vpop.f32.mrb[65].mxu1 }
0x35ab   :  { %v6300_v22 = vmax.f32 %v6297_v26, 0.0 }
0x35ad   :  { %7868 = vmatmul.mubr.msk.f32.vlgmr.msra.gmra.mrb[60].mxu0 %vm403_vm1, %v6300_v22 }
0x3680   :  { %v6381_v29 = vpop.f32.mrb[60].mxu0 }
0x3681   :  { %v6382_v36 = vadd.f32 %v6670_v15, %v6381_v29  ;;  %v7869_v37 = vpop.f32.mrb[61].mxu0 }
0x3683   :  { %v6385_v63 = vmax.f32 %v6382_v36, 0.0 }
0x3685   :  { %7875 = vmatmul.mubr.msk.f32.vlgmr.msra.gmra.mrb[66].mxu1 %vm6112_vm7, %v6385_v63 }
0x3758   :  { %v6464_v33 = vpop.f32.mrb[66].mxu1 }
0x3759   :  { %v6465_v23 = vadd.f32 %v6672_v60, %v6464_v33  ;;  %v7876_v55 = vpop.f32.mrb[67].mxu1 }
0x375b   :  { %v6674_v34 = vmul.f32 -1.442695, %v6465_v23 }
0x375d   :  { %9029 = vpow2.f32 %v6674_v34 }
0x3767   :  { %v9030_v58 = vpop.eup %9029 }
0x3768   :  { %v6472_v24 = vadd.f32 1.0, %v9030_v58 }
0x376a   :  { %9031 = vrcp.f32 %v6472_v24 }
0x3774   :  { %v9032_v40 = vpop.eup %9031 }
0x3775   :  { %v6475_v62 = vsel %vm6468_vm12, %v6465_v23, %v9032_v40 }
0x3776   :  { %6477 = vst.msk [vmem:[%s11323_s0] sm:$0xff] %vm6476_vm13, %v6475_v62 }
0x3777   :  { %6482 = vsyncpa [#allocation5], 1 }
0x3778   :  { %6483 = vsyncpa [#allocation7], 1 }
0x3779   :  { %6484 = vsyncpa [#allocation10], 1 }
0x377a   :  { %6485 = vsyncpa [#allocation13], 1 }
0x377b   :  { %6486 = vsyncpa [#allocation16], 1 }
0x377c   :  { %6487 = vsyncpa [#allocation19], 1 }
0x377d   :  { %6488 = vsyncpa [#allocation22], 1 }
0x377e   :  { %6489 = vsyncpa [#allocation25], 1 }
0x377f   :  { %6490 = vsyncpa [#allocation28], 1 }

</bundles_post_ra>
